<compile_context>
chip_gen: v5e
topology: v5e:2x2
jax: 0.10.0
libtpu: 0.0.40
codegen_flags: <defaults>
</compile_context>

<pallas_src>
import functools

import jax
import jax.numpy as jnp
from jax import lax
from jax.experimental import pallas as pl
from jax.experimental.pallas import tpu as pltpu

LANE = 128  # TPU lane width


def _round_up(x, m):
    return (x + m - 1) // m * m


# ---------------------------------------------------------------------------
# Fused kernel: QKV projection + causal softmax attention for one batch row.
# ---------------------------------------------------------------------------
def _fused_head_kernel(x_ref, w_ref, o_ref, *, head_size, hp):
    # x_ref: (T, C) bf16   w_ref: (C, 3*Hp) bf16   o_ref: (T, head_size) f32
    # Single lane-dense MXU pass for all three projections (scale already
    # folded into the Wq columns; padded columns are zero and exact).
    qkv = jnp.dot(x_ref[...], w_ref[...],
                  preferred_element_type=jnp.float32)        # (T, 3*Hp) f32

    # 128-lane-aligned splits -> no layout shuffles.
    q = qkv[:, :hp].astype(jnp.bfloat16)                     # (T, Hp)
    k = qkv[:, hp:2 * hp].astype(jnp.bfloat16)               # (T, Hp)
    v = qkv[:, 2 * hp:].astype(jnp.bfloat16)                 # (T, Hp)

    # QK^T with the transpose folded into the contraction (no XLU vxpose).
    s = lax.dot_general(
        q, k,
        dimension_numbers=(((1,), (1,)), ((), ())),
        preferred_element_type=jnp.float32)                  # (T, T) f32

    # Causal mask; large finite negative avoids any -inf arithmetic hazards.
    t = s.shape[0]
    row = lax.broadcasted_iota(jnp.int32, (t, t), 0)
    col = lax.broadcasted_iota(jnp.int32, (t, t), 1)
    s = jnp.where(row >= col, s, jnp.float32(-1e30))

    # Full-row softmax (whole sequence is resident -> no online rescaling).
    m = jnp.max(s, axis=-1, keepdims=True)
    p = jnp.exp(s - m)                                       # f32 softmax math
    l = jnp.sum(p, axis=-1, keepdims=True)
    inv_l = pl.reciprocal(l, approx=True)                    # EUP slot, not VALU

    # TODO(synk): nn.Dropout(0.2) on the attention weights is applied as
    # identity (eval-mode semantics).

    out = jnp.dot(p.astype(jnp.bfloat16), v,
                  preferred_element_type=jnp.float32)        # (T, Hp) f32
    # Normalize on the small (T, head_size) side and store unpadded output.
    o_ref[...] = (out[:, :head_size] * inv_l).astype(o_ref.dtype)


# ---------------------------------------------------------------------------
# Weight preparation (hoisted out of the per-call path; call once).
# ---------------------------------------------------------------------------
def make_qkv_weight(wk, wq, wv):
    """wk/wq/wv: (C, H) f32 -> fused (C, 3*Hp) bf16 weight with scale folded."""
    C, H = wq.shape
    Hp = _round_up(H, LANE)
    scale = jnp.float32(H) ** -0.5
    pad = [(0, 0), (0, Hp - H)]
    wq_p = jnp.pad(wq.astype(jnp.float32) * scale, pad)      # fold 1/sqrt(H)
    wk_p = jnp.pad(wk.astype(jnp.float32), pad)
    wv_p = jnp.pad(wv.astype(jnp.float32), pad)
    return jnp.concatenate([wq_p, wk_p, wv_p], axis=1).astype(jnp.bfloat16)


# ---------------------------------------------------------------------------
# Forward wrapper
# ---------------------------------------------------------------------------
def head_forward(x, w_qkv, head_size):
    """x: (B, T, C) f32; w_qkv: (C, 3*Hp) bf16 (from make_qkv_weight).

    Returns (B, T, head_size) f32.  T is expected <= block_size (256), so one
    full sequence per grid step fits comfortably in VMEM on every generation.
    """
    B, T, C = x.shape
    Hp = w_qkv.shape[1] // 3
    assert w_qkv.shape[0] == C and Hp >= head_size

    kernel = functools.partial(_fused_head_kernel, head_size=head_size, hp=Hp)

    return pl.pallas_call(
        kernel,
        out_shape=jax.ShapeDtypeStruct((B, T, head_size), jnp.float32),
        grid_spec=pltpu.PrefetchScalarGridSpec(
            num_scalar_prefetch=0,
            grid=(B,),
            in_specs=[
                pl.BlockSpec((None, T, C), lambda b: (b, 0, 0)),     # x row
                pl.BlockSpec((C, 3 * Hp), lambda b: (0, 0)),         # resident W
            ],
            out_specs=pl.BlockSpec((None, T, head_size),
                                   lambda b: (b, 0, 0)),
        ),
        compiler_params=pltpu.CompilerParams(
            dimension_semantics=("parallel",)),                      # B across TCs
    )(x.astype(jnp.bfloat16), w_qkv)


def head_forward_from_raw(x, wk, wq, wv):
    """Convenience path mirroring the nn.Module call signature."""
    return head_forward(x, make_qkv_weight(wk, wq, wv), wk.shape[1])


def head_reference(x, wk, wq, wv):
    k = x @ wk
    q = x @ wq
    v = x @ wv
    wei = (q @ jnp.swapaxes(k, -2, -1)) * (k.shape[-1] ** -0.5)
    T = x.shape[1]
    tril = jnp.tril(jnp.ones((T, T), dtype=bool))
    wei = jnp.where(tril, wei, -jnp.inf)
    wei = jax.nn.softmax(wei, axis=-1)
    return wei @ v


if __name__ == "__main__":
    # Shapes consistent with the module: n_embd=384, block_size=256, head_size=64.
    B, T, C, H = 2, 256, 384, 64

    key = jax.random.PRNGKey(0)
    kx, kk, kq, kv = jax.random.split(key, 4)

    x = jax.random.normal(kx, (B, T, C), dtype=jnp.float32)
    # nn.Linear(n_embd, head_size, bias=False) weight is (H, C); stored transposed (C, H)
    bound = 1.0 / (C ** 0.5)
    wk = jax.random.uniform(kk, (C, H), jnp.float32, -bound, bound)
    wq = jax.random.uniform(kq, (C, H), jnp.float32, -bound, bound)
    wv = jax.random.uniform(kv, (C, H), jnp.float32, -bound, bound)

    # Weight prep is done once (hoisted out of the per-forward path).
    w_qkv = jax.block_until_ready(make_qkv_weight(wk, wq, wv))

    out = jax.block_until_ready(head_forward(x, w_qkv, H))
    ref = head_reference(x, wk, wq, wv)

    assert out.shape == (B, T, H)
    # bf16 MXU inputs + approx reciprocal -> compare with bf16-appropriate tolerance.
    assert jnp.allclose(out, ref, atol=3e-2, rtol=3e-2), "mismatch vs reference"

    print("KERNEL_OK")
</pallas_src>

<mosaic_0001>
module attributes {stable_mosaic.version = 11 : i64} {
  func.func @_fused_head_kernel(%arg0: i32, %arg1: memref<1x256x384xbf16, #tpu.memory_space<vmem>>, %arg2: memref<384x384xbf16, #tpu.memory_space<vmem>>, %arg3: memref<1x256x64xf32, #tpu.memory_space<vmem>>) attributes {dimension_semantics = [#tpu.dimension_semantics<parallel>], iteration_bounds = array<i64: 2>, scalar_prefetch = 0 : i64, scratch_operands = 0 : i64, tpu.core_type = #tpu.core_type<tc>, window_params = [{transform_indices = @transform_0, window_bounds = array<i64: 1, 256, 384>}, {pipeline_mode = #tpu.pipeline_mode<synchronous>, transform_indices = @transform_1, window_bounds = array<i64: 384, 384>}, {transform_indices = @transform_2, window_bounds = array<i64: 1, 256, 64>}]} {
    %c0 = arith.constant 0 : index
    %c0_0 = arith.constant 0 : index
    %c0_1 = arith.constant 0 : index
    %0 = vector.load %arg1[%c0, %c0_0, %c0_1] : memref<1x256x384xbf16, #tpu.memory_space<vmem>>, vector<1x256x384xbf16>
    %1 = vector.shape_cast %0 : vector<1x256x384xbf16> to vector<256x384xbf16>
    %c0_2 = arith.constant 0 : index
    %c0_3 = arith.constant 0 : index
    %2 = vector.load %arg2[%c0_2, %c0_3] : memref<384x384xbf16, #tpu.memory_space<vmem>>, vector<384x384xbf16>
    %cst = arith.constant dense<0.000000e+00> : vector<256x384xf32>
    %3 = tpu.matmul %1, %2, %cst {dimension_numbers = #tpu.dot_dimension_numbers<[1], [0], [0], [1], [0, 0, 1, 1], [], []>} : vector<256x384xbf16>, vector<384x384xbf16>, vector<256x384xf32> -> vector<256x384xf32>
    %4 = vector.extract_strided_slice %3 {offsets = [0, 0], sizes = [256, 128], strides = [1, 1]} : vector<256x384xf32> to vector<256x128xf32>
    %5 = arith.truncf %4 : vector<256x128xf32> to vector<256x128xbf16>
    %6 = vector.extract_strided_slice %3 {offsets = [0, 128], sizes = [256, 128], strides = [1, 1]} : vector<256x384xf32> to vector<256x128xf32>
    %7 = arith.truncf %6 : vector<256x128xf32> to vector<256x128xbf16>
    %8 = vector.extract_strided_slice %3 {offsets = [0, 256], sizes = [256, 128], strides = [1, 1]} : vector<256x384xf32> to vector<256x128xf32>
    %9 = arith.truncf %8 : vector<256x128xf32> to vector<256x128xbf16>
    %cst_4 = arith.constant dense<0.000000e+00> : vector<256x256xf32>
    %10 = tpu.matmul %5, %7, %cst_4 {dimension_numbers = #tpu.dot_dimension_numbers<[1], [1], [0], [0], [0, 0, 1, 0], [], []>} : vector<256x128xbf16>, vector<256x128xbf16>, vector<256x256xf32> -> vector<256x256xf32>
    %11 = tpu.iota {dimensions = array<i32: 0>} : vector<256x256xi32>
    %12 = tpu.iota {dimensions = array<i32: 1>} : vector<256x256xi32>
    %13 = arith.cmpi sge, %11, %12 : vector<256x256xi32>
    %cst_5 = arith.constant -1.000000e+30 : f32
    %14 = vector.broadcast %cst_5 : f32 to vector<256x256xf32>
    %15 = arith.select %13, %10, %14 : vector<256x256xi1>, vector<256x256xf32>
    %cst_6 = arith.constant dense<0xFF800000> : vector<256xf32>
    %16 = vector.multi_reduction <maximumf>, %15, %cst_6 [1] : vector<256x256xf32> to vector<256xf32>
    %17 = vector.shape_cast %16 : vector<256xf32> to vector<256x1xf32>
    %18 = vector.broadcast %17 : vector<256x1xf32> to vector<256x256xf32>
    %19 = arith.subf %15, %18 : vector<256x256xf32>
    %20 = math.exp %19 : vector<256x256xf32>
    %cst_7 = arith.constant dense<0.000000e+00> : vector<256xf32>
    %21 = vector.multi_reduction <add>, %20, %cst_7 [1] : vector<256x256xf32> to vector<256xf32>
    %22 = vector.shape_cast %21 : vector<256xf32> to vector<256x1xf32>
    %23 = tpu.reciprocal %22 {approx = true} : vector<256x1xf32> -> vector<256x1xf32>
    %24 = arith.truncf %20 : vector<256x256xf32> to vector<256x256xbf16>
    %cst_8 = arith.constant dense<0.000000e+00> : vector<256x128xf32>
    %25 = tpu.matmul %24, %9, %cst_8 {dimension_numbers = #tpu.dot_dimension_numbers<[1], [0], [0], [1], [0, 0, 1, 1], [], []>} : vector<256x256xbf16>, vector<256x128xbf16>, vector<256x128xf32> -> vector<256x128xf32>
    %26 = vector.extract_strided_slice %25 {offsets = [0, 0], sizes = [256, 64], strides = [1, 1]} : vector<256x128xf32> to vector<256x64xf32>
    %27 = vector.broadcast %23 : vector<256x1xf32> to vector<256x64xf32>
    %28 = arith.mulf %26, %27 : vector<256x64xf32>
    %c0_9 = arith.constant 0 : index
    %c0_10 = arith.constant 0 : index
    %c0_11 = arith.constant 0 : index
    %29 = vector.load %arg3[%c0_9, %c0_10, %c0_11] : memref<1x256x64xf32, #tpu.memory_space<vmem>>, vector<1x256x64xf32>
    %30 = vector.shape_cast %29 : vector<1x256x64xf32> to vector<256x64xf32>
    %31 = vector.shape_cast %28 : vector<256x64xf32> to vector<1x256x64xf32>
    tpu.vector_store %arg3[%c0_9, %c0_10, %c0_11], %31 {strides = array<i32>} : memref<1x256x64xf32, #tpu.memory_space<vmem>>, vector<1x256x64xf32>,
    return
  }
  func.func @transform_0(%arg0: i32) -> (i32, i32, i32) {
    %c0_i32 = arith.constant 0 : i32
    %c0_i32_0 = arith.constant 0 : i32
    %c0_i32_1 = arith.constant 0 : i32
    return %arg0, %c0_i32, %c0_i32_0 : i32, i32, i32
  }
  func.func @transform_1(%arg0: i32) -> (i32, i32) {
    %c0_i32 = arith.constant 0 : i32
    %c0_i32_0 = arith.constant 0 : i32
    %c0_i32_1 = arith.constant 0 : i32
    return %c0_i32, %c0_i32_0 : i32, i32
  }
  func.func @transform_2(%arg0: i32) -> (i32, i32, i32) {
    %c0_i32 = arith.constant 0 : i32
    %c0_i32_0 = arith.constant 0 : i32
    %c0_i32_1 = arith.constant 0 : i32
    return %arg0, %c0_i32, %c0_i32_0 : i32, i32, i32
  }
}

</mosaic_0001>

<bundles_post_ra>
// kernel: tpu_custom_call.1
= control target key start
LH: loop header
LB: loop body
LE: loop exit
PB: predicated region body
PF: predicated region fallthrough
CT: control target
= control target key end

     0   :  { %7 = vsyncpa [#allocation3], 0  ;;  %s5457_s0 = inlined_call_operand.hbm [shape: bf16[2,256,384], index: 0, kind: input, shape index: {}]   ;;  %s5458_s1 = inlined_call_operand.hbm [shape: bf16[384,384], index: 1, kind: input, shape index: {}]   ;;  %s5459_s2 = inlined_call_operand.vmem [shape: f32[2,256,64], index: 2, kind: output, shape index: {}]  }
   0x1   :  { %9 = vsyncpa [#allocation3 + $0x1], 0 }
   0x2   :  { %10 = vsyncpa [#allocation5], 0  ;;  %s3943_s9 = smov 0   ;;  %s3945_s10 = smov 0  }
   0x3   :  { %s3947_s11 = smov 0   ;;  %s3949_s12 = smov 0  }
   0x4 LB: > { %s3962_s13 = sadd.s32 4294967295, %s3923_s12   ;;  %p36_p0 = scmp.ne.s32.totalorder %s3915_s10, %s3911_s9  ;;  %s3923_s12 = sphi %s3949_s12, %s5788_s12   ;;  %s3919_s11 = sphi %s3947_s11, %s5787_s11   ;;  %s3915_s10 = sphi %s3945_s10, %s5786_s10   ;;  %s3911_s9 = sphi %s3943_s9, %s5785_s9  }
   0x5   : > { %p37_p1 = scmp.eq.s32.totalorder %s3962_s13, 0  ;;  %p2943_p2 = scmp.ge.s32.totalorder %s3923_s12, 1 }
   0x6   : > { %p94_p3 = scmp.lt.s32.totalorder %s3923_s12, 3  ;;  %s105_s17 = sshll.u32 %s5458_s1, 4  ;;  %s106_s17 = int_to_ptr.hbm [resolvable:$true] %s105_s17 }
   0x7   : > { %p3970_p4 = por %p37_p1, %p36_p0  ;;  %s3925_s19 = smov [#allocation4]  }
   0x8   : > { %p3977_p5 = pnand %p2943_p2, %p94_p3  ;;  %s107_s20 = sshll.u32 %s3925_s19, 4  ;;  %s108_s20 = int_to_ptr.vmem [resolvable:$true] %s107_s20 }
   0x9   : > { %s3986_s21 = sadd.s32 1, %s3923_s12   ;;  %s3926_s22 = smov 192  }
   0xa   : > { %p3587_p6 = pneg %p3977_p5  ;;  %s3927_s23 = smov 12  }
   0xb   : > { %s20_s24 = ssub.s32 %s3923_s12, %s3986_s21  ;;  %s23_s25 = sadd.s32 1, %s3919_s11 }
   0xc   : > { %p3588_p7 = pnand %p3587_p6, %p37_p1  ;;  %p21_p8 = scmp.eq.s32.totalorder %s20_s24, 0 }
   0xd   : > { %p30_p9 = scmp.ne.s32.totalorder %s3919_s11, %s3915_s10  ;;  %p31_p10 = scmp.eq.s32.totalorder %s3923_s12, 0 }
   0xe   : > { %3590 = dma.hbm_to_vmem [thread:$0]  (!%p3588_p7), %s106_s17, 9216, %s108_s20, [#allocation5], %s3926_s22, %s3926_s22, %s3927_s23  }
   0xf   : > { %p3596_p11 = scmp.lt.s32.totalorder %s3923_s12, 2  ;;  %p32_p12 = por %p31_p10, %p30_p9 }
  0x10   : > { %s3999_s26 = scalar_select %p21_p8, %s3919_s11, %s23_s25  }
  0x11   : > { %s121_s27 = sand.u32 1, %s3919_s11   ;;  %s3579_s29 = smul.u32 384, %s3923_s12 }
  0x12   : > { %s3578_s28 = smul.u32 384, %s121_s27  ;;  %p4003_p13 = pnand %p3596_p11, %p32_p12 }
  0x13   : > { %s130_s5 = scalar_lea.hbm %s5457_s0, %s3579_s29  ;;  %s122_s9 = scalar_lea.sflag [#allocation3], %s121_s27 }
  0x14   : > { %s125_s6 = scalar_lea.vmem [#allocation2], %s3578_s28  ;;  %s131_s8 = sshll.u32 %s130_s5, 4  ;;  %s132_s8 = int_to_ptr.hbm [resolvable:$true] %s131_s8 }
  0x15   : > { %s133_s7 = sshll.u32 %s125_s6, 4  ;;  %s3855_s15 = sshra.s32 %s132_s8, 4  ;;  %s134_s7 = int_to_ptr.vmem [resolvable:$true] %s133_s7  ;;  %s3856_s15 = int_to_ptr.hbm [resolvable:$true] %s3855_s15 }
  0x16   : > { %s3857_s16 = scalar_lea.hbm %s3856_s15, 384  ;;  %p3859_p2 = pneg %p4003_p13 }
  0x17   : > { %p3858_p0 = scmp.ne.s32.totalorder %s3856_s15, %s3857_s16  ;;  %s3862_s19 = scalar_lea.hbm %s5457_s0, 768 }
  0x18   : > { %p3863_p7 = scmp.lt.s32.totalorder %s3856_s15, %s5457_s0  ;;  %p3864_p8 = scmp.lt.s32.totalorder %s3862_s19, %s3857_s16 }
  0x19   : > { %p3860_p3 = pnand %p3859_p2, %p3858_p0 }
  0x1a   : > { %p3865_p9 = por %p3864_p8, %p3863_p7 }
  0x1b   : > { %p3861_p6 = pneg %p3860_p3 }
  0x1d   : > { %p3866_p10 = pnand %p3865_p9, %p3861_p6 }
  0x1f   : > { %3869 = shalt.err (!%p3866_p10)
}
  0x20   : > { %3594 = dma.hbm_to_vmem [thread:$0]  (!%p4003_p13), %s132_s8, 6144, %s134_s7, %s122_s9, %s3926_s22, %s3926_s22, %s3927_s23  }
  0x21   : > { %145 = sbr.rel (%p3977_p5) target bundleno = 1498 (0x5da), region = 28 }
  0x26   : > { %s147_s25 = sand.u32 1, %s3915_s10  }
  0x27   : > { %s3580_s27 = smul.u32 384, %s147_s25  ;;  %s148_s28 = scalar_lea.sflag [#allocation3], %s147_s25 }
  0x29   : > { %s4026_s29 = scalar_lea.vmem [#allocation2], %s3580_s27 }
  0x2a   : > { %3902 = dma.done.wait (%p3970_p4), %s148_s28, 6144  }
  0x2b   : > { %3904 = vsyncadd (%p3970_p4), %s148_s28, 4294961152 }
  0x2c   : > { %3906 = dma.done.wait (%p37_p1), [#allocation5], 9216  }
  0x2d   : > { %3908 = vsyncadd (%p37_p1), [#allocation5], 4294958080  ;;  %v3229_v0 = vld [vmem:[#allocation4 + $0xa8] sm:$0xf]  ;;  %v3504_v1 = vld [vmem:[#allocation4 + $0xb0] sm:$0xf0] }
  0x2e   : > { %v3217_v2 = vld [vmem:[#allocation4 + $0x90] sm:$0xf]  ;;  %v3230_v3 = vor.u32 %v3504_v1, %v3229_v0  ;;  %v3501_v4 = vld [vmem:[#allocation4 + $0x98] sm:$0xf0]  ;;  %v3205_v6 = vld [vmem:[#allocation4 + $0x78] sm:$0xf] }
  0x2f   : > { %v3218_v5 = vor.u32 %v3501_v4, %v3217_v2  ;;  %v3498_v7 = vld [vmem:[#allocation4 + $0x80] sm:$0xf0]  ;;  %v3193_v9 = vld [vmem:[#allocation4 + $0x60] sm:$0xf]  ;;  %v3495_v10 = vld [vmem:[#allocation4 + $0x68] sm:$0xf0] }
  0x30   : > { %3554 = vmatpush.bf16.msra.mxu1 %v3230_v3  ;;  %3555 = vmatpush.bf16.msra.mxu2 %v3230_v3  ;;  %v3206_v8 = vor.u32 %v3498_v7, %v3205_v6  ;;  %v3194_v11 = vor.u32 %v3495_v10, %v3193_v9  ;;  %v3181_v12 = vld [vmem:[#allocation4 + $0x48] sm:$0xf]  ;;  %v3492_v13 = vld [vmem:[#allocation4 + $0x50] sm:$0xf0]  ;;  %v3169_v15 = vld [vmem:[#allocation4 + $0x30] sm:$0xf] }
  0x31   : > { %983 = vmatpush.bf16.msra.mxu0 %v3230_v3  ;;  %3556 = vmatpush.bf16.msra.mxu3 %v3230_v3  ;;  %v3182_v14 = vor.u32 %v3492_v13, %v3181_v12  ;;  %v3489_v16 = vld [vmem:[#allocation4 + $0x38] sm:$0xf0]  ;;  %v3157_v18 = vld [vmem:[#allocation4 + $0x18] sm:$0xf]  ;;  %v3486_v19 = vld [vmem:[#allocation4 + $0x20] sm:$0xf0] }
  0x32   : > { %v3170_v17 = vor.u32 %v3489_v16, %v3169_v15  ;;  %v3158_v20 = vor.u32 %v3486_v19, %v3157_v18  ;;  %v3145_v21 = vld [vmem:[#allocation4] sm:$0xf]  ;;  %v3483_v22 = vld [vmem:[#allocation4 + $0x8] sm:$0xf0]  ;;  %v3325_v30 = vld [vmem:[#allocation4 + $0x168] sm:$0xf] }
  0x33   : > { %v3001_v23 = vld [vmem:[%s4026_s29 + $0x60] sm:$0xf]  ;;  %v3146_v24 = vor.u32 %v3483_v22, %v3145_v21  ;;  %v3447_v25 = vld [vmem:[%s4026_s29 + $0x68] sm:$0xf0]  ;;  %v3528_v31 = vld [vmem:[#allocation4 + $0x170] sm:$0xf0] }
  0x34   : > { %3557 = vmatpush.bf16.msra.mxu1 %v3218_v5  ;;  %3558 = vmatpush.bf16.msra.mxu2 %v3218_v5  ;;  %v3049_v26 = vld [vmem:[%s4026_s29 + $0xc0] sm:$0xf]  ;;  %v3459_v27 = vld [vmem:[%s4026_s29 + $0xc8] sm:$0xf0]  ;;  %v4040_v28 = vor.u32 %v3447_v25, %v3001_v23  ;;  %v3421_v32 = vld [vmem:[#allocation4 + $0x228] sm:$0xf]  ;;  %v3326_v33 = vor.u32 %v3528_v31, %v3325_v30 }
  0x35   : > { %984 = vmatpush.bf16.msra.mxu0 %v3218_v5  ;;  %3559 = vmatpush.bf16.msra.mxu3 %v3218_v5  ;;  %v4042_v29 = vor.u32 %v3459_v27, %v3049_v26  ;;  %v3552_v34 = vld [vmem:[#allocation4 + $0x230] sm:$0xf0]  ;;  %v3313_v36 = vld [vmem:[#allocation4 + $0x150] sm:$0xf]  ;;  %v3525_v37 = vld [vmem:[#allocation4 + $0x158] sm:$0xf0] }
  0x36   : > { %v3422_v35 = vor.u32 %v3552_v34, %v3421_v32  ;;  %v3409_v38 = vld [vmem:[#allocation4 + $0x210] sm:$0xf]  ;;  %v3314_v39 = vor.u32 %v3525_v37, %v3313_v36  ;;  %v3549_v40 = vld [vmem:[#allocation4 + $0x218] sm:$0xf0]  ;;  %v3301_v42 = vld [vmem:[#allocation4 + $0x138] sm:$0xf] }
  0x37   : > { %5522 = vst [vmem:[#allocation8_spill] sm:$0xff] %v4042_v29  ;;  %v3410_v41 = vor.u32 %v3549_v40, %v3409_v38  ;;  %v3522_v43 = vld [vmem:[#allocation4 + $0x140] sm:$0xf0]  ;;  %v3397_v44 = vld [vmem:[#allocation4 + $0x1f8] sm:$0xf]  ;;  %p178_p1 = scmp.lt.s32.totalorder %s3962_s13, 1 }
  0x38   : > { %3560 = vmatpush.bf16.msra.mxu1 %v3206_v8  ;;  %3561 = vmatpush.bf16.msra.mxu2 %v3206_v8  ;;  %v3546_v45 = vld [vmem:[#allocation4 + $0x200] sm:$0xf0]  ;;  %v3097_v46 = vld [vmem:[%s4026_s29 + $0x120] sm:$0xf]  ;;  %v3302_v47 = vor.u32 %v3522_v43, %v3301_v42  ;;  %v3471_v48 = vld [vmem:[%s4026_s29 + $0x128] sm:$0xf0] }
  0x39   : > { %985 = vmatpush.bf16.msra.mxu0 %v3206_v8  ;;  %3562 = vmatpush.bf16.msra.mxu3 %v3206_v8  ;;  %v3398_v49 = vor.u32 %v3546_v45, %v3397_v44  ;;  %v3289_v50 = vld [vmem:[#allocation4 + $0x120] sm:$0xf]  ;;  %v3519_v51 = vld [vmem:[#allocation4 + $0x128] sm:$0xf0]  ;;  %v4048_v52 = vor.u32 %v3471_v48, %v3097_v46  ;;  %v3013_v55 = vld [vmem:[%s4026_s29 + $0x78] sm:$0xf] }
  0x3a   : > { %v3385_v53 = vld [vmem:[#allocation4 + $0x1e0] sm:$0xf]  ;;  %v3543_v54 = vld [vmem:[#allocation4 + $0x1e8] sm:$0xf0]  ;;  %v3450_v56 = vld [vmem:[%s4026_s29 + $0x80] sm:$0xf0]  ;;  %v3290_v59 = vor.u32 %v3519_v51, %v3289_v50 }
  0x3b   : > { %5523 = vst [vmem:[#allocation9_spill] sm:$0xff] %v4048_v52  ;;  %v3061_v57 = vld [vmem:[%s4026_s29 + $0xd8] sm:$0xf]  ;;  %v3462_v58 = vld [vmem:[%s4026_s29 + $0xe0] sm:$0xf0]  ;;  %v3386_v60 = vor.u32 %v3543_v54, %v3385_v53  ;;  %v4059_v0 = vor.u32 %v3450_v56, %v3013_v55  ;;  %s5790_s13 = smov (!%p178_p1, %s3962_s13), 1 }
  0x3c   : > { %3563 = vmatpush.bf16.msra.mxu1 %v3194_v11  ;;  %3564 = vmatpush.bf16.msra.mxu2 %v3194_v11  ;;  %v2953_v61 = vld [vmem:[%s4026_s29] sm:$0xf]  ;;  %v3435_v62 = vld [vmem:[%s4026_s29 + $0x8] sm:$0xf0]  ;;  %v4061_v1 = vor.u32 %v3462_v58, %v3061_v57  ;;  %v3277_v2 = vld [vmem:[#allocation4 + $0x108] sm:$0xf] }
  0x3d   : > { %986 = vmatpush.bf16.msra.mxu0 %v3194_v11  ;;  %3565 = vmatpush.bf16.msra.mxu3 %v3194_v11  ;;  %v4057_v63 = vor.u32 %v3435_v62, %v2953_v61  ;;  %5524 = vst [vmem:[#allocation10_spill] sm:$0xff] %v4059_v0  ;;  %v3516_v3 = vld [vmem:[#allocation4 + $0x110] sm:$0xf0]  ;;  %v3373_v4 = vld [vmem:[#allocation4 + $0x1c8] sm:$0xf]  ;;  %s3433_s14 = sshll.u32 %s5790_s13, 8 }
  0x3e   : > { %5525 = vst [vmem:[#allocation11_spill] sm:$0xff] %v4061_v1  ;;  %v3278_v5 = vor.u32 %v3516_v3, %v3277_v2  ;;  %v3540_v6 = vld [vmem:[#allocation4 + $0x1d0] sm:$0xf0]  ;;  %v3265_v8 = vld [vmem:[#allocation4 + $0xf0] sm:$0xf]  ;;  %s5343_s23 = scalar_lea.vmem %s5459_s2, %s3433_s14 }
  0x3f   : > { %v3374_v7 = vor.u32 %v3540_v6, %v3373_v4  ;;  %v3513_v9 = vld [vmem:[#allocation4 + $0xf8] sm:$0xf0]  ;;  %v3361_v10 = vld [vmem:[#allocation4 + $0x1b0] sm:$0xf]  ;;  %v3510_v15 = vld [vmem:[#allocation4 + $0xe0] sm:$0xf0] }
  0x40   : > { %3566 = vmatpush.bf16.msra.mxu1 %v3182_v14  ;;  %3567 = vmatpush.bf16.msra.mxu2 %v3182_v14  ;;  %v3266_v11 = vor.u32 %v3513_v9, %v3265_v8  ;;  %v3537_v12 = vld [vmem:[#allocation4 + $0x1b8] sm:$0xf0]  ;;  %v3349_v16 = vld [vmem:[#allocation4 + $0x198] sm:$0xf]  ;;  %v3241_v22 = vld [vmem:[#allocation4 + $0xc0] sm:$0xf] }
  0x41   : > { %987 = vmatpush.bf16.msra.mxu0 %v3182_v14  ;;  %3568 = vmatpush.bf16.msra.mxu3 %v3182_v14  ;;  %v3362_v13 = vor.u32 %v3537_v12, %v3361_v10  ;;  %v3253_v14 = vld [vmem:[#allocation4 + $0xd8] sm:$0xf]  ;;  %v3507_v23 = vld [vmem:[#allocation4 + $0xc8] sm:$0xf0]  ;;  %v3337_v25 = vld [vmem:[#allocation4 + $0x180] sm:$0xf] }
  0x42   : > { %v3109_v18 = vld [vmem:[%s4026_s29 + $0x138] sm:$0xf]  ;;  %v3254_v19 = vor.u32 %v3510_v15, %v3253_v14  ;;  %v3531_v26 = vld [vmem:[#allocation4 + $0x188] sm:$0xf0]  ;;  %v3025_v27 = vld [vmem:[%s4026_s29 + $0x90] sm:$0xf] }
  0x43   : > { %v3453_v30 = vld [vmem:[%s4026_s29 + $0x98] sm:$0xf0]  ;;  %v3073_v31 = vld [vmem:[%s4026_s29 + $0xf0] sm:$0xf]  ;;  %v3338_v34 = vor.u32 %v3531_v26, %v3337_v25  ;;  %v3438_v36 = vld [vmem:[%s4026_s29 + $0x20] sm:$0xf0] }
  0x44   : > { %3569 = vmatpush.bf16.msra.mxu1 %v3170_v17  ;;  %3570 = vmatpush.bf16.msra.mxu2 %v3170_v17  ;;  %v3465_v32 = vld [vmem:[%s4026_s29 + $0xf8] sm:$0xf0]  ;;  %v4079_v38 = vor.u32 %v3453_v30, %v3025_v27  ;;  %v3121_v40 = vld [vmem:[%s4026_s29 + $0x150] sm:$0xf]  ;;  %v3503_v42 = vld [vmem:[#allocation4 + $0xac] sm:$0xf] }
  0x45   : > { %988 = vmatpush.bf16.msra.mxu0 %v3170_v17  ;;  %3571 = vmatpush.bf16.msra.mxu3 %v3170_v17  ;;  %v3534_v17 = vld [vmem:[#allocation4 + $0x1a0] sm:$0xf0]  ;;  %v3231_v43 = vld [vmem:[#allocation4 + $0xb4] sm:$0xf0]  ;;  %v3500_v46 = vld [vmem:[#allocation4 + $0x94] sm:$0xf] }
  0x46   : > { %v3350_v21 = vor.u32 %v3534_v17, %v3349_v16  ;;  %5526 = vst [vmem:[#allocation12_spill] sm:$0xff] %v4079_v38  ;;  %v3234_v45 = vor.u32 %v3503_v42, %v3231_v43  ;;  %v3037_v48 = vld [vmem:[%s4026_s29 + $0xa8] sm:$0xf]  ;;  %v3456_v50 = vld [vmem:[%s4026_s29 + $0xb0] sm:$0xf0] }
  0x47   : > { %v3085_v51 = vld [vmem:[%s4026_s29 + $0x108] sm:$0xf]  ;;  %v3468_v53 = vld [vmem:[%s4026_s29 + $0x110] sm:$0xf0]  ;;  %v2977_v54 = vld [vmem:[%s4026_s29 + $0x30] sm:$0xf] }
  0x48   : > { %3572 = vmatpush.bf16.msra.mxu1 %v3158_v20  ;;  %3573 = vmatpush.bf16.msra.mxu2 %v3158_v20  ;;  %v3441_v55 = vld [vmem:[%s4026_s29 + $0x38] sm:$0xf0]  ;;  %v3207_v58 = vld [vmem:[#allocation4 + $0x84] sm:$0xf0]  ;;  %v4101_v61 = vor.u32 %v3468_v53, %v3085_v51  ;;  %v3327_v2 = vld [vmem:[#allocation4 + $0x174] sm:$0xf0] }
  0x49   : > { %989 = vmatpush.bf16.msra.mxu0 %v3158_v20  ;;  %3574 = vmatpush.bf16.msra.mxu3 %v3158_v20  ;;  %v3474_v20 = vld [vmem:[%s4026_s29 + $0x140] sm:$0xf0]  ;;  %v4097_v56 = vor.u32 %v3441_v55, %v2977_v54  ;;  %v3497_v57 = vld [vmem:[#allocation4 + $0x7c] sm:$0xf]  ;;  %v3524_v6 = vld [vmem:[#allocation4 + $0x154] sm:$0xf] }
  0x4a   : > { %5530 = vst [vmem:[#allocation16_spill] sm:$0xff] %v4101_v61  ;;  %v3210_v62 = vor.u32 %v3497_v57, %v3207_v58  ;;  %v3494_v4 = vld [vmem:[#allocation4 + $0x64] sm:$0xf]  ;;  %v3315_v8 = vld [vmem:[#allocation4 + $0x15c] sm:$0xf0] }
  0x4b   : > { %v3318_v9 = vor.u32 %v3524_v6, %v3315_v8  ;;  %v3133_v10 = vld [vmem:[%s4026_s29 + $0x168] sm:$0xf]  ;;  %v3491_v12 = vld [vmem:[#allocation4 + $0x4c] sm:$0xf]  ;;  %v3521_v14 = vld [vmem:[#allocation4 + $0x13c] sm:$0xf] }
  0x4c   : > { %3575 = vmatpush.bf16.msra.mxu1 %v3146_v24  ;;  %3576 = vmatpush.bf16.msra.mxu2 %v3146_v24  ;;  %v3303_v17 = vld [vmem:[#allocation4 + $0x144] sm:$0xf0]  ;;  %v3291_v25 = vld [vmem:[#allocation4 + $0x12c] sm:$0xf0]  ;;  %v3436_v30 = vld [vmem:[%s4026_s29 + $0x10] sm:$0xf0] }
  0x4d   : > { %990 = vmatpush.bf16.msra.mxu0 %v3146_v24  ;;  %3577 = vmatpush.bf16.msra.mxu3 %v3146_v24  ;;  %v4068_v24 = vor.u32 %v3474_v20, %v3109_v18  ;;  %v3306_v18 = vor.u32 %v3521_v14, %v3303_v17  ;;  %v3171_v20 = vld [vmem:[#allocation4 + $0x3c] sm:$0xf0]  ;;  %v2955_v26 = vld [vmem:[%s4026_s29 + $0xc] sm:$0xf0]  ;;  %v2961_v27 = vld [vmem:[%s4026_s29 + $0x8] sm:$0xf] }
  0x4e   : > { %v4121_v42 = vor.u32 %v3436_v30, %v2961_v27  ;;  %v3267_v51 = vld [vmem:[#allocation4 + $0xfc] sm:$0xf0]  ;;  %v3509_v54 = vld [vmem:[#allocation4 + $0xdc] sm:$0xf]  ;;  %v3255_v55 = vld [vmem:[#allocation4 + $0xe4] sm:$0xf0] }
  0x4f   : > { %1011 = vmatmul.bf16.vlgmr.msra.gmra.mxu1 %v4040_v28  ;;  %1031 = vmatmul.bf16.vlgmr.msra.gmra.mxu2 %v4042_v29  ;;  %v3258_v57 = vor.u32 %v3509_v54, %v3255_v55  ;;  %v3506_v58 = vld [vmem:[#allocation4 + $0xc4] sm:$0xf]  ;;  %v3440_v8 = vld [vmem:[%s4026_s29 + $0x34] sm:$0xf]  ;;  %v3443_v14 = vld [vmem:[%s4026_s29 + $0x4c] sm:$0xf] }
  0x50   : > { %1072 = vmatpush.bf16.msrb.mxu1 %v3326_v33  ;;  %1161 = vmatpush.bf16.msrb.mxu2 %v3422_v35  ;;  %v3242_v33 = vor.u32 %v3507_v23, %v3241_v22  ;;  %v2965_v35 = vld [vmem:[%s4026_s29 + $0x18] sm:$0xf]  ;;  %v3434_v22 = vld [vmem:[%s4026_s29 + $0x4] sm:$0xf]  ;;  %v2997_v17 = vld [vmem:[%s4026_s29 + $0x50] sm:$0xf] }
  0x51   : > { %1051 = vmatmul.bf16.vlgmr.msra.gmra.mxu3 %v4048_v52  ;;  %991 = vmatmul.bf16.vlgmr.msra.gmra.mxu0 %v4057_v63  ;;  %v4077_v37 = vor.u32 %v3438_v36, %v2965_v35  ;;  %v3485_v35 = vld [vmem:[#allocation4 + $0x1c] sm:$0xf]  ;;  %v3159_v36 = vld [vmem:[#allocation4 + $0x24] sm:$0xf0]  ;;  %v3452_v55 = vld [vmem:[%s4026_s29 + $0x94] sm:$0xf] }
  0x52   : > { %1250 = vmatpush.bf16.msrb.mxu3 %v3234_v45  ;;  %v3162_v43 = vor.u32 %v3485_v35, %v3159_v36  ;;  %v3279_v45 = vld [vmem:[#allocation4 + $0x114] sm:$0xf0]  ;;  %v3015_v35 = vld [vmem:[%s4026_s29 + $0x84] sm:$0xf0]  ;;  %v3021_v36 = vld [vmem:[%s4026_s29 + $0x80] sm:$0xf] }
  0x54   : > { %1073 = vmatpush.bf16.msrb.mxu1 %v3314_v39  ;;  %1162 = vmatpush.bf16.msrb.mxu2 %v3410_v41  ;;  %v4081_v39 = vor.u32 %v3465_v32, %v3073_v31  ;;  %v3477_v41 = vld [vmem:[%s4026_s29 + $0x158] sm:$0xf0]  ;;  %v2989_v32 = vld [vmem:[%s4026_s29 + $0x48] sm:$0xf] }
  0x55   : > { %v4088_v44 = vor.u32 %v3477_v41, %v3121_v40  ;;  %v3515_v40 = vld [vmem:[#allocation4 + $0x10c] sm:$0xf]  ;;  %v4119_v41 = vor.u32 %v3434_v22, %v2955_v26  ;;  %v3003_v22 = vld [vmem:[%s4026_s29 + $0x6c] sm:$0xf0] }
  0x56   : > { %5527 = vst [vmem:[#allocation13_spill] sm:$0xff] %v4081_v39 }
  0x57   : > { %5528 = vst [vmem:[#allocation14_spill] sm:$0xff] %v4088_v44 }
  0x58   : > { %1074 = vmatpush.bf16.msrb.mxu1 %v3302_v47  ;;  %1163 = vmatpush.bf16.msrb.mxu2 %v3398_v49  ;;  %v3219_v47 = vld [vmem:[#allocation4 + $0x9c] sm:$0xf0] }
  0x59   : > { %v3222_v49 = vor.u32 %v3500_v46, %v3219_v47  ;;  %v3282_v46 = vor.u32 %v3515_v40, %v3279_v45  ;;  %v3482_v47 = vld [vmem:[#allocation4 + $0x4] sm:$0xf]  ;;  %v3451_v40 = vld [vmem:[%s4026_s29 + $0x88] sm:$0xf0] }
  0x5b   : > { %1251 = vmatpush.bf16.msrb.mxu3 %v3222_v49  ;;  %v3512_v49 = vld [vmem:[#allocation4 + $0xf4] sm:$0xf] }
  0x5c   : > { %1075 = vmatpush.bf16.msrb.mxu1 %v3290_v59  ;;  %1164 = vmatpush.bf16.msrb.mxu2 %v3386_v60  ;;  %v3527_v59 = vld [vmem:[#allocation4 + $0x16c] sm:$0xf]  ;;  %v4099_v60 = vor.u32 %v3456_v50, %v3037_v48  ;;  %v3147_v48 = vld [vmem:[#allocation4 + $0xc] sm:$0xf0]  ;;  %v3270_v53 = vor.u32 %v3512_v49, %v3267_v51 }
  0x5d   : > { %v3330_v3 = vor.u32 %v3527_v59, %v3327_v2  ;;  %v3150_v50 = vor.u32 %v3482_v47, %v3147_v48  ;;  %v3243_v59 = vld [vmem:[#allocation4 + $0xcc] sm:$0xf0]  ;;  %v4191_v48 = vor.u32 %v3451_v40, %v3021_v36 }
  0x5e   : > { %5529 = vst [vmem:[#allocation15_spill] sm:$0xff] %v4099_v60  ;;  %v3246_v2 = vor.u32 %v3506_v58, %v3243_v59  ;;  %v3033_v58 = vld [vmem:[%s4026_s29 + $0x98] sm:$0xf]  ;;  %v3454_v59 = vld [vmem:[%s4026_s29 + $0xa0] sm:$0xf0] }
  0x5f   : > { %1016 = vmatmul.bf16.gmra.mxu1 %v4059_v0  ;;  %1036 = vmatmul.bf16.gmra.mxu2 %v4061_v1  ;;  %5532 = vst [vmem:[#allocation18_spill] sm:$0xff] %v4191_v48 }
  0x60   : > { %1076 = vmatpush.bf16.msrb.mxu1 %v3278_v5  ;;  %1165 = vmatpush.bf16.msrb.mxu2 %v3374_v7  ;;  %v3195_v5 = vld [vmem:[#allocation4 + $0x6c] sm:$0xf0] }
  0x61   : > { %1056 = vmatmul.bf16.gmra.mxu3 %v4068_v24  ;;  %996 = vmatmul.bf16.gmra.mxu0 %v4077_v37  ;;  %v3198_v7 = vor.u32 %v3494_v4, %v3195_v5  ;;  %v2973_v4 = vld [vmem:[%s4026_s29 + $0x20] sm:$0xf]  ;;  %v3439_v5 = vld [vmem:[%s4026_s29 + $0x28] sm:$0xf0] }
  0x62   : > { %1252 = vmatpush.bf16.msrb.mxu3 %v3210_v62  ;;  %1339 = vmatpush.bf16.msrb.mxu0 %v3330_v3  ;;  %v3437_v62 = vld [vmem:[%s4026_s29 + $0x1c] sm:$0xf]  ;;  %v2967_v3 = vld [vmem:[%s4026_s29 + $0x24] sm:$0xf0] }
  0x63   : > { %v4131_v6 = vor.u32 %v3437_v62, %v2967_v3 }
  0x64   : > { %1077 = vmatpush.bf16.msrb.mxu1 %v3266_v11  ;;  %1166 = vmatpush.bf16.msrb.mxu2 %v3362_v13  ;;  %v3480_v11 = vld [vmem:[%s4026_s29 + $0x170] sm:$0xf0]  ;;  %v3183_v13 = vld [vmem:[#allocation4 + $0x54] sm:$0xf0] }
  0x65   : > { %v4108_v15 = vor.u32 %v3480_v11, %v3133_v10  ;;  %v3186_v16 = vor.u32 %v3491_v12, %v3183_v13  ;;  %v2985_v10 = vld [vmem:[%s4026_s29 + $0x38] sm:$0xf]  ;;  %v3442_v11 = vld [vmem:[%s4026_s29 + $0x40] sm:$0xf0] }
  0x66   : > { %1253 = vmatpush.bf16.msrb.mxu3 %v3198_v7  ;;  %1340 = vmatpush.bf16.msrb.mxu0 %v3318_v9  ;;  %v4133_v7 = vor.u32 %v3439_v5, %v2973_v4  ;;  %v2979_v9 = vld [vmem:[%s4026_s29 + $0x3c] sm:$0xf0]  ;;  %v4145_v13 = vor.u32 %v3442_v11, %v2985_v10  ;;  %v4217_v5 = vor.u32 %v3454_v59, %v3033_v58  ;;  %v3458_v59 = vld [vmem:[%s4026_s29 + $0xc4] sm:$0xf] }
  0x67   : > { %v4143_v12 = vor.u32 %v3440_v8, %v2979_v9 }
  0x68   : > { %1078 = vmatpush.bf16.msrb.mxu1 %v3254_v19  ;;  %1167 = vmatpush.bf16.msrb.mxu2 %v3350_v21  ;;  %v3488_v19 = vld [vmem:[#allocation4 + $0x34] sm:$0xf]  ;;  %v3518_v21 = vld [vmem:[#allocation4 + $0x124] sm:$0xf]  ;;  %5535 = vst [vmem:[#allocation21_spill] sm:$0xff] %v4217_v5 }
  0x69   : > { %v3174_v23 = vor.u32 %v3488_v19, %v3171_v20  ;;  %v3294_v31 = vor.u32 %v3518_v21, %v3291_v25  ;;  %v3446_v21 = vld [vmem:[%s4026_s29 + $0x64] sm:$0xf]  ;;  %v3448_v25 = vld [vmem:[%s4026_s29 + $0x70] sm:$0xf0] }
  0x6a   : > { %1254 = vmatpush.bf16.msrb.mxu3 %v3186_v16  ;;  %1341 = vmatpush.bf16.msrb.mxu0 %v3306_v18  ;;  %v2991_v16 = vld [vmem:[%s4026_s29 + $0x54] sm:$0xf0]  ;;  %v3445_v18 = vld [vmem:[%s4026_s29 + $0x58] sm:$0xf0]  ;;  %v4167_v26 = vor.u32 %v3446_v21, %v3003_v22 }
  0x6b   : > { %v4155_v19 = vor.u32 %v3443_v14, %v2991_v16  ;;  %v4157_v20 = vor.u32 %v3445_v18, %v2997_v17  ;;  %v3455_v16 = vld [vmem:[%s4026_s29 + $0xac] sm:$0xf]  ;;  %v3039_v17 = vld [vmem:[%s4026_s29 + $0xb4] sm:$0xf0]  ;;  %v3045_v18 = vld [vmem:[%s4026_s29 + $0xb0] sm:$0xf] }
  0x6c   : > { %1079 = vmatpush.bf16.msrb.mxu1 %v3242_v33  ;;  %1168 = vmatpush.bf16.msrb.mxu2 %v3338_v34  ;;  %v3444_v33 = vld [vmem:[%s4026_s29 + $0x50] sm:$0xf0]  ;;  %v3457_v21 = vld [vmem:[%s4026_s29 + $0xb8] sm:$0xf0] }
  0x6d   : > { %v4117_v34 = vor.u32 %v3444_v33, %v2989_v32  ;;  %v3449_v33 = vld [vmem:[%s4026_s29 + $0x7c] sm:$0xf] }
  0x6e   : > { %1255 = vmatpush.bf16.msrb.mxu3 %v3174_v23  ;;  %1342 = vmatpush.bf16.msrb.mxu0 %v3294_v31  ;;  %v3009_v23 = vld [vmem:[%s4026_s29 + $0x68] sm:$0xf]  ;;  %v4189_v47 = vor.u32 %v3449_v33, %v3015_v35  ;;  %v4243_v33 = vor.u32 %v3455_v16, %v3039_v17  ;;  %v4245_v35 = vor.u32 %v3457_v21, %v3045_v18  ;;  %v3051_v16 = vld [vmem:[%s4026_s29 + $0xcc] sm:$0xf0]  ;;  %v3460_v18 = vld [vmem:[%s4026_s29 + $0xd0] sm:$0xf0] }
  0x6f   : > { %1021 = vmatmul.bf16.gmra.mxu1 %v4079_v38  ;;  %1041 = vmatmul.bf16.gmra.mxu2 %v4081_v39  ;;  %v4169_v27 = vor.u32 %v3448_v25, %v3009_v23  ;;  %v3057_v17 = vld [vmem:[%s4026_s29 + $0xc8] sm:$0xf] }
  0x70   : > { %5531 = vst [vmem:[#allocation17_spill] sm:$0xff] %v4189_v47 }
  0x71   : > { %1061 = vmatmul.bf16.gmra.mxu3 %v4088_v44  ;;  %1001 = vmatmul.bf16.gmra.mxu0 %v4097_v56  ;;  %5538 = vst [vmem:[#allocation24_spill] sm:$0xff] %v4243_v33 }
  0x72   : > { %1256 = vmatpush.bf16.msrb.mxu3 %v3162_v43  ;;  %1343 = vmatpush.bf16.msrb.mxu0 %v3282_v46  ;;  %5539 = vst [vmem:[#allocation25_spill] sm:$0xff] %v4245_v35 }
  0x76   : > { %1257 = vmatpush.bf16.msrb.mxu3 %v3150_v50  ;;  %1344 = vmatpush.bf16.msrb.mxu0 %v3270_v53 }
  0x7a   : > { %1345 = vmatpush.bf16.msrb.mxu0 %v3258_v57  ;;  %v3027_v57 = vld [vmem:[%s4026_s29 + $0x9c] sm:$0xf0] }
  0x7b   : > { %v4215_v4 = vor.u32 %v3452_v55, %v3027_v57 }
  0x7d   : > { %5534 = vst [vmem:[#allocation20_spill] sm:$0xff] %v4215_v4 }
  0x7e   : > { %1346 = vmatpush.bf16.msrb.mxu0 %v3246_v2 }
  0x7f   : > { %1026 = vmatmul.bf16.gmra.mxu1 %v4099_v60  ;;  %1046 = vmatmul.bf16.gmra.mxu2 %v4101_v61 }
  0x81   : > { %1066 = vmatmul.bf16.gmra.mxu3 %v4108_v15  ;;  %1006 = vmatmul.bf16.gmra.mxu0 %v4117_v34 }
  0x8f   : > { %1080 = vmatmul.bf16.vlgmr.msrb.gmra.mxu1 %v4119_v41  ;;  %1169 = vmatmul.bf16.vlgmr.msrb.gmra.mxu2 %v4121_v42 }
  0x91   : > { %1258 = vmatmul.bf16.vlgmr.msrb.gmra.mxu3 %v4057_v63  ;;  %1347 = vmatmul.bf16.vlgmr.msrb.gmra.mxu0 %v4119_v41 }
  0x9f   : > { %1085 = vmatmul.bf16.gmra.mxu1 %v4131_v6  ;;  %1174 = vmatmul.bf16.gmra.mxu2 %v4133_v7 }
  0xa1   : > { %1263 = vmatmul.bf16.gmra.mxu3 %v4077_v37  ;;  %1352 = vmatmul.bf16.gmra.mxu0 %v4131_v6 }
  0xaf   : > { %1090 = vmatmul.bf16.gmra.mxu1 %v4143_v12  ;;  %1179 = vmatmul.bf16.gmra.mxu2 %v4145_v13 }
  0xb1   : > { %1268 = vmatmul.bf16.gmra.mxu3 %v4097_v56  ;;  %1357 = vmatmul.bf16.gmra.mxu0 %v4143_v12 }
  0xbf   : > { %1095 = vmatmul.bf16.gmra.mxu1 %v4155_v19  ;;  %1184 = vmatmul.bf16.gmra.mxu2 %v4157_v20 }
  0xc1   : > { %1273 = vmatmul.bf16.gmra.mxu3 %v4117_v34  ;;  %1362 = vmatmul.bf16.gmra.mxu0 %v4155_v19 }
  0xcc   : > { %v4171_v30 = vpop.f32.mrf.mxu1 }
  0xce   : > { %v992_v43 = vpop.f32.mrf.mxu0 }
  0xcf   : > { %1100 = vmatmul.bf16.gmra.mxu1 %v4167_v26  ;;  %1189 = vmatmul.bf16.gmra.mxu2 %v4169_v27 }
  0xd1   : > { %1278 = vmatmul.bf16.gmra.mxu3 %v4040_v28  ;;  %1367 = vmatmul.bf16.gmra.mxu0 %v4167_v26 }
  0xd2   : > { %v4176_v31 = vpop.f32.mrf.mxu2 }
  0xd4   : > { %v4178_v32 = vpop.f32.mrf.mxu1  ;;  %v4187_v46 = vpop.f32.mrf.mxu3 }
  0xd6   : > { %v994_v50 = vpop.f32.mrf.mxu0 }
  0xda   : > { %v4185_v45 = vpop.f32.mrf.mxu2 }
  0xdc   : > { %v4193_v49 = vpop.f32.mrf.mxu1  ;;  %v4200_v53 = vpop.f32.mrf.mxu3 }
  0xde   : > { %v4209_v62 = vpop.f32.mrf.mxu0 }
  0xdf   : > { %1105 = vmatmul.bf16.gmra.mxu1 %v4189_v47  ;;  %1194 = vmatmul.bf16.gmra.mxu2 %v4191_v48 }
  0xe1   : > { %1283 = vmatmul.bf16.gmra.mxu3 %v4059_v0  ;;  %1372 = vmatmul.bf16.gmra.mxu0 %v4189_v47  ;;  %v3461_v0 = vld [vmem:[%s4026_s29 + $0xdc] sm:$0xf] }
  0xe2   : > { %v4198_v51 = vpop.f32.mrf.mxu2 }
  0xe4   : > { %v4202_v54 = vpop.f32.mrf.mxu1  ;;  %v4213_v3 = vpop.f32.mrf.mxu3 }
  0xe5   : > { %5533 = vst [vmem:[#allocation19_spill] sm:$0xff] %v4213_v3 }
  0xe6   : > { %v4224_v9 = vpop.f32.mrf.mxu0 }
  0xea   : > { %v4211_v2 = vpop.f32.mrf.mxu2 }
  0xec   : > { %v4219_v8 = vpop.f32.mrf.mxu1  ;;  %v4228_v11 = vpop.f32.mrf.mxu3 }
  0xed   : > { %5536 = vst [vmem:[#allocation22_spill] sm:$0xff] %v4228_v11 }
  0xee   : > { %v4237_v22 = vpop.f32.mrf.mxu0 }
  0xef   : > { %1110 = vmatmul.bf16.gmra.mxu1 %v4215_v4  ;;  %1199 = vmatmul.bf16.gmra.mxu2 %v4217_v5 }
  0xf1   : > { %1288 = vmatmul.bf16.gmra.mxu3 %v4079_v38  ;;  %1377 = vmatmul.bf16.gmra.mxu0 %v4215_v4  ;;  %v4271_v38 = vor.u32 %v3458_v59, %v3051_v16 }
  0xf2   : > { %v4226_v10 = vpop.f32.mrf.mxu2 }
  0xf3   : > { %5542 = vst [vmem:[#allocation28_spill] sm:$0xff] %v4271_v38 }
  0xf4   : > { %v4230_v14 = vpop.f32.mrf.mxu1  ;;  %v4241_v25 = vpop.f32.mrf.mxu3 }
  0xf5   : > { %5537 = vst [vmem:[#allocation23_spill] sm:$0xff] %v4241_v25 }
  0xf6   : > { %v4252_v40 = vpop.f32.mrf.mxu0 }
  0xfa   : > { %v4239_v23 = vpop.f32.mrf.mxu2 }
  0xfc   : > { %v4247_v36 = vpop.f32.mrf.mxu1  ;;  %v4256_v57 = vpop.f32.mrf.mxu3 }
  0xfd   : > { %5540 = vst [vmem:[#allocation26_spill] sm:$0xff] %v4256_v57  ;;  %v4273_v57 = vor.u32 %v3460_v18, %v3057_v17  ;;  %v3063_v17 = vld [vmem:[%s4026_s29 + $0xe4] sm:$0xf0]  ;;  %v3069_v18 = vld [vmem:[%s4026_s29 + $0xe0] sm:$0xf] }
  0xfe   : > { %v4265_v21 = vpop.f32.mrf.mxu0 }
  0xff   : > { %1115 = vmatmul.bf16.gmra.mxu1 %v4243_v33  ;;  %1204 = vmatmul.bf16.gmra.mxu2 %v4245_v35  ;;  %5543 = vst [vmem:[#allocation29_spill] sm:$0xff] %v4273_v57 }
 0x101   : > { %1293 = vmatmul.bf16.gmra.mxu3 %v4099_v60  ;;  %1382 = vmatmul.bf16.gmra.mxu0 %v4243_v33 }
 0x102   : > { %v4254_v55 = vpop.f32.mrf.mxu2 }
 0x104   : > { %v4258_v58 = vpop.f32.mrf.mxu1  ;;  %v4269_v35 = vpop.f32.mrf.mxu3 }
 0x105   : > { %5541 = vst [vmem:[#allocation27_spill] sm:$0xff] %v4269_v35 }
 0x106   : > { %v4278_v60 = vpop.f32.mrf.mxu0 }
 0x10a   : > { %v4267_v4 = vpop.f32.mrf.mxu2 }
 0x10c   : > { %v1081_v25 = vpop.f32.mrf.mxu1  ;;  %v4280_v47 = vpop.f32.mrf.mxu3 }
 0x10d   : > { %v1082_v5 = vadd.f32 %v1081_v25, %v992_v43  ;;  %5544 = vst [vmem:[#allocation30_spill] sm:$0xff] %v4280_v47  ;;  %v3463_v43 = vld [vmem:[%s4026_s29 + $0xe8] sm:$0xf0] }
 0x10e   : > { %v4291_v48 = vor.u32 %v3463_v43, %v3069_v18  ;;  %v4293_v47 = vpop.f32.mrf.mxu0 }
 0x10f   : > { %1120 = vmatmul.bf16.gmra.mxu1 %v4271_v38  ;;  %1209 = vmatmul.bf16.gmra.mxu2 %v4273_v57  ;;  %v4289_v57 = vor.u32 %v3461_v0, %v3063_v17 }
 0x110   : > { %5546 = vst [vmem:[#allocation32_spill] sm:$0xff] %v4291_v48 }
 0x111   : > { %1298 = vmatmul.bf16.gmra.mxu3 %v4042_v29  ;;  %5545 = vst [vmem:[#allocation31_spill] sm:$0xff] %v4289_v57  ;;  %1387 = vmatmul.bf16.gmra.mxu0 %v4271_v38 }
 0x112   : > { %v1170_v11 = vpop.f32.mrf.mxu2 }
 0x113   : > { %v1171_v35 = vadd.f32 %v1170_v11, %v1082_v5 }
 0x114   : > { %v1083_v59 = vpop.f32.mrf.mxu1  ;;  %v4287_v33 = vpop.f32.mrf.mxu3 }
 0x115   : > { %v1084_v16 = vadd.f32 %v1083_v59, %v994_v50 }
 0x116   : > { %v4303_v17 = vpop.f32.mrf.mxu0 }
 0x117   : > { %5548 = vst [vmem:[#allocation34_spill] sm:$0xff] %v4303_v17 }
 0x11a   : > { %v1172_v25 = vpop.f32.mrf.mxu2 }
 0x11b   : > { %v1173_v3 = vadd.f32 %v1172_v25, %v1084_v16  ;;  %v3464_v25 = vld [vmem:[%s4026_s29 + $0xf4] sm:$0xf] }
 0x11c   : > { %v1086_v50 = vpop.f32.mrf.mxu1  ;;  %v4301_v59 = vpop.f32.mrf.mxu3 }
 0x11d   : > { %v4295_v5 = vpack.c.bf16 %v1173_v3, %v1171_v35  ;;  %v1087_v11 = vadd.f32 %v1086_v50, %v4209_v62  ;;  %v3075_v3 = vld [vmem:[%s4026_s29 + $0xfc] sm:$0xf0]  ;;  %v3081_v62 = vld [vmem:[%s4026_s29 + $0xf8] sm:$0xf]  ;;  %v3466_v35 = vld [vmem:[%s4026_s29 + $0x100] sm:$0xf0] }
 0x11e   : > { %v4315_v29 = vor.u32 %v3466_v35, %v3081_v62 }
 0x11f   : > { %5547 = vst [vmem:[#allocation33_spill] sm:$0xff] %v4295_v5  ;;  %1125 = vmatmul.bf16.gmra.mxu1 %v4289_v57  ;;  %1214 = vmatmul.bf16.gmra.mxu2 %v4291_v48  ;;  %v4313_v48 = vor.u32 %v3464_v25, %v3075_v3 }
 0x120   : > { %5550 = vst [vmem:[#allocation36_spill] sm:$0xff] %v4315_v29 }
 0x121   : > { %1303 = vmatmul.bf16.gmra.mxu3 %v4061_v1  ;;  %5549 = vst [vmem:[#allocation35_spill] sm:$0xff] %v4313_v48  ;;  %1392 = vmatmul.bf16.gmra.mxu0 %v4289_v57  ;;  %v3469_v57 = vld [vmem:[%s4026_s29 + $0x118] sm:$0xf0] }
 0x122   : > { %v1175_v0 = vpop.f32.mrf.mxu2 }
 0x123   : > { %v1176_v16 = vadd.f32 %v1175_v0, %v1087_v11  ;;  %v4317_v11 = vpop.f32.mrf.mxu0 }
 0x124   : > { %v1088_v18 = vpop.f32.mrf.mxu1  ;;  %v4311_v5 = vpop.f32.mrf.mxu3 }
 0x125   : > { %v1089_v43 = vadd.f32 %v1088_v18, %v4224_v9  ;;  %v3551_v18 = vld [vmem:[#allocation4 + $0x22c] sm:$0xf] }
 0x12a   : > { %v1177_v50 = vpop.f32.mrf.mxu2 }
 0x12b   : > { %v1178_v38 = vadd.f32 %v1177_v50, %v1089_v43  ;;  %v3423_v43 = vld [vmem:[#allocation4 + $0x234] sm:$0xf0]  ;;  %v3467_v50 = vld [vmem:[%s4026_s29 + $0x10c] sm:$0xf] }
 0x12c   : > { %v1091_v0 = vpop.f32.mrf.mxu1  ;;  %v3426_v25 = vor.u32 %v3551_v18, %v3423_v43  ;;  %v4325_v62 = vpop.f32.mrf.mxu3 }
 0x12d   : > { %v4319_v17 = vpack.c.bf16 %v1178_v38, %v1176_v16  ;;  %v1092_v9 = vadd.f32 %v1091_v0, %v4237_v22  ;;  %v4327_v16 = vpop.f32.mrf.mxu0  ;;  %v3087_v0 = vld [vmem:[%s4026_s29 + $0x114] sm:$0xf0] }
 0x12e   : > { %1428 = vmatpush.bf16.msra.mxu1 %v3426_v25  ;;  %v4337_v43 = vor.u32 %v3467_v50, %v3087_v0 }
 0x12f   : > { %5551 = vst [vmem:[#allocation37_spill] sm:$0xff] %v4319_v17  ;;  %1130 = vmatmul.bf16.gmra.mxu1 %v4313_v48  ;;  %1219 = vmatmul.bf16.gmra.mxu2 %v4315_v29  ;;  %v3093_v17 = vld [vmem:[%s4026_s29 + $0x110] sm:$0xf] }
 0x130   : > { %5552 = vst [vmem:[#allocation38_spill] sm:$0xff] %v4337_v43  ;;  %v4339_v25 = vor.u32 %v3469_v57, %v3093_v17 }
 0x131   : > { %1308 = vmatmul.bf16.gmra.mxu3 %v4081_v39  ;;  %1397 = vmatmul.bf16.gmra.mxu0 %v4313_v48  ;;  %v3470_v39 = vld [vmem:[%s4026_s29 + $0x124] sm:$0xf] }
 0x132   : > { %v1180_v3 = vpop.f32.mrf.mxu2  ;;  %5553 = vst [vmem:[#allocation39_spill] sm:$0xff] %v4339_v25 }
 0x133   : > { %v1181_v38 = vadd.f32 %v1180_v3, %v1092_v9 }
 0x134   : > { %v1093_v22 = vpop.f32.mrf.mxu1  ;;  %v4335_v1 = vpop.f32.mrf.mxu3 }
 0x135   : > { %v1094_v35 = vadd.f32 %v1093_v22, %v4252_v40  ;;  %v4341_v9 = vpop.f32.mrf.mxu0 }
 0x136   : > { %5554 = vst [vmem:[#allocation40_spill] sm:$0xff] %v4341_v9 }
 0x13a   : > { %v1182_v29 = vpop.f32.mrf.mxu2 }
 0x13b   : > { %v1183_v18 = vadd.f32 %v1182_v29, %v1094_v35 }
 0x13c   : > { %v1096_v40 = vpop.f32.mrf.mxu1  ;;  %v4349_v35 = vpop.f32.mrf.mxu3 }
 0x13d   : > { %v4343_v3 = vpack.c.bf16 %v1183_v18, %v1181_v38  ;;  %v1097_v22 = vadd.f32 %v1096_v40, %v4265_v21  ;;  %5556 = vst [vmem:[#allocation42_spill] sm:$0xff] %v4349_v35  ;;  %v4351_v17 = vpop.f32.mrf.mxu0  ;;  %v3099_v38 = vld [vmem:[%s4026_s29 + $0x12c] sm:$0xf0]  ;;  %v3105_v21 = vld [vmem:[%s4026_s29 + $0x128] sm:$0xf] }
 0x13e   : > { %5557 = vst [vmem:[#allocation43_spill] sm:$0xff] %v4351_v17  ;;  %v3472_v18 = vld [vmem:[%s4026_s29 + $0x130] sm:$0xf0]  ;;  %v3375_v35 = vld [vmem:[#allocation4 + $0x1d4] sm:$0xf0] }
 0x13f   : > { %5555 = vst [vmem:[#allocation41_spill] sm:$0xff] %v4343_v3  ;;  %1135 = vmatmul.bf16.gmra.mxu1 %v4337_v43  ;;  %1224 = vmatmul.bf16.gmra.mxu2 %v4339_v25  ;;  %v4361_v25 = vor.u32 %v3470_v39, %v3099_v38  ;;  %v4363_v9 = vor.u32 %v3472_v18, %v3105_v21 }
 0x141   : > { %1313 = vmatmul.bf16.gmra.mxu3 %v4101_v61  ;;  %5559 = vst [vmem:[#allocation45_spill] sm:$0xff] %v4363_v9  ;;  %1402 = vmatmul.bf16.gmra.mxu0 %v4337_v43  ;;  %v3111_v61 = vld [vmem:[%s4026_s29 + $0x144] sm:$0xf0] }
 0x142   : > { %v1185_v29 = vpop.f32.mrf.mxu2 }
 0x143   : > { %v1186_v57 = vadd.f32 %v1185_v29, %v1097_v22 }
 0x144   : > { %v1098_v50 = vpop.f32.mrf.mxu1  ;;  %v4359_v3 = vpop.f32.mrf.mxu3 }
 0x145   : > { %v1099_v0 = vadd.f32 %v1098_v50, %v4278_v60  ;;  %5558 = vst [vmem:[#allocation44_spill] sm:$0xff] %v4359_v3  ;;  %v4365_v22 = vpop.f32.mrf.mxu0  ;;  %v3548_v60 = vld [vmem:[#allocation4 + $0x214] sm:$0xf]  ;;  %v3411_v50 = vld [vmem:[#allocation4 + $0x21c] sm:$0xf0] }
 0x146   : > { %5560 = vst [vmem:[#allocation46_spill] sm:$0xff] %v4365_v22  ;;  %v3414_v39 = vor.u32 %v3548_v60, %v3411_v50  ;;  %v3117_v22 = vld [vmem:[%s4026_s29 + $0x140] sm:$0xf]  ;;  %v3475_v3 = vld [vmem:[%s4026_s29 + $0x148] sm:$0xf0] }
 0x147   : > { %v3387_v60 = vld [vmem:[#allocation4 + $0x1ec] sm:$0xf0] }
 0x148   : > { %1429 = vmatpush.bf16.msra.mxu1 %v3414_v39 }
 0x14a   : > { %v1187_v40 = vpop.f32.mrf.mxu2 }
 0x14b   : > { %v1188_v48 = vadd.f32 %v1187_v40, %v1099_v0  ;;  %v3545_v40 = vld [vmem:[#allocation4 + $0x1fc] sm:$0xf] }
 0x14c   : > { %v1101_v29 = vpop.f32.mrf.mxu1  ;;  %v4373_v21 = vpop.f32.mrf.mxu3 }
 0x14d   : > { %v4367_v17 = vpack.c.bf16 %v1188_v48, %v1186_v57  ;;  %v1102_v0 = vadd.f32 %v1101_v29, %v4171_v30  ;;  %5562 = vst [vmem:[#allocation48_spill] sm:$0xff] %v4373_v21  ;;  %v4375_v57 = vpop.f32.mrf.mxu0  ;;  %v3542_v29 = vld [vmem:[#allocation4 + $0x1e4] sm:$0xf]  ;;  %v4387_v21 = vor.u32 %v3475_v3, %v3117_v22  ;;  %v3363_v3 = vld [vmem:[#allocation4 + $0x1bc] sm:$0xf0] }
 0x14e   : > { %5563 = vst [vmem:[#allocation49_spill] sm:$0xff] %v4375_v57  ;;  %v3390_v39 = vor.u32 %v3542_v29, %v3387_v60  ;;  %v3533_v60 = vld [vmem:[#allocation4 + $0x19c] sm:$0xf] }
 0x14f   : > { %5561 = vst [vmem:[#allocation47_spill] sm:$0xff] %v4367_v17  ;;  %1140 = vmatmul.bf16.gmra.mxu1 %v4361_v25  ;;  %1229 = vmatmul.bf16.gmra.mxu2 %v4363_v9  ;;  %v3399_v17 = vld [vmem:[#allocation4 + $0x204] sm:$0xf0]  ;;  %v3473_v9 = vld [vmem:[%s4026_s29 + $0x13c] sm:$0xf] }
 0x150   : > { %v3402_v43 = vor.u32 %v3545_v40, %v3399_v17  ;;  %v4385_v57 = vor.u32 %v3473_v9, %v3111_v61  ;;  %v3536_v9 = vld [vmem:[#allocation4 + $0x1b4] sm:$0xf] }
 0x151   : > { %1318 = vmatmul.bf16.gmra.mxu3 %v4048_v52  ;;  %1407 = vmatmul.bf16.gmra.mxu0 %v4361_v25 }
 0x152   : > { %v1190_v38 = vpop.f32.mrf.mxu2  ;;  %1430 = vmatpush.bf16.msra.mxu1 %v3402_v43  ;;  %5565 = vst [vmem:[#allocation51_spill] sm:$0xff] %v4385_v57  ;;  %v3539_v43 = vld [vmem:[#allocation4 + $0x1cc] sm:$0xf] }
 0x153   : > { %v1191_v48 = vadd.f32 %v1190_v38, %v1102_v0 }
 0x154   : > { %v1103_v18 = vpop.f32.mrf.mxu1  ;;  %v4383_v0 = vpop.f32.mrf.mxu3 }
 0x155   : > { %v1104_v30 = vadd.f32 %v1103_v18, %v4178_v32  ;;  %5564 = vst [vmem:[#allocation50_spill] sm:$0xff] %v4383_v0  ;;  %v4389_v17 = vpop.f32.mrf.mxu0  ;;  %v3378_v32 = vor.u32 %v3539_v43, %v3375_v35  ;;  %v3478_v43 = vld [vmem:[%s4026_s29 + $0x160] sm:$0xf0] }
 0x156   : > { %5566 = vst [vmem:[#allocation52_spill] sm:$0xff] %v4389_v17  ;;  %1431 = vmatpush.bf16.msra.mxu1 %v3390_v39  ;;  %v3526_v0 = vld [vmem:[#allocation4 + $0x160] sm:$0xf0] }
 0x15a   : > { %v1192_v50 = vpop.f32.mrf.mxu2  ;;  %1432 = vmatpush.bf16.msra.mxu1 %v3378_v32 }
 0x15b   : > { %v1193_v38 = vadd.f32 %v1192_v50, %v1104_v30  ;;  %v3351_v50 = vld [vmem:[#allocation4 + $0x1a4] sm:$0xf0] }
 0x15c   : > { %v1106_v40 = vpop.f32.mrf.mxu1  ;;  %v4397_v18 = vpop.f32.mrf.mxu3  ;;  %v3354_v39 = vor.u32 %v3533_v60, %v3351_v50 }
 0x15d   : > { %v4391_v52 = vpack.c.bf16 %v1193_v38, %v1191_v48  ;;  %v1107_v61 = vadd.f32 %v1106_v40, %v4193_v49  ;;  %v3366_v48 = vor.u32 %v3536_v9, %v3363_v3  ;;  %5568 = vst [vmem:[#allocation54_spill] sm:$0xff] %v4397_v18  ;;  %v4399_v29 = vpop.f32.mrf.mxu0  ;;  %v3476_v38 = vld [vmem:[%s4026_s29 + $0x154] sm:$0xf]  ;;  %v3123_v49 = vld [vmem:[%s4026_s29 + $0x15c] sm:$0xf0] }
 0x15e   : > { %5569 = vst [vmem:[#allocation55_spill] sm:$0xff] %v4399_v29  ;;  %v3129_v40 = vld [vmem:[%s4026_s29 + $0x158] sm:$0xf]  ;;  %v3530_v9 = vld [vmem:[#allocation4 + $0x184] sm:$0xf] }
 0x15f   : > { %5567 = vst [vmem:[#allocation53_spill] sm:$0xff] %v4391_v52  ;;  %1145 = vmatmul.bf16.gmra.mxu1 %v4385_v57  ;;  %1234 = vmatmul.bf16.gmra.mxu2 %v4387_v21  ;;  %v3339_v3 = vld [vmem:[#allocation4 + $0x18c] sm:$0xf0]  ;;  %v4411_v18 = vor.u32 %v3478_v43, %v3129_v40  ;;  %v3529_v43 = vld [vmem:[#allocation4 + $0x178] sm:$0xf0] }
 0x160   : > { %1433 = vmatpush.bf16.msra.mxu1 %v3366_v48  ;;  %v4409_v48 = vor.u32 %v3476_v38, %v3123_v49  ;;  %v3505_v38 = vld [vmem:[#allocation4 + $0xb8] sm:$0xf0]  ;;  %v3333_v49 = vld [vmem:[#allocation4 + $0x170] sm:$0xf] }
 0x161   : > { %1323 = vmatmul.bf16.gmra.mxu3 %v4068_v24  ;;  %5571 = vst [vmem:[#allocation57_spill] sm:$0xff] %v4411_v18  ;;  %1412 = vmatmul.bf16.gmra.mxu0 %v4385_v57 }
 0x162   : > { %v1195_v22 = vpop.f32.mrf.mxu2 }
 0x163   : > { %v1196_v30 = vadd.f32 %v1195_v22, %v1107_v61  ;;  %v3342_v61 = vor.u32 %v3530_v9, %v3339_v3  ;;  %v3334_v9 = vor.u32 %v3529_v43, %v3333_v49  ;;  %v3502_v3 = vld [vmem:[#allocation4 + $0xa0] sm:$0xf0]  ;;  %v3213_v49 = vld [vmem:[#allocation4 + $0x80] sm:$0xf] }
 0x164   : > { %v1108_v35 = vpop.f32.mrf.mxu1  ;;  %1434 = vmatpush.bf16.msra.mxu1 %v3354_v39  ;;  %v4407_v22 = vpop.f32.mrf.mxu3  ;;  %v3237_v39 = vld [vmem:[#allocation4 + $0xb0] sm:$0xf]  ;;  %v3309_v43 = vld [vmem:[#allocation4 + $0x140] sm:$0xf] }
 0x165   : > { %v1109_v32 = vadd.f32 %v1108_v35, %v4202_v54  ;;  %5570 = vst [vmem:[#allocation56_spill] sm:$0xff] %v4407_v22  ;;  %v4413_v60 = vpop.f32.mrf.mxu0  ;;  %1606 = vmatpush.bf16.msra.mxu3 %v3334_v9 }
 0x166   : > { %5572 = vst [vmem:[#allocation58_spill] sm:$0xff] %v4413_v60 }
 0x168   : > { %1435 = vmatpush.bf16.msra.mxu1 %v3342_v61  ;;  %v3321_v61 = vld [vmem:[#allocation4 + $0x158] sm:$0xf] }
 0x169   : > { %v3322_v60 = vor.u32 %v3526_v0, %v3321_v61  ;;  %v3429_v0 = vld [vmem:[#allocation4 + $0x230] sm:$0xf]  ;;  %v3553_v61 = vld [vmem:[#allocation4 + $0x238] sm:$0xf0] }
 0x16a   : > { %v1197_v52 = vpop.f32.mrf.mxu2 }
 0x16b   : > { %v1198_v29 = vadd.f32 %v1197_v52, %v1109_v32  ;;  %1607 = vmatpush.bf16.msra.mxu3 %v3322_v60  ;;  %v3201_v60 = vld [vmem:[#allocation4 + $0x68] sm:$0xf] }
 0x16c   : > { %v1111_v50 = vpop.f32.mrf.mxu1  ;;  %v4421_v52 = vpop.f32.mrf.mxu3 }
 0x16d   : > { %v4415_v17 = vpack.c.bf16 %v1198_v29, %v1196_v30  ;;  %v1112_v54 = vadd.f32 %v1111_v50, %v4219_v8  ;;  %5574 = vst [vmem:[#allocation60_spill] sm:$0xff] %v4421_v52  ;;  %v4423_v30 = vpop.f32.mrf.mxu0  ;;  %v3238_v29 = vor.u32 %v3505_v38, %v3237_v39  ;;  %v3225_v8 = vld [vmem:[#allocation4 + $0x98] sm:$0xf]  ;;  %v3479_v50 = vld [vmem:[%s4026_s29 + $0x16c] sm:$0xf] }
 0x16e   : > { %5575 = vst [vmem:[#allocation61_spill] sm:$0xff] %v4423_v30  ;;  %v3135_v52 = vld [vmem:[%s4026_s29 + $0x174] sm:$0xf0] }
 0x16f   : > { %5573 = vst [vmem:[#allocation59_spill] sm:$0xff] %v4415_v17  ;;  %1150 = vmatmul.bf16.gmra.mxu1 %v4409_v48  ;;  %1239 = vmatmul.bf16.gmra.mxu2 %v4411_v18  ;;  %v3226_v17 = vor.u32 %v3502_v3, %v3225_v8  ;;  %v4433_v22 = vor.u32 %v3479_v50, %v3135_v52  ;;  %v3523_v18 = vld [vmem:[#allocation4 + $0x148] sm:$0xf0]  ;;  %v3496_v52 = vld [vmem:[#allocation4 + $0x70] sm:$0xf0] }
 0x170   : > { %1517 = vmatpush.bf16.msra.mxu2 %v3238_v29  ;;  %v3499_v29 = vld [vmem:[#allocation4 + $0x88] sm:$0xf0]  ;;  %v3202_v50 = vor.u32 %v3496_v52, %v3201_v60  ;;  %v3517_v60 = vld [vmem:[#allocation4 + $0x118] sm:$0xf0]  ;;  %v3405_v52 = vld [vmem:[#allocation4 + $0x200] sm:$0xf] }
 0x171   : > { %1328 = vmatmul.bf16.gmra.mxu3 %v4088_v44  ;;  %v3214_v3 = vor.u32 %v3499_v29, %v3213_v49  ;;  %1417 = vmatmul.bf16.gmra.mxu0 %v4409_v48 }
 0x172   : > { %v1200_v35 = vpop.f32.mrf.mxu2 }
 0x173   : > { %v1201_v40 = vadd.f32 %v1200_v35, %v1112_v54  ;;  %v3141_v54 = vld [vmem:[%s4026_s29 + $0x170] sm:$0xf]  ;;  %v3481_v35 = vld [vmem:[%s4026_s29 + $0x178] sm:$0xf0] }
 0x174   : > { %v1113_v32 = vpop.f32.mrf.mxu1  ;;  %1518 = vmatpush.bf16.msra.mxu2 %v3226_v17  ;;  %v4431_v38 = vpop.f32.mrf.mxu3  ;;  %v4435_v44 = vor.u32 %v3481_v35, %v3141_v54  ;;  %v3310_v17 = vor.u32 %v3523_v18, %v3309_v43  ;;  %v3520_v54 = vld [vmem:[#allocation4 + $0x130] sm:$0xf0]  ;;  %v3417_v35 = vld [vmem:[#allocation4 + $0x218] sm:$0xf] }
 0x175   : > { %v1114_v30 = vadd.f32 %v1113_v32, %v4230_v14  ;;  %v4437_v8 = vpop.f32.mrf.mxu0  ;;  %v3430_v32 = vor.u32 %v3553_v61, %v3429_v0  ;;  %v3285_v0 = vld [vmem:[#allocation4 + $0x110] sm:$0xf] }
 0x176   : > { %1608 = vmatpush.bf16.msra.mxu3 %v3310_v17 }
 0x177   : > { %1695 = vmatpush.bf16.msra.mxu0 %v3430_v32 }
 0x178   : > { %1519 = vmatpush.bf16.msra.mxu2 %v3214_v3  ;;  %v3493_v3 = vld [vmem:[#allocation4 + $0x58] sm:$0xf0] }
 0x17a   : > { %v1202_v39 = vpop.f32.mrf.mxu2 }
 0x17b   : > { %v1203_v9 = vadd.f32 %v1202_v39, %v1114_v30  ;;  %v3297_v30 = vld [vmem:[#allocation4 + $0x128] sm:$0xf]  ;;  %v3550_v39 = vld [vmem:[#allocation4 + $0x220] sm:$0xf0] }
 0x17c   : > { %v1116_v14 = vpop.f32.mrf.mxu1  ;;  %v3298_v18 = vor.u32 %v3520_v54, %v3297_v30  ;;  %v3418_v49 = vor.u32 %v3550_v39, %v3417_v35  ;;  %1520 = vmatpush.bf16.msra.mxu2 %v3202_v50  ;;  %v4445_v43 = vpop.f32.mrf.mxu3  ;;  %v3286_v54 = vor.u32 %v3517_v60, %v3285_v0  ;;  %v3273_v50 = vld [vmem:[#allocation4 + $0xf8] sm:$0xf]  ;;  %v3261_v60 = vld [vmem:[#allocation4 + $0xe0] sm:$0xf] }
 0x17d   : > { %v4439_v57 = vpack.c.bf16 %v1203_v9, %v1201_v40  ;;  %v1117_v40 = vadd.f32 %v1116_v14, %v4247_v36  ;;  %5577 = vst [vmem:[#allocation63_spill] sm:$0xff] %v4445_v43  ;;  %v3189_v9 = vld [vmem:[#allocation4 + $0x50] sm:$0xf]  ;;  %v4447_v17 = vpop.f32.mrf.mxu0  ;;  %v3177_v36 = vld [vmem:[#allocation4 + $0x38] sm:$0xf] }
 0x17e   : > { %1609 = vmatpush.bf16.msra.mxu3 %v3298_v18  ;;  %1696 = vmatpush.bf16.msra.mxu0 %v3418_v49  ;;  %5578 = vst [vmem:[#allocation64_spill] sm:$0xff] %v4447_v17  ;;  %v3190_v32 = vor.u32 %v3493_v3, %v3189_v9  ;;  %v3490_v14 = vld [vmem:[#allocation4 + $0x40] sm:$0xf0]  ;;  %v3393_v49 = vld [vmem:[#allocation4 + $0x1e8] sm:$0xf] }
 0x17f   : > { %5576 = vst [vmem:[#allocation62_spill] sm:$0xff] %v4439_v57  ;;  %1155 = vmatmul.bf16.gmra.mxu1 %v4433_v22  ;;  %1244 = vmatmul.bf16.gmra.mxu2 %v4435_v44  ;;  %v3547_v57 = vld [vmem:[#allocation4 + $0x208] sm:$0xf0]  ;;  %v3178_v39 = vor.u32 %v3490_v14, %v3177_v36  ;;  %v3514_v18 = vld [vmem:[#allocation4 + $0x100] sm:$0xf0] }
 0x180   : > { %v3406_v35 = vor.u32 %v3547_v57, %v3405_v52  ;;  %1521 = vmatpush.bf16.msra.mxu2 %v3190_v32  ;;  %v3165_v57 = vld [vmem:[#allocation4 + $0x20] sm:$0xf]  ;;  %v3487_v32 = vld [vmem:[#allocation4 + $0x28] sm:$0xf0]  ;;  %v3381_v14 = vld [vmem:[#allocation4 + $0x1d0] sm:$0xf] }
 0x181   : > { %1333 = vmatmul.bf16.gmra.mxu3 %v4108_v15  ;;  %v3511_v36 = vld [vmem:[#allocation4 + $0xe8] sm:$0xf0]  ;;  %v3541_v43 = vld [vmem:[#allocation4 + $0x1d8] sm:$0xf0]  ;;  %1422 = vmatmul.bf16.gmra.mxu0 %v4433_v22 }
 0x182   : > { %v1205_v29 = vpop.f32.mrf.mxu2  ;;  %1610 = vmatpush.bf16.msra.mxu3 %v3286_v54  ;;  %1697 = vmatpush.bf16.msra.mxu0 %v3406_v35  ;;  %v3166_v35 = vor.u32 %v3487_v32, %v3165_v57 }
 0x183   : > { %v1206_v61 = vadd.f32 %v1205_v29, %v1117_v40  ;;  %v3544_v40 = vld [vmem:[#allocation4 + $0x1f0] sm:$0xf0]  ;;  %v3274_v29 = vor.u32 %v3514_v18, %v3273_v50  ;;  %v3262_v18 = vor.u32 %v3511_v36, %v3261_v60 }
 0x184   : > { %v1118_v30 = vpop.f32.mrf.mxu1  ;;  %v3394_v9 = vor.u32 %v3544_v40, %v3393_v49  ;;  %1522 = vmatpush.bf16.msra.mxu2 %v3178_v39  ;;  %v4451_v0 = vpop.f32.mrf.mxu3  ;;  %v3382_v49 = vor.u32 %v3541_v43, %v3381_v14  ;;  %v3484_v39 = vld [vmem:[#allocation4 + $0x10] sm:$0xf0]  ;;  %v3249_v40 = vld [vmem:[#allocation4 + $0xc8] sm:$0xf] }
 0x185   : > { %v1119_v3 = vadd.f32 %v1118_v30, %v4258_v58  ;;  %v4453_v54 = vpop.f32.mrf.mxu0  ;;  %v3153_v30 = vld [vmem:[#allocation4 + $0x8] sm:$0xf] }
 0x186   : > { %1611 = vmatpush.bf16.msra.mxu3 %v3274_v29  ;;  %1698 = vmatpush.bf16.msra.mxu0 %v3394_v9  ;;  %v3508_v29 = vld [vmem:[#allocation4 + $0xd0] sm:$0xf0]  ;;  %v3369_v9 = vld [vmem:[#allocation4 + $0x1b8] sm:$0xf] }
 0x187   : > { %v3250_v57 = vor.u32 %v3508_v29, %v3249_v40 }
 0x188   : > { %1523 = vmatpush.bf16.msra.mxu2 %v3166_v35  ;;  %v3535_v35 = vld [vmem:[#allocation4 + $0x1a8] sm:$0xf0] }
 0x18a   : > { %v1207_v17 = vpop.f32.mrf.mxu2  ;;  %1612 = vmatpush.bf16.msra.mxu3 %v3262_v18  ;;  %1699 = vmatpush.bf16.msra.mxu0 %v3382_v49 }
 0x18b   : > { %v1208_v52 = vadd.f32 %v1207_v17, %v1119_v3  ;;  %v3154_v17 = vor.u32 %v3484_v39, %v3153_v30  ;;  %v3538_v3 = vld [vmem:[#allocation4 + $0x1c0] sm:$0xf0]  ;;  %v3345_v30 = vld [vmem:[#allocation4 + $0x188] sm:$0xf]  ;;  %v3532_v39 = vld [vmem:[#allocation4 + $0x190] sm:$0xf0] }
 0x18c   : > { %v1121_v50 = vpop.f32.mrf.mxu1  ;;  %v3370_v32 = vor.u32 %v3538_v3, %v3369_v9  ;;  %v4460_v60 = vpop.f32.mrf.mxu3 }
 0x18d   : > { %v4455_v58 = vpack.c.bf16 %v1208_v52, %v1206_v61  ;;  %v1122_v43 = vadd.f32 %v1121_v50, %v4176_v31  ;;  %1524 = vmatpush.bf16.msra.mxu2 %v3154_v17  ;;  %v3357_v52 = vld [vmem:[#allocation4 + $0x1a0] sm:$0xf]  ;;  %v4462_v14 = vpop.f32.mrf.mxu0  ;;  %v3346_v31 = vor.u32 %v3532_v39, %v3345_v30 }
 0x18e   : > { %1613 = vmatpush.bf16.msra.mxu3 %v3250_v57  ;;  %1700 = vmatpush.bf16.msra.mxu0 %v3370_v32  ;;  %v3358_v18 = vor.u32 %v3535_v35, %v3357_v52 }
 0x18f   : > { %5579 = vst [vmem:[#allocation65_spill] sm:$0xff] %v4455_v58  ;;  %1436 = vmatmul.bf16.vlgmr.msra.gmra.mxu1 %v4121_v42  ;;  %v5649_v58 = vld [vmem:[#allocation31_spill] sm:$0xff] }
 0x190   : > { %1525 = vmatmul.bf16.vlgmr.msra.gmra.mxu2 %v4057_v63 }
 0x191   : > { %1614 = vmatmul.bf16.vlgmr.msra.gmra.mxu3 %v4119_v41 }
 0x192   : > { %v1210_v61 = vpop.f32.mrf.mxu2  ;;  %1701 = vmatpush.bf16.msra.mxu0 %v3358_v18 }
 0x193   : > { %v1211_v36 = vadd.f32 %v1210_v61, %v1122_v43 }
 0x194   : > { %v1123_v49 = vpop.f32.mrf.mxu1  ;;  %v4467_v17 = vpop.f32.mrf.mxu3 }
 0x195   : > { %v1124_v50 = vadd.f32 %v1123_v49, %v4185_v45  ;;  %5580 = vst [vmem:[#allocation66_spill] sm:$0xff] %v4467_v17  ;;  %v4469_v9 = vpop.f32.mrf.mxu0 }
 0x196   : > { %1702 = vmatpush.bf16.msra.mxu0 %v3346_v31  ;;  %5581 = vst [vmem:[#allocation67_spill] sm:$0xff] %v4469_v9 }
 0x199   : > { %1703 = vmatmul.bf16.vlgmr.msra.gmra.mxu0 %v4121_v42 }
 0x19a   : > { %v1212_v40 = vpop.f32.mrf.mxu2 }
 0x19b   : > { %v1213_v29 = vadd.f32 %v1212_v40, %v1124_v50 }
 0x19c   : > { %v1126_v3 = vpop.f32.mrf.mxu1  ;;  %v4476_v32 = vpop.f32.mrf.mxu3 }
 0x19d   : > { %v4471_v57 = vpack.c.bf16 %v1213_v29, %v1211_v36  ;;  %v1127_v63 = vadd.f32 %v1126_v3, %v4198_v51  ;;  %5583 = vst [vmem:[#allocation69_spill] sm:$0xff] %v4476_v32  ;;  %v4478_v43 = vpop.f32.mrf.mxu0 }
 0x19e   : > { %5584 = vst [vmem:[#allocation70_spill] sm:$0xff] %v4478_v43 }
 0x19f   : > { %5582 = vst [vmem:[#allocation68_spill] sm:$0xff] %v4471_v57  ;;  %1441 = vmatmul.bf16.gmra.mxu1 %v4133_v7  ;;  %v5627_v57 = vld [vmem:[#allocation15_spill] sm:$0xff] }
 0x1a0   : > { %1530 = vmatmul.bf16.gmra.mxu2 %v4077_v37 }
 0x1a1   : > { %1619 = vmatmul.bf16.gmra.mxu3 %v4131_v6 }
 0x1a2   : > { %v1215_v41 = vpop.f32.mrf.mxu2 }
 0x1a3   : > { %v1216_v45 = vadd.f32 %v1215_v41, %v1127_v63 }
 0x1a4   : > { %v1128_v61 = vpop.f32.mrf.mxu1  ;;  %v4483_v36 = vpop.f32.mrf.mxu3 }
 0x1a5   : > { %v1129_v52 = vadd.f32 %v1128_v61, %v4211_v2  ;;  %5585 = vst [vmem:[#allocation71_spill] sm:$0xff] %v4483_v36  ;;  %v4485_v18 = vpop.f32.mrf.mxu0  ;;  %v5656_v36 = vld [vmem:[#allocation13_spill] sm:$0xff] }
 0x1a6   : > { %5586 = vst [vmem:[#allocation72_spill] sm:$0xff] %v4485_v18 }
 0x1a9   : > { %1708 = vmatmul.bf16.gmra.mxu0 %v4133_v7 }
 0x1aa   : > { %v1217_v35 = vpop.f32.mrf.mxu2 }
 0x1ab   : > { %v1218_v42 = vadd.f32 %v1217_v35, %v1129_v52 }
 0x1ac   : > { %v1131_v51 = vpop.f32.mrf.mxu1  ;;  %v4492_v39 = vpop.f32.mrf.mxu3 }
 0x1ad   : > { %v4487_v49 = vpack.c.bf16 %v1218_v42, %v1216_v45  ;;  %v1132_v30 = vadd.f32 %v1131_v51, %v4226_v10  ;;  %5588 = vst [vmem:[#allocation74_spill] sm:$0xff] %v4492_v39  ;;  %v4494_v2 = vpop.f32.mrf.mxu0 }
 0x1ae   : > { %5589 = vst [vmem:[#allocation75_spill] sm:$0xff] %v4494_v2 }
 0x1af   : > { %5587 = vst [vmem:[#allocation73_spill] sm:$0xff] %v4487_v49  ;;  %1446 = vmatmul.bf16.gmra.mxu1 %v4145_v13 }
 0x1b0   : > { %1535 = vmatmul.bf16.gmra.mxu2 %v4097_v56 }
 0x1b1   : > { %1624 = vmatmul.bf16.gmra.mxu3 %v4143_v12 }
 0x1b2   : > { %v1220_v37 = vpop.f32.mrf.mxu2 }
 0x1b3   : > { %v1221_v6 = vadd.f32 %v1220_v37, %v1132_v30 }
 0x1b4   : > { %v1133_v31 = vpop.f32.mrf.mxu1  ;;  %v4499_v29 = vpop.f32.mrf.mxu3 }
 0x1b5   : > { %v1134_v50 = vadd.f32 %v1133_v31, %v4239_v23  ;;  %5590 = vst [vmem:[#allocation76_spill] sm:$0xff] %v4499_v29  ;;  %v4501_v3 = vpop.f32.mrf.mxu0 }
 0x1b6   : > { %5591 = vst [vmem:[#allocation77_spill] sm:$0xff] %v4501_v3  ;;  %v5659_v3 = vld [vmem:[#allocation35_spill] sm:$0xff] }
 0x1b9   : > { %1713 = vmatmul.bf16.gmra.mxu0 %v4145_v13 }
 0x1ba   : > { %v1222_v40 = vpop.f32.mrf.mxu2 }
 0x1bb   : > { %v1223_v7 = vadd.f32 %v1222_v40, %v1134_v50 }
 0x1bc   : > { %v1136_v10 = vpop.f32.mrf.mxu1  ;;  %v4508_v45 = vpop.f32.mrf.mxu3 }
 0x1bd   : > { %v4503_v63 = vpack.c.bf16 %v1223_v7, %v1221_v6  ;;  %v1137_v41 = vadd.f32 %v1136_v10, %v4254_v55  ;;  %5593 = vst [vmem:[#allocation79_spill] sm:$0xff] %v4508_v45  ;;  %v4510_v23 = vpop.f32.mrf.mxu0  ;;  %v5663_v45 = vld [vmem:[#allocation48_spill] sm:$0xff] }
 0x1be   : > { %5594 = vst [vmem:[#allocation80_spill] sm:$0xff] %v4510_v23 }
 0x1bf   : > { %5592 = vst [vmem:[#allocation78_spill] sm:$0xff] %v4503_v63  ;;  %1451 = vmatmul.bf16.gmra.mxu1 %v4157_v20 }
 0x1c0   : > { %1540 = vmatmul.bf16.gmra.mxu2 %v4117_v34 }
 0x1c1   : > { %1629 = vmatmul.bf16.gmra.mxu3 %v4155_v19 }
 0x1c2   : > { %v1225_v56 = vpop.f32.mrf.mxu2 }
 0x1c3   : > { %v1226_v12 = vadd.f32 %v1225_v56, %v1137_v41  ;;  %v5603_v56 = vld [vmem:[#allocation18_spill] sm:$0xff] }
 0x1c4   : > { %v1138_v61 = vpop.f32.mrf.mxu1  ;;  %v4515_v42 = vpop.f32.mrf.mxu3 }
 0x1c5   : > { %v1139_v52 = vadd.f32 %v1138_v61, %v4267_v4  ;;  %5595 = vst [vmem:[#allocation81_spill] sm:$0xff] %v4515_v42  ;;  %v4517_v51 = vpop.f32.mrf.mxu0  ;;  %v5665_v42 = vld [vmem:[#allocation16_spill] sm:$0xff] }
 0x1c6   : > { %5596 = vst [vmem:[#allocation82_spill] sm:$0xff] %v4517_v51 }
 0x1c9   : > { %1718 = vmatmul.bf16.gmra.mxu0 %v4157_v20 }
 0x1ca   : > { %v1227_v35 = vpop.f32.mrf.mxu2 }
 0x1cb   : > { %v1228_v13 = vadd.f32 %v1227_v35, %v1139_v52 }
 0x1cc   : > { %v1141_v55 = vpop.f32.mrf.mxu1  ;;  %v4524_v6 = vpop.f32.mrf.mxu3 }
 0x1cd   : > { %v4519_v30 = vpack.c.bf16 %v1228_v13, %v1226_v12  ;;  %v1142_v37 = vadd.f32 %v1141_v55, %v4187_v46  ;;  %5598 = vst [vmem:[#allocation84_spill] sm:$0xff] %v4524_v6  ;;  %v4526_v4 = vpop.f32.mrf.mxu0  ;;  %v5604_v12 = vld [vmem:[#allocation19_spill] sm:$0xff]  ;;  %v5607_v13 = vld [vmem:[#allocation10_spill] sm:$0xff]  ;;  %v5608_v55 = vld [vmem:[#allocation17_spill] sm:$0xff] }
 0x1ce   : > { %5599 = vst [vmem:[#allocation85_spill] sm:$0xff] %v4526_v4 }
 0x1cf   : > { %5597 = vst [vmem:[#allocation83_spill] sm:$0xff] %v4519_v30  ;;  %1456 = vmatmul.bf16.gmra.mxu1 %v4169_v27 }
 0x1d0   : > { %1545 = vmatmul.bf16.gmra.mxu2 %v4040_v28 }
 0x1d1   : > { %1634 = vmatmul.bf16.gmra.mxu3 %v4167_v26 }
 0x1d2   : > { %v1230_v34 = vpop.f32.mrf.mxu2 }
 0x1d3   : > { %v1231_v19 = vadd.f32 %v1230_v34, %v1142_v37  ;;  %v5609_v37 = vld [vmem:[#allocation22_spill] sm:$0xff] }
 0x1d4   : > { %v1143_v31 = vpop.f32.mrf.mxu1  ;;  %v4531_v7 = vpop.f32.mrf.mxu3 }
 0x1d5   : > { %v1144_v50 = vadd.f32 %v1143_v31, %v4200_v53  ;;  %5600 = vst [vmem:[#allocation86_spill] sm:$0xff] %v4531_v7  ;;  %v4533_v10 = vpop.f32.mrf.mxu0 }
 0x1d6   : > { %5601 = vst [vmem:[#allocation87_spill] sm:$0xff] %v4533_v10  ;;  %v5668_v10 = vld [vmem:[#allocation38_spill] sm:$0xff] }
 0x1d9   : > { %1723 = vmatmul.bf16.gmra.mxu0 %v4169_v27 }
 0x1da   : > { %v1232_v40 = vpop.f32.mrf.mxu2 }
 0x1db   : > { %v1233_v20 = vadd.f32 %v1232_v40, %v1144_v50 }
 0x1dc   : > { %v1146_v46 = vpop.f32.mrf.mxu1  ;;  %v4540_v52 = vpop.f32.mrf.mxu3 }
 0x1dd   : > { %v4535_v41 = vpack.c.bf16 %v1233_v20, %v1231_v19  ;;  %v1147_v61 = vadd.f32 %v1146_v46, %v5604_v12  ;;  %5605 = vst [vmem:[#allocation18_spill] sm:$0xff] %v4540_v52  ;;  %v4542_v53 = vpop.f32.mrf.mxu0  ;;  %v5613_v46 = vld [vmem:[#allocation21_spill] sm:$0xff]  ;;  %v5614_v12 = vld [vmem:[#allocation23_spill] sm:$0xff] }
 0x1de   : > { %5606 = vst [vmem:[#allocation19_spill] sm:$0xff] %v4542_v53 }
 0x1df   : > { %5602 = vst [vmem:[#allocation88_spill] sm:$0xff] %v4535_v41  ;;  %1461 = vmatmul.bf16.gmra.mxu1 %v5603_v56  ;;  %v5617_v41 = vld [vmem:[#allocation12_spill] sm:$0xff] }
 0x1e0   : > { %1550 = vmatmul.bf16.gmra.mxu2 %v5607_v13 }
 0x1e1   : > { %1639 = vmatmul.bf16.gmra.mxu3 %v5608_v55 }
 0x1e2   : > { %v1235_v28 = vpop.f32.mrf.mxu2 }
 0x1e3   : > { %v1236_v26 = vadd.f32 %v1235_v28, %v1147_v61 }
 0x1e4   : > { %v1148_v35 = vpop.f32.mrf.mxu1  ;;  %v4547_v31 = vpop.f32.mrf.mxu3 }
 0x1e5   : > { %v1149_v34 = vadd.f32 %v1148_v35, %v5609_v37  ;;  %5610 = vst [vmem:[#allocation10_spill] sm:$0xff] %v4547_v31  ;;  %v4549_v50 = vpop.f32.mrf.mxu0 }
 0x1e6   : > { %5611 = vst [vmem:[#allocation17_spill] sm:$0xff] %v4549_v50 }
 0x1e9   : > { %1728 = vmatmul.bf16.gmra.mxu0 %v5603_v56 }
 0x1ea   : > { %v1237_v19 = vpop.f32.mrf.mxu2 }
 0x1eb   : > { %v1238_v27 = vadd.f32 %v1237_v19, %v1149_v34  ;;  %v5618_v34 = vld [vmem:[#allocation20_spill] sm:$0xff]  ;;  %v5619_v19 = vld [vmem:[#allocation26_spill] sm:$0xff] }
 0x1ec   : > { %v1151_v40 = vpop.f32.mrf.mxu1  ;;  %v4556_v13 = vpop.f32.mrf.mxu3 }
 0x1ed   : > { %v4551_v20 = vpack.c.bf16 %v1238_v27, %v1236_v26  ;;  %v1152_v61 = vadd.f32 %v1151_v40, %v5614_v12  ;;  %5615 = vst [vmem:[#allocation21_spill] sm:$0xff] %v4556_v13  ;;  %v4558_v35 = vpop.f32.mrf.mxu0 }
 0x1ee   : > { %5616 = vst [vmem:[#allocation23_spill] sm:$0xff] %v4558_v35 }
 0x1ef   : > { %5612 = vst [vmem:[#allocation22_spill] sm:$0xff] %v4551_v20  ;;  %1466 = vmatmul.bf16.gmra.mxu1 %v5613_v46 }
 0x1f0   : > { %1555 = vmatmul.bf16.gmra.mxu2 %v5617_v41 }
 0x1f1   : > { %1644 = vmatmul.bf16.gmra.mxu3 %v5618_v34 }
 0x1f2   : > { %v1240_v28 = vpop.f32.mrf.mxu2 }
 0x1f3   : > { %v1241_v55 = vadd.f32 %v1240_v28, %v1152_v61  ;;  %v5623_v61 = vld [vmem:[#allocation25_spill] sm:$0xff]  ;;  %v5624_v28 = vld [vmem:[#allocation27_spill] sm:$0xff] }
 0x1f4   : > { %v1153_v37 = vpop.f32.mrf.mxu1  ;;  %v4563_v20 = vpop.f32.mrf.mxu3 }
 0x1f5   : > { %v1154_v26 = vadd.f32 %v1153_v37, %v5619_v19  ;;  %5620 = vst [vmem:[#allocation12_spill] sm:$0xff] %v4563_v20  ;;  %v4565_v30 = vpop.f32.mrf.mxu0 }
 0x1f6   : > { %5621 = vst [vmem:[#allocation20_spill] sm:$0xff] %v4565_v30 }
 0x1f9   : > { %1733 = vmatmul.bf16.gmra.mxu0 %v5613_v46 }
 0x1fa   : > { %v1242_v27 = vpop.f32.mrf.mxu2 }
 0x1fb   : > { %v1243_v56 = vadd.f32 %v1242_v27, %v1154_v26  ;;  %v5628_v26 = vld [vmem:[#allocation24_spill] sm:$0xff]  ;;  %v5629_v27 = vld [vmem:[#allocation30_spill] sm:$0xff] }
 0x1fc   : > { %v1156_v40 = vpop.f32.mrf.mxu1  ;;  %v4572_v49 = vpop.f32.mrf.mxu3 }
 0x1fd   : > { %v4567_v12 = vpack.c.bf16 %v1243_v56, %v1241_v55  ;;  %v1157_v63 = vadd.f32 %v1156_v40, %v5624_v28  ;;  %5625 = vst [vmem:[#allocation25_spill] sm:$0xff] %v4572_v49  ;;  %v4574_v37 = vpop.f32.mrf.mxu0 }
 0x1fe   : > { %5626 = vst [vmem:[#allocation27_spill] sm:$0xff] %v4574_v37 }
 0x1ff   : > { %5622 = vst [vmem:[#allocation26_spill] sm:$0xff] %v4567_v12  ;;  %1471 = vmatmul.bf16.gmra.mxu1 %v5623_v61 }
 0x200   : > { %1560 = vmatmul.bf16.gmra.mxu2 %v5627_v57  ;;  %v1349_v57 = vadd.f32 %v4293_v47, %v4287_v33 }
 0x201   : > { %1649 = vmatmul.bf16.gmra.mxu3 %v5628_v26 }
 0x202   : > { %v1245_v41 = vpop.f32.mrf.mxu2 }
 0x203   : > { %v1246_v34 = vadd.f32 %v1245_v41, %v1157_v63  ;;  %v5633_v63 = vld [vmem:[#allocation29_spill] sm:$0xff] }
 0x204   : > { %v1158_v19 = vpop.f32.mrf.mxu1  ;;  %v4579_v12 = vpop.f32.mrf.mxu3 }
 0x205   : > { %v1159_v55 = vadd.f32 %v1158_v19, %v5629_v27  ;;  %5630 = vst [vmem:[#allocation15_spill] sm:$0xff] %v4579_v12  ;;  %v4581_v43 = vpop.f32.mrf.mxu0  ;;  %v5635_v19 = vld [vmem:[#allocation34_spill] sm:$0xff] }
 0x206   : > { %5631 = vst [vmem:[#allocation24_spill] sm:$0xff] %v4581_v43  ;;  %v1351_v26 = vadd.f32 %v5635_v19, %v4301_v59  ;;  %v5642_v19 = vld [vmem:[#allocation32_spill] sm:$0xff] }
 0x209   : > { %1738 = vmatmul.bf16.gmra.mxu0 %v5623_v61  ;;  %v5646_v61 = vld [vmem:[#allocation11_spill] sm:$0xff] }
 0x20a   : > { %v1247_v56 = vpop.f32.mrf.mxu2 }
 0x20b   : > { %v1248_v46 = vadd.f32 %v1247_v56, %v1159_v55  ;;  %v5637_v56 = vld [vmem:[#allocation8_spill] sm:$0xff] }
 0x20c   : > { %v1437_v40 = vpop.f32.mrf.mxu1  ;;  %v4589_v41 = vpop.f32.mrf.mxu3 }
 0x20d   : > { %v4583_v28 = vpack.c.bf16 %v1248_v46, %v1246_v34  ;;  %5634 = vst [vmem:[#allocation29_spill] sm:$0xff] %v4589_v41  ;;  %v4593_v27 = vpop.f32.mrf.mxu0  ;;  %v4596_v32 = vadd.f32 %v1437_v40, %v1349_v57  ;;  %v5640_v46 = vld [vmem:[#allocation28_spill] sm:$0xff]  ;;  %v1354_v57 = vadd.f32 %v4317_v11, %v4311_v5 }
 0x20e   : > { %5636 = vst [vmem:[#allocation34_spill] sm:$0xff] %v4593_v27 }
 0x20f   : > { %5632 = vst [vmem:[#allocation30_spill] sm:$0xff] %v4583_v28  ;;  %1476 = vmatmul.bf16.gmra.mxu1 %v5633_v63 }
 0x210   : > { %1565 = vmatmul.bf16.gmra.mxu2 %v5637_v56  ;;  %5638 = vst [vmem:[#allocation8_spill] sm:$0xff] %v4596_v32  ;;  %v5673_v32 = vld [vmem:[#allocation14_spill] sm:$0xff] }
 0x211   : > { %1654 = vmatmul.bf16.gmra.mxu3 %v5640_v46 }
 0x213   : > { %v4603_v47 = vpop.f32.mrf.mxu2 }
 0x214   : > { %v1439_v55 = vpop.f32.mrf.mxu1  ;;  %v4605_v33 = vpop.f32.mrf.mxu3 }
 0x215   : > { %v4598_v34 = vadd.f32 %v1439_v55, %v1351_v26  ;;  %v1356_v55 = vadd.f32 %v4327_v16, %v4325_v62  ;;  %v5651_v16 = vld [vmem:[#allocation36_spill] sm:$0xff] }
 0x216   : > { %v4607_v28 = vpop.f32.mrf.mxu0 }
 0x217   : > { %5639 = vst [vmem:[#allocation89_spill] sm:$0xff] %v4598_v34 }
 0x218   : > { %5641 = vst [vmem:[#allocation28_spill] sm:$0xff] %v4607_v28 }
 0x219   : > { %1743 = vmatmul.bf16.gmra.mxu0 %v5633_v63 }
 0x21b   : > { %v4611_v40 = vpop.f32.mrf.mxu2 }
 0x21c   : > { %v1442_v59 = vpop.f32.mrf.mxu1  ;;  %5643 = vst [vmem:[#allocation32_spill] sm:$0xff] %v4611_v40  ;;  %v4615_v26 = vpop.f32.mrf.mxu3 }
 0x21d   : > { %5644 = vst [vmem:[#allocation90_spill] sm:$0xff] %v4615_v26  ;;  %v4622_v9 = vadd.f32 %v1442_v59, %v1354_v57  ;;  %v5652_v59 = vld [vmem:[#allocation40_spill] sm:$0xff] }
 0x21e   : > { %v4619_v56 = vpop.f32.mrf.mxu0  ;;  %v1359_v57 = vadd.f32 %v5652_v59, %v4335_v1 }
 0x21f   : > { %1481 = vmatmul.bf16.gmra.mxu1 %v5642_v19  ;;  %5645 = vst [vmem:[#allocation91_spill] sm:$0xff] %v4619_v56 }
 0x220   : > { %1570 = vmatmul.bf16.gmra.mxu2 %v5646_v61  ;;  %5647 = vst [vmem:[#allocation11_spill] sm:$0xff] %v4622_v9 }
 0x221   : > { %1659 = vmatmul.bf16.gmra.mxu3 %v5649_v58  ;;  %v5654_v58 = vld [vmem:[#allocation43_spill] sm:$0xff] }
 0x223   : > { %v4629_v5 = vpop.f32.mrf.mxu2 }
 0x224   : > { %v1444_v46 = vpop.f32.mrf.mxu1  ;;  %v4631_v11 = vpop.f32.mrf.mxu3 }
 0x225   : > { %v4624_v63 = vadd.f32 %v1444_v46, %v1356_v55  ;;  %v5653_v46 = vld [vmem:[#allocation42_spill] sm:$0xff] }
 0x226   : > { %v4633_v2 = vpop.f32.mrf.mxu0  ;;  %v1361_v17 = vadd.f32 %v5654_v58, %v5653_v46  ;;  %v5660_v58 = vld [vmem:[#allocation39_spill] sm:$0xff] }
 0x227   : > { %5648 = vst [vmem:[#allocation92_spill] sm:$0xff] %v4624_v63 }
 0x228   : > { %5650 = vst [vmem:[#allocation31_spill] sm:$0xff] %v4633_v2  ;;  %v5675_v2 = vld [vmem:[#allocation64_spill] sm:$0xff] }
 0x229   : > { %1748 = vmatmul.bf16.gmra.mxu0 %v5642_v19 }
 0x22b   : > { %v4637_v61 = vpop.f32.mrf.mxu2 }
 0x22c   : > { %v1447_v62 = vpop.f32.mrf.mxu1  ;;  %v4641_v55 = vpop.f32.mrf.mxu3 }
 0x22d   : > { %v4648_v23 = vadd.f32 %v1447_v62, %v1359_v57 }
 0x22e   : > { %v4645_v39 = vpop.f32.mrf.mxu0 }
 0x22f   : > { %1486 = vmatmul.bf16.gmra.mxu1 %v5651_v16  ;;  %5655 = vst [vmem:[#allocation36_spill] sm:$0xff] %v4645_v39  ;;  %v5674_v39 = vld [vmem:[#allocation63_spill] sm:$0xff] }
 0x230   : > { %1575 = vmatmul.bf16.gmra.mxu2 %v5656_v36  ;;  %5657 = vst [vmem:[#allocation40_spill] sm:$0xff] %v4648_v23 }
 0x231   : > { %1664 = vmatmul.bf16.gmra.mxu3 %v5659_v3  ;;  %v5664_v3 = vld [vmem:[#allocation49_spill] sm:$0xff] }
 0x232   : > { %v1366_v4 = vadd.f32 %v5664_v3, %v5663_v45 }
 0x233   : > { %v4655_v1 = vpop.f32.mrf.mxu2 }
 0x234   : > { %v1449_v18 = vpop.f32.mrf.mxu1  ;;  %v4657_v59 = vpop.f32.mrf.mxu3 }
 0x235   : > { %v4650_v19 = vadd.f32 %v1449_v18, %v1361_v17  ;;  %v5661_v17 = vld [vmem:[#allocation44_spill] sm:$0xff]  ;;  %v5662_v18 = vld [vmem:[#allocation46_spill] sm:$0xff] }
 0x236   : > { %v4659_v29 = vpop.f32.mrf.mxu0  ;;  %v1364_v62 = vadd.f32 %v5662_v18, %v5661_v17 }
 0x237   : > { %5658 = vst [vmem:[#allocation42_spill] sm:$0xff] %v4650_v19  ;;  %v1386_v19 = vadd.f32 %v4462_v14, %v4460_v60 }
 0x239   : > { %1753 = vmatmul.bf16.gmra.mxu0 %v5651_v16 }
 0x23b   : > { %v4663_v36 = vpop.f32.mrf.mxu2 }
 0x23c   : > { %v1452_v46 = vpop.f32.mrf.mxu1  ;;  %v4667_v57 = vpop.f32.mrf.mxu3 }
 0x23d   : > { %v4674_v53 = vadd.f32 %v1452_v46, %v1364_v62 }
 0x23e   : > { %v4671_v6 = vpop.f32.mrf.mxu0 }
 0x23f   : > { %1491 = vmatmul.bf16.gmra.mxu1 %v5660_v58  ;;  %5666 = vst [vmem:[#allocation43_spill] sm:$0xff] %v4674_v53 }
 0x240   : > { %1580 = vmatmul.bf16.gmra.mxu2 %v5665_v42  ;;  %v5669_v42 = vld [vmem:[#allocation45_spill] sm:$0xff] }
 0x241   : > { %1669 = vmatmul.bf16.gmra.mxu3 %v5668_v10  ;;  %v5670_v10 = vld [vmem:[#allocation9_spill] sm:$0xff] }
 0x243   : > { %v4681_v17 = vpop.f32.mrf.mxu2 }
 0x244   : > { %v1454_v51 = vpop.f32.mrf.mxu1  ;;  %v4683_v18 = vpop.f32.mrf.mxu3 }
 0x245   : > { %v4676_v16 = vadd.f32 %v1454_v51, %v1366_v4 }
 0x246   : > { %v4685_v7 = vpop.f32.mrf.mxu0 }
 0x247   : > { %5667 = vst [vmem:[#allocation13_spill] sm:$0xff] %v4676_v16  ;;  %v1379_v16 = vadd.f32 %v4437_v8, %v4431_v38  ;;  %v5680_v38 = vld [vmem:[#allocation61_spill] sm:$0xff] }
 0x249   : > { %1758 = vmatmul.bf16.gmra.mxu0 %v5660_v58 }
 0x24b   : > { %v4691_v46 = vpop.f32.mrf.mxu2 }
 0x24c   : > { %v4687_v45 = vpop.f32.mrf.mxu1  ;;  %v4693_v51 = vpop.f32.mrf.mxu3 }
 0x24e   : > { %v4695_v4 = vpop.f32.mrf.mxu0 }
 0x24f   : > { %1496 = vmatmul.bf16.gmra.mxu1 %v5669_v42 }
 0x250   : > { %1585 = vmatmul.bf16.gmra.mxu2 %v5670_v10 }
 0x251   : > { %1674 = vmatmul.bf16.gmra.mxu3 %v4361_v25  ;;  %v5671_v25 = vld [vmem:[#allocation51_spill] sm:$0xff] }
 0x253   : > { %v4701_v3 = vpop.f32.mrf.mxu2 }
 0x254   : > { %v4697_v62 = vpop.f32.mrf.mxu1  ;;  %v4703_v52 = vpop.f32.mrf.mxu3 }
 0x256   : > { %v4705_v35 = vpop.f32.mrf.mxu0 }
 0x259   : > { %1763 = vmatmul.bf16.gmra.mxu0 %v5669_v42  ;;  %v5672_v42 = vld [vmem:[#allocation57_spill] sm:$0xff] }
 0x25b   : > { %v4709_v13 = vpop.f32.mrf.mxu2 }
 0x25c   : > { %v1462_v58 = vpop.f32.mrf.mxu1  ;;  %v4711_v50 = vpop.f32.mrf.mxu3 }
 0x25e   : > { %v4713_v31 = vpop.f32.mrf.mxu0 }
 0x25f   : > { %1501 = vmatmul.bf16.gmra.mxu1 %v4387_v21 }
 0x260   : > { %1590 = vmatmul.bf16.gmra.mxu2 %v4068_v24 }
 0x261   : > { %1679 = vmatmul.bf16.gmra.mxu3 %v5671_v25 }
 0x263   : > { %v1551_v37 = vpop.f32.mrf.mxu2 }
 0x264   : > { %v1464_v10 = vpop.f32.mrf.mxu1  ;;  %v1640_v49 = vpop.f32.mrf.mxu3 }
 0x266   : > { %v4717_v30 = vpop.f32.mrf.mxu0 }
 0x269   : > { %1768 = vmatmul.bf16.gmra.mxu0 %v4387_v21  ;;  %v1384_v21 = vadd.f32 %v4453_v54, %v4451_v0  ;;  %v1381_v0 = vadd.f32 %v5675_v2, %v5674_v39 }
 0x26b   : > { %v1553_v27 = vpop.f32.mrf.mxu2 }
 0x26c   : > { %v1467_v20 = vpop.f32.mrf.mxu1  ;;  %v1642_v41 = vpop.f32.mrf.mxu3 }
 0x26d   : > { %v1468_v40 = vadd.f32 %v1467_v20, %v1379_v16 }
 0x26e   : > { %v1731_v43 = vpop.f32.mrf.mxu0 }
 0x26f   : > { %1506 = vmatmul.bf16.gmra.mxu1 %v5672_v42 }
 0x270   : > { %1595 = vmatmul.bf16.gmra.mxu2 %v5673_v32 }
 0x271   : > { %1684 = vmatmul.bf16.gmra.mxu3 %v4409_v48 }
 0x273   : > { %v1556_v24 = vpop.f32.mrf.mxu2 }
 0x274   : > { %v1469_v12 = vpop.f32.mrf.mxu1  ;;  %v1645_v34 = vpop.f32.mrf.mxu3 }
 0x275   : > { %v1470_v26 = vadd.f32 %v1469_v12, %v1381_v0  ;;  %v1646_v20 = vadd.f32 %v1645_v34, %v1556_v24 }
 0x276   : > { %v1734_v25 = vpop.f32.mrf.mxu0 }
 0x279   : > { %1773 = vmatmul.bf16.gmra.mxu0 %v5672_v42 }
 0x27b   : > { %v1558_v63 = vpop.f32.mrf.mxu2 }
 0x27c   : > { %v1472_v9 = vpop.f32.mrf.mxu1  ;;  %v1647_v23 = vpop.f32.mrf.mxu3 }
 0x27d   : > { %v1473_v48 = vadd.f32 %v1472_v9, %v1384_v21  ;;  %v1648_v16 = vadd.f32 %v1647_v23, %v1558_v63 }
 0x27e   : > { %v1736_v56 = vpop.f32.mrf.mxu0 }
 0x27f   : > { %1511 = vmatmul.bf16.gmra.mxu1 %v4435_v44 }
 0x280   : > { %1600 = vmatmul.bf16.gmra.mxu2 %v4108_v15  ;;  %v1806_v15 = vpack.c.bf16 %v1470_v26, %v1468_v40  ;;  %v1735_v26 = vadd.f32 %v1734_v25, %v1646_v20 }
 0x281   : > { %1689 = vmatmul.bf16.gmra.mxu3 %v4433_v22  ;;  %v5677_v22 = vld [vmem:[#allocation56_spill] sm:$0xff] }
 0x283   : > { %v1561_v42 = vpop.f32.mrf.mxu2 }
 0x284   : > { %v1474_v32 = vpop.f32.mrf.mxu1  ;;  %v1650_v54 = vpop.f32.mrf.mxu3 }
 0x285   : > { %v1475_v28 = vadd.f32 %v1474_v32, %v1386_v19  ;;  %v5678_v19 = vld [vmem:[#allocation58_spill] sm:$0xff]  ;;  %v5679_v32 = vld [vmem:[#allocation60_spill] sm:$0xff] }
 0x286   : > { %v1739_v60 = vpop.f32.mrf.mxu0  ;;  %v1374_v21 = vadd.f32 %v5678_v19, %v5677_v22  ;;  %v1376_v8 = vadd.f32 %v5680_v38, %v5679_v32  ;;  %v1641_v19 = vadd.f32 %v1640_v49, %v1551_v37  ;;  %v1643_v32 = vadd.f32 %v1642_v41, %v1553_v27  ;;  %v5684_v38 = vld [vmem:[#allocation52_spill] sm:$0xff] }
 0x287   : > { %v1807_v53 = vpack.c.bf16 %v1475_v28, %v1473_v48  ;;  %v1651_v28 = vadd.f32 %v1650_v54, %v1561_v42  ;;  %v1737_v42 = vadd.f32 %v1736_v56, %v1648_v16  ;;  %v1636_v37 = vadd.f32 %v4703_v52, %v4701_v3  ;;  %v5694_v3 = vld [vmem:[#allocation32_spill] sm:$0xff]  ;;  %v5704_v16 = vld [vmem:[#allocation91_spill] sm:$0xff] }
 0x288   : > { %v1465_v2 = vadd.f32 %v1464_v10, %v1376_v8  ;;  %v1730_v23 = vadd.f32 %v4717_v30, %v1641_v19  ;;  %v1732_v34 = vadd.f32 %v1731_v43, %v1643_v32  ;;  %v1638_v41 = vadd.f32 %v4711_v50, %v4709_v13  ;;  %v5706_v19 = vld [vmem:[#allocation40_spill] sm:$0xff] }
 0x289   : > { %1832 = vmatpush.bf16.xpose.msrb.mxu1 %v1807_v53  ;;  %1778 = vmatmul.bf16.gmra.mxu0 %v4435_v44  ;;  %v1740_v53 = vadd.f32 %v1739_v60, %v1651_v28  ;;  %v1463_v44 = vadd.f32 %v1462_v58, %v1374_v21  ;;  %v5685_v60 = vld [vmem:[#allocation54_spill] sm:$0xff]  ;;  %v1822_v8 = vpack.c.bf16 %v1737_v42, %v1735_v26 }
 0x28a   : > { %v1631_v30 = vadd.f32 %v4683_v18, %v4681_v17  ;;  %v1821_v43 = vpack.c.bf16 %v1732_v34, %v1730_v23  ;;  %v1725_v24 = vadd.f32 %v4705_v35, %v1636_v37  ;;  %v1626_v52 = vadd.f32 %v4657_v59, %v4655_v1  ;;  %v5695_v21 = vld [vmem:[#allocation90_spill] sm:$0xff] }
 0x28b   : > { %v1563_v9 = vpop.f32.mrf.mxu2  ;;  %v1805_v54 = vpack.c.bf16 %v1465_v2, %v1463_v44  ;;  %v1633_v50 = vadd.f32 %v4693_v51, %v4691_v46  ;;  %v1628_v13 = vadd.f32 %v4667_v57, %v4663_v36  ;;  %v1621_v1 = vadd.f32 %v4631_v11, %v4629_v5  ;;  %v5696_v5 = vld [vmem:[#allocation31_spill] sm:$0xff]  ;;  %v5697_v2 = vld [vmem:[#allocation36_spill] sm:$0xff] }
 0x28c   : > { %v4735_v14 = vpop.f32.mrf.mxu1  ;;  %v1652_v39 = vpop.f32.mrf.mxu3  ;;  %v1720_v17 = vadd.f32 %v4685_v7, %v1631_v30  ;;  %v1623_v46 = vadd.f32 %v4641_v55, %v4637_v61  ;;  %v1715_v36 = vadd.f32 %v4659_v29, %v1626_v52  ;;  %v5699_v61 = vld [vmem:[#allocation43_spill] sm:$0xff]  ;;  %v5717_v52 = vld [vmem:[#allocation33_spill] sm:$0xff] }
 0x28d   : > { %5676 = vst [vmem:[#allocation35_spill] sm:$0xff] %v4735_v14  ;;  %v1653_v12 = vadd.f32 %v1652_v39, %v1563_v9  ;;  %v5686_v9 = vld [vmem:[#allocation55_spill] sm:$0xff]  ;;  %v1722_v35 = vadd.f32 %v4695_v4, %v1633_v50  ;;  %v1717_v7 = vadd.f32 %v4671_v6, %v1628_v13  ;;  %v1616_v4 = vadd.f32 %v4605_v33, %v4603_v47  ;;  %v5703_v47 = vld [vmem:[#allocation28_spill] sm:$0xff] }
 0x28e   : > { %v1741_v48 = vpop.f32.mrf.mxu0  ;;  %v1371_v28 = vadd.f32 %v5686_v9, %v5685_v60  ;;  %v1618_v39 = vadd.f32 %v5695_v21, %v5694_v3  ;;  %v1710_v11 = vadd.f32 %v5696_v5, %v1621_v1  ;;  %v5710_v9 = vld [vmem:[#allocation92_spill] sm:$0xff] }
 0x28f   : > { %v1742_v40 = vadd.f32 %v1741_v48, %v1653_v12  ;;  %v1819_v57 = vpack.c.bf16 %v1722_v35, %v1720_v17  ;;  %v5698_v12 = vld [vmem:[#allocation13_spill] sm:$0xff]  ;;  %v1818_v29 = vpack.c.bf16 %v1717_v7, %v1715_v36  ;;  %v1705_v33 = vadd.f32 %v5703_v47, %v1616_v4 }
 0x290   : > { %v1460_v56 = vadd.f32 %v4697_v62, %v1371_v28  ;;  %v1727_v62 = vadd.f32 %v4713_v31, %v1638_v41  ;;  %v5700_v55 = vpack.c.bf16 %v5698_v12, %v5699_v61  ;;  %v1707_v44 = vadd.f32 %v5704_v16, %v1618_v39  ;;  %v5711_v28 = vld [vmem:[#allocation11_spill] sm:$0xff]  ;;  %v5713_v41 = vld [vmem:[#allocation89_spill] sm:$0xff] }
 0x291   : > { %1833 = vmatpush.bf16.xpose.msrb.mxu1 %v1806_v15  ;;  %v1823_v14 = vpack.c.bf16 %v1742_v40, %v1740_v53  ;;  %v5683_v15 = vld [vmem:[#allocation50_spill] sm:$0xff]  ;;  %v1712_v53 = vadd.f32 %v5697_v2, %v1623_v46  ;;  %v5718_v7 = vld [vmem:[#allocation37_spill] sm:$0xff] }
 0x292   : > { %v1369_v10 = vadd.f32 %v5684_v38, %v5683_v15  ;;  %v1820_v18 = vpack.c.bf16 %v1727_v62, %v1725_v24  ;;  %v1816_v42 = vpack.c.bf16 %v1707_v44, %v1705_v33 }
 0x293   : > { %v4744_v22 = vpop.f32.mrf.mxu2  ;;  %2622 = vmatpush.bf16.msrb.mxu3 %v1823_v14  ;;  %v1817_v40 = vpack.c.bf16 %v1712_v53, %v1710_v11  ;;  %v5719_v53 = vld [vmem:[#allocation41_spill] sm:$0xff] }
 0x294   : > { %v4742_v0 = vpop.f32.mrf.mxu1  ;;  %5682 = vst [vmem:[#allocation44_spill] sm:$0xff] %v4744_v22  ;;  %v4751_v63 = vpop.f32.mrf.mxu3  ;;  %v1458_v27 = vadd.f32 %v4687_v45, %v1369_v10 }
 0x295   : > { %5681 = vst [vmem:[#allocation39_spill] sm:$0xff] %v4742_v0 }
 0x296   : > { %5687 = vst [vmem:[#allocation46_spill] sm:$0xff] %v4751_v63  ;;  %v4754_v58 = vpop.f32.mrf.mxu0  ;;  %v1804_v25 = vpack.c.bf16 %v1460_v56, %v1458_v27  ;;  %v5714_v27 = vld [vmem:[#allocation8_spill] sm:$0xff] }
 0x297   : > { %5688 = vst [vmem:[#allocation48_spill] sm:$0xff] %v4754_v58  ;;  %2623 = vmatpush.bf16.msrb.mxu3 %v1822_v8  ;;  %v5712_v8 = vpack.c.bf16 %v5710_v9, %v5711_v28  ;;  %v5715_v30 = vpack.c.bf16 %v5713_v41, %v5714_v27  ;;  %v5721_v9 = vld [vmem:[#allocation15_spill] sm:$0xff]  ;;  %v5722_v28 = vld [vmem:[#allocation24_spill] sm:$0xff]  ;;  %v5723_v27 = vld [vmem:[#allocation29_spill] sm:$0xff] }
 0x298   : > { %v5725_v58 = vld [vmem:[#allocation53_spill] sm:$0xff] }
 0x299   : > { %1834 = vmatpush.bf16.xpose.msrb.mxu1 %v1805_v54  ;;  %v5705_v54 = vld [vmem:[#allocation42_spill] sm:$0xff] }
 0x29a   : > { %v5707_v32 = vpack.c.bf16 %v5705_v54, %v5706_v19 }
 0x29b   : > { %v4767_v14 = vpop.f32.mrf.mxu2  ;;  %2624 = vmatpush.bf16.msrb.mxu3 %v1821_v43 }
 0x29c   : > { %v4756_v49 = vpop.f32.mrf.mxu1  ;;  %5690 = vst [vmem:[#allocation16_spill] sm:$0xff] %v4767_v14  ;;  %v4777_v31 = vpop.f32.mrf.mxu3 }
 0x29d   : > { %5689 = vst [vmem:[#allocation49_spill] sm:$0xff] %v4756_v49 }
 0x29e   : > { %5691 = vst [vmem:[#allocation38_spill] sm:$0xff] %v4777_v31  ;;  %v4779_v45 = vpop.f32.mrf.mxu0 }
 0x29f   : > { %5692 = vst [vmem:[#allocation45_spill] sm:$0xff] %v4779_v45  ;;  %2625 = vmatpush.bf16.msrb.mxu3 %v1820_v18 }
 0x2a1   : > { %1835 = vmatpush.bf16.xpose.msrb.mxu1 %v1804_v25 }
 0x2a3   : > { %v4789_v51 = vpop.f32.mrf.mxu2  ;;  %2626 = vmatpush.bf16.msrb.mxu3 %v1819_v57 }
 0x2a4   : > { %v4783_v59 = vpop.f32.mrf.mxu1  ;;  %v4800_v6 = vpop.f32.mrf.mxu3 }
 0x2a5   : > { %5693 = vst [vmem:[#allocation9_spill] sm:$0xff] %v4783_v59 }
 0x2a6   : > { %v4802_v48 = vpop.f32.mrf.mxu0 }
 0x2a7   : > { %5701 = vst [vmem:[#allocation51_spill] sm:$0xff] %v4802_v48  ;;  %2627 = vmatpush.bf16.msrb.mxu3 %v1818_v29  ;;  %v5729_v48 = vld [vmem:[#allocation27_spill] sm:$0xff] }
 0x2a9   : > { %1836 = vmatpush.bf16.xpose.msrb.mxu1 %v5700_v55 }
 0x2ab   : > { %v4808_v26 = vpop.f32.mrf.mxu2  ;;  %2628 = vmatpush.bf16.msrb.mxu3 %v1817_v40  ;;  %v5720_v40 = vld [vmem:[#allocation47_spill] sm:$0xff] }
 0x2ac   : > { %v4804_v20 = vpop.f32.mrf.mxu1  ;;  %v4813_v15 = vpop.f32.mrf.mxu3 }
 0x2ad   : > { %5702 = vst [vmem:[#allocation57_spill] sm:$0xff] %v4804_v20  ;;  %v5727_v20 = vld [vmem:[#allocation20_spill] sm:$0xff] }
 0x2ae   : > { %v4815_v38 = vpop.f32.mrf.mxu0 }
 0x2af   : > { %5708 = vst [vmem:[#allocation14_spill] sm:$0xff] %v4815_v38  ;;  %2629 = vmatpush.bf16.msrb.mxu3 %v1816_v42  ;;  %v5728_v38 = vld [vmem:[#allocation25_spill] sm:$0xff] }
 0x2b0   : > { %v1421_v31 = vadd.f32 %v5729_v48, %v5728_v38 }
 0x2b1   : > { %1837 = vmatpush.bf16.xpose.msrb.mxu1 %v5707_v32 }
 0x2b3   : > { %v4819_v60 = vpop.f32.mrf.mxu2 }
 0x2b4   : > { %v4817_v10 = vpop.f32.mrf.mxu1  ;;  %v4824_v23 = vpop.f32.mrf.mxu3 }
 0x2b5   : > { %5709 = vst [vmem:[#allocation63_spill] sm:$0xff] %v4817_v10 }
 0x2b6   : > { %v4826_v34 = vpop.f32.mrf.mxu0 }
 0x2b9   : > { %1838 = vmatpush.bf16.xpose.msrb.mxu1 %v5712_v8  ;;  %v1424_v8 = vadd.f32 %v5722_v28, %v5721_v9 }
 0x2bb   : > { %v4830_v37 = vpop.f32.mrf.mxu2 }
 0x2bc   : > { %v4828_v56 = vpop.f32.mrf.mxu1  ;;  %v4835_v43 = vpop.f32.mrf.mxu3 }
 0x2be   : > { %v4837_v24 = vpop.f32.mrf.mxu0 }
 0x2bf   : > { %5716 = vst [vmem:[#allocation64_spill] sm:$0xff] %v4837_v24 }
 0x2c1   : > { %1839 = vmatpush.bf16.xpose.msrb.mxu1 %v5715_v30  ;;  %v5724_v30 = vld [vmem:[#allocation34_spill] sm:$0xff] }
 0x2c3   : > { %v4841_v25 = vpop.f32.mrf.mxu2 }
 0x2c4   : > { %v4839_v62 = vpop.f32.mrf.mxu1  ;;  %v4844_v50 = vpop.f32.mrf.mxu3 }
 0x2c6   : > { %v4846_v13 = vpop.f32.mrf.mxu0 }
 0x2c8   : > { %1840 = vmatmul.bf16.vlgmr.msrb.gmra.mxu1 %v5717_v52 }
 0x2cb   : > { %v4850_v18 = vpop.f32.mrf.mxu2 }
 0x2cc   : > { %v4848_v17 = vpop.f32.mrf.mxu1  ;;  %v4852_v35 = vpop.f32.mrf.mxu3 }
 0x2ce   : > { %v4854_v1 = vpop.f32.mrf.mxu0 }
 0x2d3   : > { %v4858_v36 = vpop.f32.mrf.mxu2 }
 0x2d4   : > { %v4856_v46 = vpop.f32.mrf.mxu1  ;;  %v4861_v57 = vpop.f32.mrf.mxu3 }
 0x2d6   : > { %v4863_v4 = vpop.f32.mrf.mxu0 }
 0x2d8   : > { %1845 = vmatmul.bf16.gmra.mxu1 %v5718_v7 }
 0x2db   : > { %v4865_v21 = vpop.f32.mrf.mxu2 }
 0x2dc   : > { %v1502_v3 = vpop.f32.mrf.mxu1  ;;  %v4867_v39 = vpop.f32.mrf.mxu3 }
 0x2de   : > { %v4869_v5 = vpop.f32.mrf.mxu0 }
 0x2e3   : > { %v1591_v2 = vpop.f32.mrf.mxu2 }
 0x2e4   : > { %v1504_v11 = vpop.f32.mrf.mxu1  ;;  %v1680_v12 = vpop.f32.mrf.mxu3 }
 0x2e6   : > { %v1769_v61 = vpop.f32.mrf.mxu0 }
 0x2e8   : > { %1850 = vmatmul.bf16.gmra.mxu1 %v5719_v53  ;;  %v1426_v53 = vadd.f32 %v5724_v30, %v5723_v27 }
 0x2eb   : > { %v1593_v29 = vpop.f32.mrf.mxu2 }
 0x2ec   : > { %v1507_v55 = vpop.f32.mrf.mxu1  ;;  %v1682_v47 = vpop.f32.mrf.mxu3 }
 0x2ee   : > { %v1771_v33 = vpop.f32.mrf.mxu0 }
 0x2f3   : > { %v1596_v44 = vpop.f32.mrf.mxu2 }
 0x2f4   : > { %v1509_v16 = vpop.f32.mrf.mxu1  ;;  %v1685_v42 = vpop.f32.mrf.mxu3 }
 0x2f5   : > { %v1510_v28 = vadd.f32 %v1509_v16, %v1421_v31 }
 0x2f6   : > { %v1774_v54 = vpop.f32.mrf.mxu0 }
 0x2f8   : > { %1855 = vmatmul.bf16.gmra.mxu1 %v5720_v40  ;;  %v5726_v40 = vld [vmem:[#allocation12_spill] sm:$0xff] }
 0x2f9   : > { %v1419_v10 = vadd.f32 %v5727_v20, %v5726_v40 }
 0x2fb   : > { %v1598_v32 = vpop.f32.mrf.mxu2  ;;  %v1508_v63 = vadd.f32 %v1507_v55, %v1419_v10 }
 0x2fc   : > { %v1512_v19 = vpop.f32.mrf.mxu1  ;;  %v1687_v41 = vpop.f32.mrf.mxu3 }
 0x2fd   : > { %v1513_v0 = vadd.f32 %v1512_v19, %v1424_v8  ;;  %v1814_v27 = vpack.c.bf16 %v1510_v28, %v1508_v63  ;;  %v5730_v19 = vld [vmem:[#allocation10_spill] sm:$0xff]  ;;  %v1688_v38 = vadd.f32 %v1687_v41, %v1598_v32  ;;  %v1681_v28 = vadd.f32 %v1680_v12, %v1591_v2  ;;  %v5741_v32 = vld [vmem:[#allocation84_spill] sm:$0xff] }
 0x2fe   : > { %v1776_v7 = vpop.f32.mrf.mxu0  ;;  %v1678_v2 = vadd.f32 %v4867_v39, %v4865_v21  ;;  %v1666_v21 = vadd.f32 %v4824_v23, %v4819_v60  ;;  %v1661_v60 = vadd.f32 %v4800_v6, %v4789_v51  ;;  %v1663_v23 = vadd.f32 %v4813_v15, %v4808_v26  ;;  %v5750_v51 = vld [vmem:[#allocation16_spill] sm:$0xff]  ;;  %v5751_v6 = vld [vmem:[#allocation38_spill] sm:$0xff]  ;;  %v5753_v15 = vld [vmem:[#allocation51_spill] sm:$0xff] }
 0x2ff   : > { %v1777_v63 = vadd.f32 %v1776_v7, %v1688_v38  ;;  %v1676_v7 = vadd.f32 %v4861_v57, %v4858_v36  ;;  %v5742_v36 = vld [vmem:[#allocation85_spill] sm:$0xff]  ;;  %v5752_v26 = vld [vmem:[#allocation62_spill] sm:$0xff] }
 0x300   : > { %v1406_v57 = vadd.f32 %v5742_v36, %v5741_v32  ;;  %v5754_v38 = vld [vmem:[#allocation14_spill] sm:$0xff] }
 0x301   : > { %v5769_v32 = vld [vmem:[#allocation70_spill] sm:$0xff] }
 0x303   : > { %v1601_v45 = vpop.f32.mrf.mxu2 }
 0x304   : > { %v1514_v52 = vpop.f32.mrf.mxu1  ;;  %v1690_v9 = vpop.f32.mrf.mxu3 }
 0x305   : > { %v1515_v49 = vadd.f32 %v1514_v52, %v1426_v53  ;;  %v1691_v30 = vadd.f32 %v1690_v9, %v1601_v45  ;;  %v5731_v52 = vld [vmem:[#allocation17_spill] sm:$0xff]  ;;  %v5733_v53 = vld [vmem:[#allocation23_spill] sm:$0xff] }
 0x306   : > { %v1779_v14 = vpop.f32.mrf.mxu0  ;;  %v5734_v9 = vld [vmem:[#allocation59_spill] sm:$0xff] }
 0x307   : > { %v1815_v59 = vpack.c.bf16 %v1515_v49, %v1513_v0  ;;  %v1414_v0 = vadd.f32 %v5731_v52, %v5730_v19  ;;  %v5732_v49 = vld [vmem:[#allocation21_spill] sm:$0xff]  ;;  %v1780_v40 = vadd.f32 %v1779_v14, %v1691_v30  ;;  %v1683_v19 = vadd.f32 %v1682_v47, %v1593_v29  ;;  %v5735_v52 = vld [vmem:[#allocation86_spill] sm:$0xff]  ;;  %v5744_v30 = vld [vmem:[#allocation76_spill] sm:$0xff] }
 0x308   : > { %1860 = vmatmul.bf16.gmra.mxu1 %v5725_v58  ;;  %v1416_v8 = vadd.f32 %v5733_v53, %v5732_v49  ;;  %v5736_v49 = vld [vmem:[#allocation87_spill] sm:$0xff]  ;;  %v5737_v53 = vld [vmem:[#allocation18_spill] sm:$0xff]  ;;  %v1671_v29 = vadd.f32 %v4844_v50, %v4841_v25  ;;  %v1668_v25 = vadd.f32 %v4835_v43, %v4830_v37 }
 0x309   : > { %1921 = vmatpush.bf16.xpose.msrb.mxu2 %v1815_v59  ;;  %v1686_v59 = vadd.f32 %v1685_v42, %v1596_v44  ;;  %v1503_v31 = vadd.f32 %v1502_v3, %v1414_v0  ;;  %v1772_v3 = vadd.f32 %v1771_v33, %v1683_v19  ;;  %v1765_v44 = vadd.f32 %v4863_v4, %v1676_v7  ;;  %v5739_v42 = vld [vmem:[#allocation81_spill] sm:$0xff] }
 0x30a   : > { %v1505_v20 = vadd.f32 %v1504_v11, %v1416_v8  ;;  %v5738_v11 = vld [vmem:[#allocation19_spill] sm:$0xff]  ;;  %v1760_v50 = vadd.f32 %v4846_v13, %v1671_v29  ;;  %v5745_v0 = vld [vmem:[#allocation77_spill] sm:$0xff] }
 0x30b   : > { %v1603_v22 = vpop.f32.mrf.mxu2  ;;  %v1775_v10 = vadd.f32 %v1774_v54, %v1686_v59  ;;  %v1411_v14 = vadd.f32 %v5738_v11, %v5737_v53  ;;  %v5746_v8 = vld [vmem:[#allocation79_spill] sm:$0xff]  ;;  %v1658_v59 = vadd.f32 %v5751_v6, %v5750_v51  ;;  %v5764_v29 = vld [vmem:[#allocation49_spill] sm:$0xff] }
 0x30c   : > { %v1692_v58 = vpop.f32.mrf.mxu3  ;;  %v1813_v45 = vpack.c.bf16 %v1505_v20, %v1503_v31  ;;  %v1752_v31 = vadd.f32 %v5754_v38, %v1663_v23  ;;  %v5759_v11 = vld [vmem:[#allocation71_spill] sm:$0xff] }
 0x30d   : > { %v1693_v24 = vadd.f32 %v1692_v58, %v1603_v22  ;;  %v1830_v22 = vpack.c.bf16 %v1777_v63, %v1775_v10  ;;  %v1770_v58 = vadd.f32 %v1769_v61, %v1681_v28  ;;  %v1767_v61 = vadd.f32 %v4869_v5, %v1678_v2  ;;  %v5755_v10 = vld [vmem:[#allocation63_spill] sm:$0xff]  ;;  %v5757_v28 = vld [vmem:[#allocation48_spill] sm:$0xff]  ;;  %v5763_v2 = vld [vmem:[#allocation9_spill] sm:$0xff] }
 0x30e   : > { %v1781_v48 = vpop.f32.mrf.mxu0  ;;  %v1495_v5 = vadd.f32 %v4839_v62, %v1406_v57  ;;  %v5747_v62 = vld [vmem:[#allocation80_spill] sm:$0xff]  ;;  %v5770_v57 = vld [vmem:[#allocation39_spill] sm:$0xff] }
 0x30f   : > { %v1782_v16 = vadd.f32 %v1781_v48, %v1693_v24  ;;  %v1500_v24 = vadd.f32 %v4856_v46, %v1411_v14  ;;  %v1829_v47 = vpack.c.bf16 %v1772_v3, %v1770_v58  ;;  %v5740_v46 = vld [vmem:[#allocation82_spill] sm:$0xff]  ;;  %v1828_v4 = vpack.c.bf16 %v1767_v61, %v1765_v44  ;;  %v5760_v14 = vld [vmem:[#allocation72_spill] sm:$0xff]  ;;  %v5762_v3 = vld [vmem:[#allocation75_spill] sm:$0xff] }
 0x310   : > { %v1404_v54 = vadd.f32 %v5740_v46, %v5739_v42  ;;  %v1401_v20 = vadd.f32 %v5747_v62, %v5746_v8  ;;  %v5761_v58 = vld [vmem:[#allocation74_spill] sm:$0xff]  ;;  %v5765_v61 = vld [vmem:[#allocation65_spill] sm:$0xff]  ;;  %v5767_v42 = vld [vmem:[#allocation67_spill] sm:$0xff] }
 0x311   : > { %1922 = vmatpush.bf16.xpose.msrb.mxu2 %v1814_v27  ;;  %v1831_v55 = vpack.c.bf16 %v1782_v16, %v1780_v40  ;;  %v1409_v27 = vadd.f32 %v5736_v49, %v5735_v52  ;;  %v5749_v40 = vld [vmem:[#allocation46_spill] sm:$0xff]  ;;  %v5758_v52 = vld [vmem:[#allocation45_spill] sm:$0xff] }
 0x312   : > { %v1493_v41 = vadd.f32 %v4828_v56, %v1404_v54  ;;  %v5748_v56 = vld [vmem:[#allocation44_spill] sm:$0xff]  ;;  %v1490_v63 = vadd.f32 %v5755_v10, %v1401_v20  ;;  %v1747_v49 = vadd.f32 %v5758_v52, %v1658_v59  ;;  %v5768_v54 = vld [vmem:[#allocation69_spill] sm:$0xff] }
 0x313   : > { %2711 = vmatpush.bf16.msrb.mxu0 %v1831_v55  ;;  %v1498_v12 = vadd.f32 %v4848_v17, %v1409_v27  ;;  %v1673_v17 = vadd.f32 %v4852_v35, %v4850_v18  ;;  %v1755_v18 = vadd.f32 %v4826_v34, %v1666_v21  ;;  %v5743_v35 = vld [vmem:[#allocation64_spill] sm:$0xff]  ;;  %v1656_v48 = vadd.f32 %v5749_v40, %v5748_v56  ;;  %v5774_v56 = vld [vmem:[#allocation73_spill] sm:$0xff] }
 0x314   : > { %v1757_v37 = vadd.f32 %v5743_v35, %v1668_v25  ;;  %v1811_v13 = vpack.c.bf16 %v1495_v5, %v1493_v41  ;;  %v1750_v34 = vadd.f32 %v5753_v15, %v1661_v60  ;;  %v1391_v36 = vadd.f32 %v5769_v32, %v5768_v54  ;;  %v5771_v25 = vld [vmem:[#allocation35_spill] sm:$0xff]  ;;  %v5772_v35 = vld [vmem:[#allocation68_spill] sm:$0xff]  ;;  %v5775_v40 = vld [vmem:[#allocation37_spill] sm:$0xff] }
 0x315   : > { %v1812_v33 = vpack.c.bf16 %v1500_v24, %v1498_v12  ;;  %v1762_v39 = vadd.f32 %v4854_v1, %v1673_v17  ;;  %v1399_v1 = vadd.f32 %v5745_v0, %v5744_v30  ;;  %v1745_v19 = vadd.f32 %v5757_v28, %v1656_v48  ;;  %v5777_v10 = vld [vmem:[#allocation41_spill] sm:$0xff] }
 0x316   : > { %v1826_v16 = vpack.c.bf16 %v1757_v37, %v1755_v18  ;;  %v1825_v27 = vpack.c.bf16 %v1752_v31, %v1750_v34  ;;  %v1396_v24 = vadd.f32 %v5762_v3, %v5761_v58  ;;  %v1480_v21 = vadd.f32 %v5770_v57, %v1391_v36  ;;  %v5773_v37 = vld [vmem:[#allocation33_spill] sm:$0xff] }
 0x317   : > { %2712 = vmatpush.bf16.msrb.mxu0 %v1830_v22  ;;  %v1827_v43 = vpack.c.bf16 %v1762_v39, %v1760_v50  ;;  %v1394_v22 = vadd.f32 %v5760_v14, %v5759_v11  ;;  %v1824_v7 = vpack.c.bf16 %v1747_v49, %v1745_v19  ;;  %v2010_v17 = vlaneseq  ;;  %v5779_v11 = vld [vmem:[#allocation47_spill] sm:$0xff] }
 0x318   : > { %1865 = vmatmul.bf16.gmra.mxu1 %v5734_v9  ;;  %v1485_v12 = vadd.f32 %v5763_v2, %v1396_v24 }
 0x319   : > { %1923 = vmatpush.bf16.xpose.msrb.mxu2 %v1813_v45  ;;  %v5756_v45 = vld [vmem:[#allocation57_spill] sm:$0xff]  ;;  %v4949_v39 = vshrl.u32 %v2010_v17, 7  ;;  %v4951_v5 = vand.u32 127, %v2010_v17 }
 0x31a   : > { %v1488_v55 = vadd.f32 %v5756_v45, %v1399_v1 }
 0x31b   : > { %2713 = vmatpush.bf16.msrb.mxu0 %v1829_v47  ;;  %v1483_v47 = vadd.f32 %v5764_v29, %v1394_v22  ;;  %vm2046_vm0 = vcmp.ge.s32.totalorder %v4949_v39, %v4951_v5  ;;  %v2012_v18 = vadd.s32 8, %v4949_v39  ;;  %v2013_v0 = vadd.s32 16, %v4949_v39  ;;  %v5780_v29 = vld [vmem:[#allocation88_spill] sm:$0xff] }
 0x31c   : > { %v1810_v53 = vpack.c.bf16 %v1490_v63, %v1488_v55  ;;  %v2014_v20 = vadd.s32 24, %v4949_v39  ;;  %v2015_v59 = vadd.s32 32, %v4949_v39  ;;  %v2016_v31 = vadd.s32 40, %v4949_v39 }
 0x31d   : > { %v1809_v44 = vpack.c.bf16 %v1485_v12, %v1483_v47  ;;  %vm2048_vm1 = vcmp.ge.s32.totalorder %v2012_v18, %v4951_v5  ;;  %vm2050_vm2 = vcmp.ge.s32.totalorder %v2013_v0, %v4951_v5  ;;  %v2017_v28 = vadd.s32 48, %v4949_v39  ;;  %v5781_v47 = vld [vmem:[#allocation53_spill] sm:$0xff] }
 0x31e   : > { %vm2052_vm3 = vcmp.ge.s32.totalorder %v2014_v20, %v4951_v5  ;;  %vm2054_vm4 = vcmp.ge.s32.totalorder %v2015_v59, %v4951_v5  ;;  %vm2056_vm5 = vcmp.ge.s32.totalorder %v2016_v31, %v4951_v5  ;;  %v2019_v3 = vadd.s32 64, %v4949_v39 }
 0x31f   : > { %2714 = vmatpush.bf16.msrb.mxu0 %v1828_v4  ;;  %vm2058_vm6 = vcmp.ge.s32.totalorder %v2017_v28, %v4951_v5  ;;  %v2020_v12 = vadd.s32 72, %v4949_v39  ;;  %v2022_v57 = vadd.s32 88, %v4949_v39 }
 0x320   : > { %vm2062_vm8 = vcmp.ge.s32.totalorder %v2019_v3, %v4951_v5 }
 0x321   : > { %1924 = vmatpush.bf16.xpose.msrb.mxu2 %v1812_v33  ;;  %v5766_v33 = vld [vmem:[#allocation66_spill] sm:$0xff]  ;;  %vm2064_vm9 = vcmp.ge.s32.totalorder %v2020_v12, %v4951_v5  ;;  %vm2068_vm11 = vcmp.ge.s32.totalorder %v2022_v57, %v4951_v5 }
 0x322   : > { %v1389_v46 = vadd.f32 %v5767_v42, %v5766_v33 }
 0x323   : > { %2715 = vmatpush.bf16.msrb.mxu0 %v1827_v43 }
 0x324   : > { %v1478_v50 = vadd.f32 %v5771_v25, %v1389_v46  ;;  %v2021_v46 = vadd.s32 80, %v4949_v39 }
 0x326   : > { %v1808_v4 = vpack.c.bf16 %v1480_v21, %v1478_v50  ;;  %vm2066_vm10 = vcmp.ge.s32.totalorder %v2021_v46, %v4951_v5  ;;  %v5782_v21 = vld [vmem:[#allocation22_spill] sm:$0xff] }
 0x327   : > { %2716 = vmatpush.bf16.msrb.mxu0 %v1826_v16  ;;  %v5776_v16 = vld [vmem:[#allocation78_spill] sm:$0xff] }
 0x328   : > { %1870 = vmatmul.bf16.gmra.mxu1 %v5752_v26 }
 0x329   : > { %1925 = vmatpush.bf16.xpose.msrb.mxu2 %v1811_v13 }
 0x32b   : > { %2717 = vmatpush.bf16.msrb.mxu0 %v1825_v27  ;;  %v2018_v27 = vadd.s32 56, %v4949_v39 }
 0x32d   : > { %vm2060_vm7 = vcmp.ge.s32.totalorder %v2018_v27, %v4951_v5 }
 0x32f   : > { %2718 = vmatpush.bf16.msrb.mxu0 %v1824_v7 }
 0x331   : > { %1926 = vmatpush.bf16.xpose.msrb.mxu2 %v1810_v53  ;;  %v5778_v53 = vld [vmem:[#allocation83_spill] sm:$0xff] }
 0x338   : > { %1875 = vmatmul.bf16.gmra.mxu1 %v5765_v61 }
 0x339   : > { %1927 = vmatpush.bf16.xpose.msrb.mxu2 %v1809_v44 }
 0x341   : > { %1928 = vmatpush.bf16.xpose.msrb.mxu2 %v1808_v4  ;;  %v2023_v4 = vadd.s32 96, %v4949_v39 }
 0x343   : > { %vm2070_vm12 = vcmp.ge.s32.totalorder %v2023_v4, %v4951_v5 }
 0x345   : > { %v1841_v41 = vpop.f32.mrf.mxu1 }
 0x346   : > { %v4955_v60 = vsel %vm2046_vm0, %v1841_v41, -1e+30 }
 0x347   : > { %v2174_v23 = vmax.f32 %v4955_v60, -1e+30 }
 0x348   : > { %1880 = vmatmul.bf16.gmra.mxu1 %v5772_v35  ;;  %1929 = vmatmul.bf16.vlgmr.msrb.gmra.mxu2 %v5773_v37  ;;  %v5783_v37 = vld [vmem:[#allocation26_spill] sm:$0xff] }
 0x349   : > { %2175 = vmax.xlane.f32.xlu0 %v2174_v23 }
 0x34d   : > { %v1843_v43 = vpop.f32.mrf.mxu1 }
 0x34e   : > { %v4962_v13 = vsel %vm2048_vm1, %v1843_v43, -1e+30 }
 0x34f   : > { %v2177_v30 = vmax.f32 %v4962_v13, -1e+30 }
 0x351   : > { %2178 = vmax.xlane.f32.xlu0 %v2177_v30 }
 0x355   : > { %v1846_v1 = vpop.f32.mrf.mxu1 }
 0x356   : > { %v4967_v8 = vsel %vm2050_vm2, %v1846_v1, -1e+30  ;;  %v2025_v1 = vadd.s32 112, %v4949_v39 }
 0x357   : > { %v2180_v62 = vmax.f32 %v4967_v8, -1e+30 }
 0x358   : > { %1885 = vmatmul.bf16.gmra.mxu1 %v5774_v56  ;;  %1934 = vmatmul.bf16.gmra.mxu2 %v5775_v40  ;;  %vm2074_vm14 = vcmp.ge.s32.totalorder %v2025_v1, %v4951_v5 }
 0x359   : > { %2181 = vmax.xlane.f32.xlu1 %v2180_v62 }
 0x35d   : > { %v1848_v48 = vpop.f32.mrf.mxu1 }
 0x35e   : > { %v4974_v51 = vsel %vm2052_vm3, %v1848_v48, -1e+30  ;;  %v5784_v48 = vld [vmem:[#allocation30_spill] sm:$0xff] }
 0x35f   : > { %v2183_v6 = vmax.f32 %v4974_v51, -1e+30 }
 0x361   : > { %2184 = vmax.xlane.f32.xlu1 %v2183_v6 }
 0x365   : > { %v1851_v15 = vpop.f32.mrf.mxu1 }
 0x366   : > { %v4979_v34 = vsel %vm2054_vm4, %v1851_v15, -1e+30 }
 0x367   : > { %v2186_v38 = vmax.f32 %v4979_v34, -1e+30 }
 0x368   : > { %1890 = vmatmul.bf16.gmra.mxu1 %v5776_v16  ;;  %1939 = vmatmul.bf16.gmra.mxu2 %v5777_v10 }
 0x369   : > { %2187 = vmax.xlane.f32.xlu2 %v2186_v38 }
 0x36d   : > { %v1853_v63 = vpop.f32.mrf.mxu1 }
 0x36e   : > { %v4986_v45 = vsel %vm2056_vm5, %v1853_v63, -1e+30 }
 0x36f   : > { %v2189_v55 = vmax.f32 %v4986_v45, -1e+30 }
 0x371   : > { %2190 = vmax.xlane.f32.xlu2 %v2189_v55 }
 0x375   : > { %v1856_v19 = vpop.f32.mrf.mxu1 }
 0x376   : > { %v4991_v52 = vsel %vm2058_vm6, %v1856_v19, -1e+30 }
 0x377   : > { %v2192_v49 = vmax.f32 %v4991_v52, -1e+30 }
 0x378   : > { %1895 = vmatmul.bf16.gmra.mxu1 %v5778_v53  ;;  %1944 = vmatmul.bf16.gmra.mxu2 %v5779_v11 }
 0x379   : > { %2193 = vmax.xlane.f32.xlu0 %v2192_v49 }
 0x37d   : > { %v1858_v14 = vpop.f32.mrf.mxu1 }
 0x37e   : > { %v4998_v22 = vsel %vm2060_vm7, %v1858_v14, -1e+30 }
 0x37f   : > { %v2195_v58 = vmax.f32 %v4998_v22, -1e+30 }
 0x381   : > { %2196 = vmax.xlane.f32.xlu1 %v2195_v58 }
 0x385   : > { %v1861_v24 = vpop.f32.mrf.mxu1 }
 0x386   : > { %v5003_v7 = vsel %vm2062_vm8, %v1861_v24, -1e+30 }
 0x387   : > { %v2198_v2 = vmax.f32 %v5003_v7, -1e+30 }
 0x388   : > { %1900 = vmatmul.bf16.gmra.mxu1 %v5780_v29  ;;  %1949 = vmatmul.bf16.gmra.mxu2 %v5781_v47 }
 0x389   : > { %2199 = vmax.xlane.f32.xlu2 %v2198_v2 }
 0x38d   : > { %v1863_v44 = vpop.f32.mrf.mxu1 }
 0x38e   : > { %v5010_v33 = vsel %vm2064_vm9, %v1863_v44, -1e+30 }
 0x38f   : > { %v2201_v42 = vmax.f32 %v5010_v33, -1e+30 }
 0x391   : > { %2202 = vmax.xlane.f32.xlu0 %v2201_v42 }
 0x395   : > { %v1866_v54 = vpop.f32.mrf.mxu1 }
 0x396   : > { %v5015_v32 = vsel %vm2066_vm10, %v1866_v54, -1e+30 }
 0x397   : > { %v2204_v36 = vmax.f32 %v5015_v32, -1e+30 }
 0x398   : > { %1905 = vmatmul.bf16.gmra.mxu1 %v5782_v21  ;;  %1954 = vmatmul.bf16.gmra.mxu2 %v5734_v9  ;;  %v2024_v9 = vadd.s32 104, %v4949_v39 }
 0x399   : > { %2205 = vmax.xlane.f32.xlu1 %v2204_v36 }
 0x39a   : > { %vm2072_vm13 = vcmp.ge.s32.totalorder %v2024_v9, %v4951_v5 }
 0x39d   : > { %v1868_v17 = vpop.f32.mrf.mxu1 }
 0x39e   : > { %v5022_v25 = vsel %vm2068_vm11, %v1868_v17, -1e+30 }
 0x39f   : > { %v2207_v50 = vmax.f32 %v5022_v25, -1e+30 }
 0x3a1   : > { %2208 = vmax.xlane.f32.xlu2 %v2207_v50 }
 0x3a5   : > { %v1871_v41 = vpop.f32.mrf.mxu1 }
 0x3a6   : > { %v5027_v23 = vsel %vm2070_vm12, %v1871_v41, -1e+30 }
 0x3a7   : > { %v2210_v18 = vmax.f32 %v5027_v23, -1e+30 }
 0x3a8   : > { %1910 = vmatmul.bf16.gmra.mxu1 %v5783_v37  ;;  %1959 = vmatmul.bf16.gmra.mxu2 %v5752_v26  ;;  %v2026_v26 = vadd.s32 120, %v4949_v39 }
 0x3a9   : > { %2211 = vmax.xlane.f32.xlu0 %v2210_v18 }
 0x3aa   : > { %vm2076_vm15 = vcmp.ge.s32.totalorder %v2026_v26, %v4951_v5 }
 0x3ad   : > { %v1873_v43 = vpop.f32.mrf.mxu1 }
 0x3ae   : > { %v5034_v30 = vsel %vm2072_vm13, %v1873_v43, -1e+30 }
 0x3af   : > { %v2213_v0 = vmax.f32 %v5034_v30, -1e+30 }
 0x3b1   : > { %2214 = vmax.xlane.f32.xlu1 %v2213_v0 }
 0x3b5   : > { %v1876_v62 = vpop.f32.mrf.mxu1 }
 0x3b6   : > { %v5039_v20 = vsel %vm2074_vm14, %v1876_v62, -1e+30 }
 0x3b7   : > { %v2216_v40 = vmax.f32 %v5039_v20, -1e+30 }
 0x3b8   : > { %1915 = vmatmul.bf16.gmra.mxu1 %v5784_v48  ;;  %1964 = vmatmul.bf16.gmra.mxu2 %v5765_v61 }
 0x3b9   : > { %2217 = vmax.xlane.f32.xlu2 %v2216_v40 }
 0x3bc   : > { %v2176_v6 = vpop.xlane.xlu0 %2175 }
 0x3bd   : > { %v2270_v59 = vsub.f32 %v4955_v60, %v2176_v6  ;;  %v2271_v15 = vsub.f32 -1e+30, %v2176_v6  ;;  %v1878_v38 = vpop.f32.mrf.mxu1 }
 0x3be   : > { %v5047_v31 = vsel %vm2076_vm15, %v1878_v38, -1e+30 }
 0x3bf   : > { %v2334_v10 = vmul.f32 1.442695, %v2270_v59  ;;  %v2336_v63 = vmul.f32 1.442695, %v2271_v15  ;;  %v2219_v55 = vmax.f32 %v5047_v31, -1e+30 }
 0x3c1   : > { %3633 = vpow2.f32 %v2334_v10  ;;  %2220 = vmax.xlane.f32.xlu0 %v2219_v55 }
 0x3c2   : > { %3635 = vpow2.f32 %v2336_v63 }
 0x3c4   : > { %v2179_v28 = vpop.xlane.xlu0 %2178 }
 0x3c5   : > { %v2272_v61 = vsub.f32 %v4962_v13, %v2179_v28  ;;  %v2273_v19 = vsub.f32 -1e+30, %v2179_v28 }
 0x3c7   : > { %v3634_v49 = vpop.eup %3633  ;;  %v2338_v27 = vmul.f32 1.442695, %v2272_v61  ;;  %v2340_v11 = vmul.f32 1.442695, %v2273_v19 }
 0x3c8   : > { %v3636_v14 = vpop.eup %3635  ;;  %1969 = vmatmul.bf16.gmra.mxu2 %v5772_v35 }
 0x3c9   : > { %3637 = vpow2.f32 %v2338_v27  ;;  %v5052_v60 = vadd.f32 %v3636_v14, %v3634_v49 }
 0x3ca   : > { %3639 = vpow2.f32 %v2340_v11 }
 0x3cb   : > { %v1930_v58 = vpop.f32.mrf.mxu2 }
 0x3cc   : > { %v2182_v3 = vpop.xlane.xlu1 %2181 }
 0x3cd   : > { %v2274_v24 = vsub.f32 %v4967_v8, %v2182_v3  ;;  %v2275_v2 = vsub.f32 -1e+30, %v2182_v3 }
 0x3cf   : > { %v3638_v12 = vpop.eup %3637  ;;  %v2342_v47 = vmul.f32 1.442695, %v2274_v24  ;;  %v2344_v44 = vmul.f32 1.442695, %v2275_v2 }
 0x3d0   : > { %v3640_v13 = vpop.eup %3639  ;;  %v2590_v42 = vpack.c.bf16 %v3638_v12, %v3634_v49 }
 0x3d1   : > { %v2591_v46 = vpack.c.bf16 %v3640_v13, %v3636_v14  ;;  %3641 = vpow2.f32 %v2342_v47  ;;  %v5055_v54 = vadd.f32 %v3640_v13, %v3638_v12 }
 0x3d2   : > { %3643 = vpow2.f32 %v2344_v44  ;;  %2630 = vmatmul.bf16.vlgmr.msrb.gmra.mxu3 %v2590_v42 }
 0x3d3   : > { %2719 = vmatmul.bf16.vlgmr.msrb.gmra.mxu0 %v2591_v46  ;;  %v1932_v35 = vpop.f32.mrf.mxu2 }
 0x3d4   : > { %v2185_v36 = vpop.xlane.xlu1 %2184 }
 0x3d5   : > { %v2276_v57 = vsub.f32 %v4974_v51, %v2185_v36  ;;  %v2277_v17 = vsub.f32 -1e+30, %v2185_v36 }
 0x3d7   : > { %v3642_v50 = vpop.eup %3641  ;;  %v2346_v8 = vmul.f32 1.442695, %v2276_v57  ;;  %v2348_v4 = vmul.f32 1.442695, %v2277_v17 }
 0x3d8   : > { %v3644_v41 = vpop.eup %3643  ;;  %1974 = vmatmul.bf16.gmra.mxu2 %v5774_v56 }
 0x3d9   : > { %3645 = vpow2.f32 %v2346_v8  ;;  %v5059_v18 = vadd.f32 %v3644_v41, %v3642_v50 }
 0x3da   : > { %3647 = vpow2.f32 %v2348_v4 }
 0x3db   : > { %v1935_v9 = vpop.f32.mrf.mxu2 }
 0x3dc   : > { %v2188_v43 = vpop.xlane.xlu2 %2187 }
 0x3dd   : > { %v2278_v0 = vsub.f32 %v4979_v34, %v2188_v43  ;;  %v2279_v1 = vsub.f32 -1e+30, %v2188_v43 }
 0x3df   : > { %v3646_v62 = vpop.eup %3645  ;;  %v2350_v40 = vmul.f32 1.442695, %v2278_v0  ;;  %v2352_v26 = vmul.f32 1.442695, %v2279_v1 }
 0x3e0   : > { %v3648_v51 = vpop.eup %3647  ;;  %v2592_v6 = vpack.c.bf16 %v3646_v62, %v3642_v50 }
 0x3e1   : > { %3649 = vpow2.f32 %v2350_v40  ;;  %v2593_v59 = vpack.c.bf16 %v3648_v51, %v3644_v41  ;;  %v5062_v15 = vadd.f32 %v3648_v51, %v3646_v62 }
 0x3e2   : > { %3651 = vpow2.f32 %v2352_v26  ;;  %2635 = vmatmul.bf16.gmra.mxu3 %v2592_v6 }
 0x3e3   : > { %2724 = vmatmul.bf16.gmra.mxu0 %v2593_v59  ;;  %v1937_v56 = vpop.f32.mrf.mxu2 }
 0x3e4   : > { %v2191_v38 = vpop.xlane.xlu2 %2190 }
 0x3e5   : > { %v2280_v10 = vsub.f32 %v4986_v45, %v2191_v38  ;;  %v2281_v63 = vsub.f32 -1e+30, %v2191_v38 }
 0x3e7   : > { %v3650_v55 = vpop.eup %3649  ;;  %v2354_v34 = vmul.f32 1.442695, %v2280_v10  ;;  %v2356_v28 = vmul.f32 1.442695, %v2281_v63 }
 0x3e8   : > { %v3652_v61 = vpop.eup %3651  ;;  %1979 = vmatmul.bf16.gmra.mxu2 %v5776_v16 }
 0x3e9   : > { %3653 = vpow2.f32 %v2354_v34  ;;  %v5066_v19 = vadd.f32 %v3652_v61, %v3650_v55 }
 0x3ea   : > { %3655 = vpow2.f32 %v2356_v28 }
 0x3eb   : > { %v1940_v49 = vpop.f32.mrf.mxu2 }
 0x3ec   : > { %v2194_v27 = vpop.xlane.xlu0 %2193 }
 0x3ed   : > { %v2282_v11 = vsub.f32 %v4991_v52, %v2194_v27  ;;  %v2283_v14 = vsub.f32 -1e+30, %v2194_v27 }
 0x3ef   : > { %v3654_v58 = vpop.eup %3653  ;;  %v2358_v3 = vmul.f32 1.442695, %v2282_v11  ;;  %v2360_v24 = vmul.f32 1.442695, %v2283_v14 }
 0x3f0   : > { %v3656_v45 = vpop.eup %3655  ;;  %v2594_v2 = vpack.c.bf16 %v3654_v58, %v3650_v55 }
 0x3f1   : > { %3657 = vpow2.f32 %v2358_v3  ;;  %v2595_v12 = vpack.c.bf16 %v3656_v45, %v3652_v61  ;;  %v5069_v47 = vadd.f32 %v3656_v45, %v3654_v58 }
 0x3f2   : > { %3659 = vpow2.f32 %v2360_v24  ;;  %2640 = vmatmul.bf16.gmra.mxu3 %v2594_v2 }
 0x3f3   : > { %2729 = vmatmul.bf16.gmra.mxu0 %v2595_v12  ;;  %v1942_v16 = vpop.f32.mrf.mxu2 }
 0x3f4   : > { %v2197_v44 = vpop.xlane.xlu1 %2196 }
 0x3f5   : > { %v2284_v13 = vsub.f32 %v4998_v22, %v2197_v44  ;;  %v2285_v42 = vsub.f32 -1e+30, %v2197_v44 }
 0x3f7   : > { %v3658_v46 = vpop.eup %3657  ;;  %v2362_v52 = vmul.f32 1.442695, %v2284_v13  ;;  %v2364_v35 = vmul.f32 1.442695, %v2285_v42 }
 0x3f8   : > { %v3660_v36 = vpop.eup %3659  ;;  %1984 = vmatmul.bf16.gmra.mxu2 %v5778_v53 }
 0x3f9   : > { %3661 = vpow2.f32 %v2362_v52  ;;  %v5073_v57 = vadd.f32 %v3660_v36, %v3658_v46 }
 0x3fa   : > { %3663 = vpow2.f32 %v2364_v35 }
 0x3fb   : > { %v1945_v17 = vpop.f32.mrf.mxu2 }
 0x3fc   : > { %v2200_v50 = vpop.xlane.xlu2 %2199 }
 0x3fd   : > { %v2286_v8 = vsub.f32 %v5003_v7, %v2200_v50  ;;  %v2287_v4 = vsub.f32 -1e+30, %v2200_v50 }
 0x3ff   : > { %v3662_v41 = vpop.eup %3661  ;;  %v2366_v9 = vmul.f32 1.442695, %v2286_v8  ;;  %v2368_v43 = vmul.f32 1.442695, %v2287_v4 }
 0x400   : > { %v3664_v22 = vpop.eup %3663  ;;  %v2596_v0 = vpack.c.bf16 %v3662_v41, %v3658_v46 }
 0x401   : > { %3665 = vpow2.f32 %v2366_v9  ;;  %v2597_v1 = vpack.c.bf16 %v3664_v22, %v3660_v36  ;;  %v5076_v62 = vadd.f32 %v3664_v22, %v3662_v41 }
 0x402   : > { %3667 = vpow2.f32 %v2368_v43  ;;  %2645 = vmatmul.bf16.gmra.mxu3 %v2596_v0 }
 0x403   : > { %2734 = vmatmul.bf16.gmra.mxu0 %v2597_v1  ;;  %v1947_v53 = vpop.f32.mrf.mxu2 }
 0x404   : > { %v2203_v40 = vpop.xlane.xlu0 %2202 }
 0x405   : > { %v2288_v26 = vsub.f32 %v5010_v33, %v2203_v40  ;;  %v2289_v51 = vsub.f32 -1e+30, %v2203_v40 }
 0x407   : > { %v3666_v6 = vpop.eup %3665  ;;  %v2370_v7 = vmul.f32 1.442695, %v2288_v26  ;;  %v2372_v59 = vmul.f32 1.442695, %v2289_v51 }
 0x408   : > { %v3668_v56 = vpop.eup %3667  ;;  %1989 = vmatmul.bf16.gmra.mxu2 %v5780_v29 }
 0x409   : > { %3669 = vpow2.f32 %v2370_v7  ;;  %v5080_v38 = vadd.f32 %v3668_v56, %v3666_v6 }
 0x40a   : > { %3671 = vpow2.f32 %v2372_v59 }
 0x40b   : > { %v1950_v10 = vpop.f32.mrf.mxu2 }
 0x40c   : > { %v2206_v63 = vpop.xlane.xlu1 %2205 }
 0x40d   : > { %v2290_v55 = vsub.f32 %v5015_v32, %v2206_v63  ;;  %v2291_v34 = vsub.f32 -1e+30, %v2206_v63 }
 0x40f   : > { %v3670_v28 = vpop.eup %3669  ;;  %v2374_v61 = vmul.f32 1.442695, %v2290_v55  ;;  %v2376_v49 = vmul.f32 1.442695, %v2291_v34 }
 0x410   : > { %v3672_v33 = vpop.eup %3671  ;;  %v2598_v27 = vpack.c.bf16 %v3670_v28, %v3666_v6  ;;  %v5097_v6 = vpop.f32.mrf.mxu1 }
 0x411   : > { %3673 = vpow2.f32 %v2374_v61  ;;  %v2599_v11 = vpack.c.bf16 %v3672_v33, %v3668_v56  ;;  %v5083_v14 = vadd.f32 %v3672_v33, %v3670_v28 }
 0x412   : > { %3675 = vpow2.f32 %v2376_v49  ;;  %2650 = vmatmul.bf16.gmra.mxu3 %v2598_v27 }
 0x413   : > { %2739 = vmatmul.bf16.gmra.mxu0 %v2599_v11  ;;  %v1952_v29 = vpop.f32.mrf.mxu2 }
 0x414   : > { %v2209_v58 = vpop.xlane.xlu2 %2208 }
 0x415   : > { %v2292_v3 = vsub.f32 %v5022_v25, %v2209_v58  ;;  %v2293_v24 = vsub.f32 -1e+30, %v2209_v58 }
 0x417   : > { %v3674_v45 = vpop.eup %3673  ;;  %v2378_v32 = vmul.f32 1.442695, %v2292_v3  ;;  %v2380_v2 = vmul.f32 1.442695, %v2293_v24 }
 0x418   : > { %v3676_v12 = vpop.eup %3675  ;;  %1994 = vmatmul.bf16.gmra.mxu2 %v5782_v21  ;;  %v5102_v11 = vpop.f32.mrf.mxu1 }
 0x419   : > { %3677 = vpow2.f32 %v2378_v32  ;;  %v5087_v16 = vadd.f32 %v3676_v12, %v3674_v45 }
 0x41a   : > { %3679 = vpow2.f32 %v2380_v2 }
 0x41b   : > { %v1955_v44 = vpop.f32.mrf.mxu2 }
 0x41c   : > { %v2212_v13 = vpop.xlane.xlu0 %2211  ;;  %v2027_v44 = vadd.s32 128, %v4949_v39 }
 0x41d   : > { %v2294_v42 = vsub.f32 %v5027_v23, %v2212_v13  ;;  %v2295_v46 = vsub.f32 -1e+30, %v2212_v13 }
 0x41f   : > { %v3678_v52 = vpop.eup %3677  ;;  %v2382_v35 = vmul.f32 1.442695, %v2294_v42  ;;  %v2384_v36 = vmul.f32 1.442695, %v2295_v46 }
 0x420   : > { %v3680_v25 = vpop.eup %3679  ;;  %v2600_v17 = vpack.c.bf16 %v3678_v52, %v3674_v45 }
 0x421   : > { %3681 = vpow2.f32 %v2382_v35  ;;  %v2601_v50 = vpack.c.bf16 %v3680_v25, %v3676_v12  ;;  %v5090_v8 = vadd.f32 %v3680_v25, %v3678_v52  ;;  %v2028_v35 = vadd.s32 136, %v4949_v39 }
 0x422   : > { %3683 = vpow2.f32 %v2384_v36  ;;  %2655 = vmatmul.bf16.gmra.mxu3 %v2600_v17 }
 0x423   : > { %2744 = vmatmul.bf16.gmra.mxu0 %v2601_v50  ;;  %v1957_v21 = vpop.f32.mrf.mxu2 }
 0x424   : > { %v2215_v4 = vpop.xlane.xlu1 %2214  ;;  %v2029_v21 = vadd.s32 144, %v4949_v39 }
 0x425   : > { %v2296_v41 = vsub.f32 %v5034_v30, %v2215_v4  ;;  %v2297_v9 = vsub.f32 -1e+30, %v2215_v4 }
 0x427   : > { %v3682_v43 = vpop.eup %3681  ;;  %v2386_v23 = vmul.f32 1.442695, %v2296_v41  ;;  %v2388_v22 = vmul.f32 1.442695, %v2297_v9 }
 0x428   : > { %v3684_v0 = vpop.eup %3683  ;;  %1999 = vmatmul.bf16.gmra.mxu2 %v5783_v37 }
 0x429   : > { %3685 = vpow2.f32 %v2386_v23  ;;  %v5094_v1 = vadd.f32 %v3684_v0, %v3682_v43 }
 0x42a   : > { %3687 = vpow2.f32 %v2388_v22 }
 0x42b   : > { %v1960_v53 = vpop.f32.mrf.mxu2 }
 0x42c   : > { %v2218_v40 = vpop.xlane.xlu2 %2217  ;;  %v2030_v53 = vadd.s32 152, %v4949_v39 }
 0x42d   : > { %v2298_v26 = vsub.f32 %v5039_v20, %v2218_v40  ;;  %v2299_v51 = vsub.f32 -1e+30, %v2218_v40 }
 0x42f   : > { %v3686_v7 = vpop.eup %3685  ;;  %v2390_v30 = vmul.f32 1.442695, %v2298_v26  ;;  %v2392_v59 = vmul.f32 1.442695, %v2299_v51 }
 0x430   : > { %v3688_v56 = vpop.eup %3687  ;;  %v2602_v10 = vpack.c.bf16 %v3686_v7, %v3682_v43 }
 0x431   : > { %3689 = vpow2.f32 %v2390_v30  ;;  %v2603_v63 = vpack.c.bf16 %v3688_v56, %v3684_v0  ;;  %v5099_v55 = vadd.f32 %v3688_v56, %v3686_v7  ;;  %v2031_v56 = vadd.s32 160, %v4949_v39 }
 0x432   : > { %3691 = vpow2.f32 %v2392_v59  ;;  %2660 = vmatmul.bf16.gmra.mxu3 %v2602_v10 }
 0x433   : > { %2749 = vmatmul.bf16.gmra.mxu0 %v2603_v63  ;;  %v1962_v37 = vpop.f32.mrf.mxu2 }
 0x434   : > { %v2221_v34 = vpop.xlane.xlu0 %2220 }
 0x435   : > { %v2300_v28 = vsub.f32 %v5047_v31, %v2221_v34  ;;  %v2301_v20 = vsub.f32 -1e+30, %v2221_v34  ;;  %v5109_v31 = vpop.f32.mrf.mxu1 }
 0x437   : > { %v3690_v61 = vpop.eup %3689  ;;  %v2394_v49 = vmul.f32 1.442695, %v2300_v28  ;;  %v2396_v33 = vmul.f32 1.442695, %v2301_v20 }
 0x438   : > { %v3692_v27 = vpop.eup %3691  ;;  %2004 = vmatmul.bf16.gmra.mxu2 %v5784_v48  ;;  %v5113_v48 = vadd.s32 128, %v4951_v5 }
 0x439   : > { %3693 = vpow2.f32 %v2394_v49  ;;  %v5105_v29 = vadd.f32 %v3692_v27, %v3690_v61  ;;  %v2032_v49 = vadd.s32 168, %v4949_v39 }
 0x43a   : > { %3695 = vpow2.f32 %v2396_v33  ;;  %vm2079_vm0 = vcmp.ge.s32.totalorder %v2027_v44, %v5113_v48  ;;  %vm2081_vm1 = vcmp.ge.s32.totalorder %v2028_v35, %v5113_v48  ;;  %vm2083_vm2 = vcmp.ge.s32.totalorder %v2029_v21, %v5113_v48 }
 0x43b   : > { %v1965_v58 = vpop.f32.mrf.mxu2  ;;  %vm2085_vm3 = vcmp.ge.s32.totalorder %v2030_v53, %v5113_v48  ;;  %vm2087_vm4 = vcmp.ge.s32.totalorder %v2031_v56, %v5113_v48  ;;  %vm2089_vm5 = vcmp.ge.s32.totalorder %v2032_v49, %v5113_v48  ;;  %v2034_v35 = vadd.s32 184, %v4949_v39 }
 0x43c   : > { %v2035_v21 = vadd.s32 192, %v4949_v39 }
 0x43d   : > { %v5116_v42 = vpop.f32.mrf.mxu1  ;;  %vm2093_vm7 = vcmp.ge.s32.totalorder %v2034_v35, %v5113_v48  ;;  %v2039_v35 = vadd.s32 224, %v4949_v39 }
 0x43e   : > { %vm2095_vm8 = vcmp.ge.s32.totalorder %v2035_v21, %v5113_v48 }
 0x43f   : > { %v3694_v3 = vpop.eup %3693  ;;  %vm2103_vm12 = vcmp.ge.s32.totalorder %v2039_v35, %v5113_v48  ;;  %v2042_v35 = vadd.s32 248, %v4949_v39 }
 0x440   : > { %v3696_v24 = vpop.eup %3695  ;;  %v2604_v45 = vpack.c.bf16 %v3694_v3, %v3690_v61 }
 0x441   : > { %v2605_v32 = vpack.c.bf16 %v3696_v24, %v3692_v27  ;;  %v5107_v2 = vadd.f32 %v3696_v24, %v3694_v3  ;;  %vm2109_vm15 = vcmp.ge.s32.totalorder %v2042_v35, %v5113_v48 }
 0x442   : > { %2665 = vmatmul.bf16.gmra.mxu3 %v2604_v45 }
 0x443   : > { %2754 = vmatmul.bf16.gmra.mxu0 %v2605_v32  ;;  %v1967_v12 = vpop.f32.mrf.mxu2  ;;  %v2033_v32 = vadd.s32 176, %v4949_v39 }
 0x445   : > { %v5129_v4 = vpop.f32.mrf.mxu1  ;;  %vm2091_vm6 = vcmp.ge.s32.totalorder %v2033_v32, %v5113_v48 }
 0x44b   : > { %v1970_v13 = vpop.f32.mrf.mxu2 }
 0x44c   : > { %v5118_v46 = vsel %vm2079_vm0, %v1970_v13, -1e+30  ;;  %vm2832_vm0 = vcmask 523264  }
 0x44d   : > { %v2222_v52 = vmax.f32 %v5097_v6, %v5118_v46  ;;  %v5143_v40 = vpop.f32.mrf.mxu1 }
 0x44f   : > { %2223 = vmax.xlane.f32.xlu1 %v2222_v52 }
 0x450   : > { %v2720_v36 = vpop.f32.mrf.mxu0 }
 0x453   : > { %v1972_v25 = vpop.f32.mrf.mxu2 }
 0x454   : > { %v5124_v17 = vsel %vm2081_vm1, %v1972_v25, -1e+30 }
 0x455   : > { %v2631_v5 = vpop.f32.mrf.mxu3  ;;  %v2225_v50 = vmax.f32 %v5102_v11, %v5124_v17  ;;  %v5154_v63 = vpop.f32.mrf.mxu1 }
 0x456   : > { %v5131_v41 = vadd.f32 %v2720_v36, %v2631_v5 }
 0x457   : > { %2226 = vmax.xlane.f32.xlu2 %v2225_v50 }
 0x458   : > { %v5133_v9 = vpop.f32.mrf.mxu0 }
 0x45b   : > { %v1975_v43 = vpop.f32.mrf.mxu2 }
 0x45c   : > { %v5136_v23 = vsel %vm2083_vm2, %v1975_v43, -1e+30 }
 0x45d   : > { %v5138_v22 = vpop.f32.mrf.mxu3  ;;  %v2228_v0 = vmax.f32 %v5109_v31, %v5136_v23  ;;  %v5166_v27 = vpop.f32.mrf.mxu1 }
 0x45f   : > { %2229 = vmax.xlane.f32.xlu0 %v2228_v0 }
 0x460   : > { %v2725_v26 = vpop.f32.mrf.mxu0 }
 0x463   : > { %v1977_v51 = vpop.f32.mrf.mxu2 }
 0x464   : > { %v5146_v7 = vsel %vm2085_vm3, %v1977_v51, -1e+30  ;;  %v2036_v51 = vadd.s32 200, %v4949_v39 }
 0x465   : > { %v2636_v30 = vpop.f32.mrf.mxu3  ;;  %v2231_v59 = vmax.f32 %v5116_v42, %v5146_v7  ;;  %v5181_v36 = vpop.f32.mrf.mxu1 }
 0x466   : > { %v5151_v10 = vadd.f32 %v2725_v26, %v2636_v30  ;;  %vm2097_vm9 = vcmp.ge.s32.totalorder %v2036_v51, %v5113_v48 }
 0x467   : > { %2232 = vmax.xlane.f32.xlu1 %v2231_v59 }
 0x468   : > { %v5156_v37 = vpop.f32.mrf.mxu0 }
 0x46b   : > { %v1980_v34 = vpop.f32.mrf.mxu2 }
 0x46c   : > { %v5158_v28 = vsel %vm2087_vm4, %v1980_v34, -1e+30 }
 0x46d   : > { %v5160_v20 = vpop.f32.mrf.mxu3  ;;  %v2234_v61 = vmax.f32 %v5129_v4, %v5158_v28  ;;  %v5189_v43 = vpop.f32.mrf.mxu1 }
 0x46f   : > { %2235 = vmax.xlane.f32.xlu2 %v2234_v61  ;;  %v2037_v61 = vadd.s32 208, %v4949_v39 }
 0x470   : > { %v2730_v3 = vpop.f32.mrf.mxu0 }
 0x471   : > { %vm2099_vm10 = vcmp.ge.s32.totalorder %v2037_v61, %v5113_v48 }
 0x473   : > { %v1982_v33 = vpop.f32.mrf.mxu2 }
 0x474   : > { %v5168_v58 = vsel %vm2089_vm5, %v1982_v33, -1e+30 }
 0x475   : > { %v2641_v24 = vpop.f32.mrf.mxu3  ;;  %v2237_v45 = vmax.f32 %v5143_v40, %v5168_v58  ;;  %v5198_v30 = vpop.f32.mrf.mxu1 }
 0x476   : > { %v5173_v12 = vadd.f32 %v2730_v3, %v2641_v24 }
 0x477   : > { %2238 = vmax.xlane.f32.xlu0 %v2237_v45  ;;  %v2038_v45 = vadd.s32 216, %v4949_v39 }
 0x479   : > { %vm2101_vm11 = vcmp.ge.s32.totalorder %v2038_v45, %v5113_v48 }
 0x47b   : > { %v1985_v44 = vpop.f32.mrf.mxu2 }
 0x47c   : > { %v5176_v13 = vsel %vm2091_vm6, %v1985_v44, -1e+30 }
 0x47d   : > { %v2240_v52 = vmax.f32 %v5154_v63, %v5176_v13  ;;  %v5206_v33 = vpop.f32.mrf.mxu1 }
 0x47f   : > { %2241 = vmax.xlane.f32.xlu1 %v2240_v52 }
 0x483   : > { %v1987_v25 = vpop.f32.mrf.mxu2 }
 0x484   : > { %v5184_v5 = vsel %vm2093_vm7, %v1987_v25, -1e+30 }
 0x485   : > { %v2243_v50 = vmax.f32 %v5166_v27, %v5184_v5  ;;  %v5219_v25 = vpop.f32.mrf.mxu1 }
 0x487   : > { %2244 = vmax.xlane.f32.xlu2 %v2243_v50 }
 0x48b   : > { %v1990_v0 = vpop.f32.mrf.mxu2 }
 0x48c   : > { %v5192_v53 = vsel %vm2095_vm8, %v1990_v0, -1e+30 }
 0x48d   : > { %v2246_v26 = vmax.f32 %v5181_v36, %v5192_v53  ;;  %v5227_v51 = vpop.f32.mrf.mxu1 }
 0x48f   : > { %2247 = vmax.xlane.f32.xlu0 %v2246_v26  ;;  %v2040_v26 = vadd.s32 232, %v4949_v39 }
 0x491   : > { %vm2105_vm13 = vcmp.ge.s32.totalorder %v2040_v26, %v5113_v48 }
 0x493   : > { %v1992_v59 = vpop.f32.mrf.mxu2 }
 0x494   : > { %v5200_v56 = vsel %vm2097_vm9, %v1992_v59, -1e+30 }
 0x495   : > { %v2249_v34 = vmax.f32 %v5189_v43, %v5200_v56 }
 0x497   : > { %2250 = vmax.xlane.f32.xlu1 %v2249_v34 }
 0x49b   : > { %v1995_v49 = vpop.f32.mrf.mxu2 }
 0x49c   : > { %v5208_v3 = vsel %vm2099_vm10, %v1995_v49, -1e+30  ;;  %v2041_v49 = vadd.s32 240, %v4949_v39 }
 0x49d   : > { %v2252_v24 = vmax.f32 %v5198_v30, %v5208_v3 }
 0x49e   : > { %vm2107_vm14 = vcmp.ge.s32.totalorder %v2041_v49, %v5113_v48 }
 0x49f   : > { %2253 = vmax.xlane.f32.xlu2 %v2252_v24  ;;  %v5236_v24 = vpop.f32.mrf.mxu1 }
 0x4a3   : > { %v1997_v32 = vpop.f32.mrf.mxu2 }
 0x4a4   : > { %v5214_v44 = vsel %vm2101_vm11, %v1997_v32, -1e+30 }
 0x4a5   : > { %v2255_v52 = vmax.f32 %v5206_v33, %v5214_v44 }
 0x4a7   : > { %2256 = vmax.xlane.f32.xlu0 %v2255_v52  ;;  %v5245_v26 = vpop.f32.mrf.mxu1 }
 0x4ab   : > { %v2000_v50 = vpop.f32.mrf.mxu2 }
 0x4ac   : > { %v5222_v21 = vsel %vm2103_vm12, %v2000_v50, -1e+30 }
 0x4ad   : > { %v2258_v0 = vmax.f32 %v5219_v25, %v5222_v21 }
 0x4af   : > { %2259 = vmax.xlane.f32.xlu1 %v2258_v0 }
 0x4b3   : > { %v2002_v59 = vpop.f32.mrf.mxu2 }
 0x4b4   : > { %v5230_v34 = vsel %vm2105_vm13, %v2002_v59, -1e+30 }
 0x4b5   : > { %v2261_v61 = vmax.f32 %v5227_v51, %v5230_v34 }
 0x4b7   : > { %2262 = vmax.xlane.f32.xlu2 %v2261_v61 }
 0x4bb   : > { %v2005_v45 = vpop.f32.mrf.mxu2 }
 0x4bc   : > { %v5238_v32 = vsel %vm2107_vm14, %v2005_v45, -1e+30 }
 0x4bd   : > { %v2264_v52 = vmax.f32 %v5236_v24, %v5238_v32 }
 0x4bf   : > { %2463 = vadd.xlane.f32.xlu2 %v5052_v60  ;;  %2265 = vmax.xlane.f32.xlu0 %v2264_v52 }
 0x4c2   : > { %v2224_v50 = vpop.xlane.xlu1 %2223 }
 0x4c3   : > { %v2007_v0 = vpop.f32.mrf.mxu2  ;;  %v2302_v61 = vsub.f32 %v5097_v6, %v2224_v50  ;;  %v2303_v45 = vsub.f32 %v5118_v46, %v2224_v50 }
 0x4c4   : > { %v5247_v59 = vsel %vm2109_vm15, %v2007_v0, -1e+30 }
 0x4c5   : > { %v2267_v49 = vmax.f32 %v5245_v26, %v5247_v59  ;;  %v2398_v39 = vmul.f32 1.442695, %v2302_v61  ;;  %v2400_v60 = vmul.f32 1.442695, %v2303_v45 }
 0x4c7   : > { %2472 = vadd.xlane.f32.xlu2 %v5062_v15  ;;  %2466 = vadd.xlane.f32.xlu0 %v5055_v54  ;;  %3697 = vpow2.f32 %v2398_v39 }
 0x4c8   : > { %2268 = vmax.xlane.f32.xlu1 %v2267_v49  ;;  %3699 = vpow2.f32 %v2400_v60 }
 0x4ca   : > { %v2227_v48 = vpop.xlane.xlu2 %2226 }
 0x4cb   : > { %v2304_v52 = vsub.f32 %v5102_v11, %v2227_v48  ;;  %v2305_v35 = vsub.f32 %v5124_v17, %v2227_v48 }
 0x4cd   : > { %v2402_v0 = vmul.f32 1.442695, %v2304_v52  ;;  %v2404_v6 = vmul.f32 1.442695, %v2305_v35  ;;  %v3698_v15 = vpop.eup %3697 }
 0x4ce   : > { %v3700_v46 = vpop.eup %3699 }
 0x4cf   : > { %3701 = vpow2.f32 %v2402_v0  ;;  %2481 = vadd.xlane.f32.xlu2 %v5073_v57  ;;  %2475 = vadd.xlane.f32.xlu0 %v5066_v19 }
 0x4d0   : > { %3703 = vpow2.f32 %v2404_v6  ;;  %2469 = vadd.xlane.f32.xlu1 %v5059_v18 }
 0x4d2   : > { %v2230_v54 = vpop.xlane.xlu0 %2229 }
 0x4d3   : > { %v2306_v11 = vsub.f32 %v5109_v31, %v2230_v54  ;;  %v2307_v61 = vsub.f32 %v5136_v23, %v2230_v54 }
 0x4d5   : > { %v5260_v50 = vpop.eup %3701  ;;  %v2406_v18 = vmul.f32 1.442695, %v2306_v11  ;;  %v2408_v57 = vmul.f32 1.442695, %v2307_v61 }
 0x4d6   : > { %v5263_v17 = vpop.eup %3703  ;;  %v2606_v49 = vpack.c.bf16 %v5260_v50, %v3698_v15 }
 0x4d7   : > { %2490 = vadd.xlane.f32.xlu2 %v5083_v14  ;;  %2484 = vadd.xlane.f32.xlu0 %v5076_v62  ;;  %v2607_v19 = vpack.c.bf16 %v5263_v17, %v3700_v46  ;;  %3705 = vpow2.f32 %v2406_v18 }
 0x4d8   : > { %2478 = vadd.xlane.f32.xlu1 %v5069_v47  ;;  %2670 = vmatmul.bf16.gmra.mxu3 %v2606_v49  ;;  %3707 = vpow2.f32 %v2408_v57 }
 0x4d9   : > { %2759 = vmatmul.bf16.gmra.mxu0 %v2607_v19 }
 0x4da   : > { %v2233_v45 = vpop.xlane.xlu1 %2232 }
 0x4db   : > { %v2308_v31 = vsub.f32 %v5116_v42, %v2233_v45  ;;  %v2309_v39 = vsub.f32 %v5146_v7, %v2233_v45 }
 0x4dd   : > { %v2410_v23 = vmul.f32 1.442695, %v2308_v31  ;;  %v2412_v60 = vmul.f32 1.442695, %v2309_v39  ;;  %v3706_v62 = vpop.eup %3705  ;;  %v2513_v39 = vadd.f32 %v5263_v17, %v5260_v50 }
 0x4de   : > { %v3708_v14 = vpop.eup %3707 }
 0x4df   : > { %3709 = vpow2.f32 %v2410_v23  ;;  %2499 = vadd.xlane.f32.xlu2 %v5094_v1  ;;  %2493 = vadd.xlane.f32.xlu0 %v5087_v16  ;;  %v5281_v16 = vpop.f32.mrf.mxu0  ;;  %v2516_v61 = vadd.f32 %v3708_v14, %v3706_v62 }
 0x4e0   : > { %3711 = vpow2.f32 %v2412_v60  ;;  %2487 = vadd.xlane.f32.xlu1 %v5080_v38 }
 0x4e2   : > { %v2236_v47 = vpop.xlane.xlu2 %2235 }
 0x4e3   : > { %v2310_v42 = vsub.f32 %v5129_v4, %v2236_v47  ;;  %v2311_v7 = vsub.f32 %v5158_v28, %v2236_v47  ;;  %v2510_v28 = vadd.f32 %v3700_v46, %v3698_v15 }
 0x4e5   : > { %v3710_v48 = vpop.eup %3709  ;;  %v2414_v38 = vmul.f32 1.442695, %v2310_v42  ;;  %v2416_v0 = vmul.f32 1.442695, %v2311_v7 }
 0x4e6   : > { %v3712_v52 = vpop.eup %3711  ;;  %v2608_v35 = vpack.c.bf16 %v3710_v48, %v3706_v62 }
 0x4e7   : > { %2508 = vadd.xlane.f32.xlu2 %v5107_v2  ;;  %2502 = vadd.xlane.f32.xlu0 %v5099_v55  ;;  %v2609_v1 = vpack.c.bf16 %v3712_v52, %v3708_v14  ;;  %3713 = vpow2.f32 %v2414_v38  ;;  %v5285_v55 = vpop.f32.mrf.mxu3  ;;  %v5288_v19 = vpop.f32.mrf.mxu0  ;;  %v2519_v45 = vadd.f32 %v3712_v52, %v3710_v48 }
 0x4e8   : > { %2496 = vadd.xlane.f32.xlu1 %v5090_v8  ;;  %2675 = vmatmul.bf16.gmra.mxu3 %v2608_v35  ;;  %3715 = vpow2.f32 %v2416_v0 }
 0x4e9   : > { %2764 = vmatmul.bf16.gmra.mxu0 %v2609_v1 }
 0x4ea   : > { %v2239_v6 = vpop.xlane.xlu0 %2238 }
 0x4eb   : > { %v2312_v4 = vsub.f32 %v5143_v40, %v2239_v6  ;;  %v2313_v54 = vsub.f32 %v5168_v58, %v2239_v6 }
 0x4ed   : > { %v2418_v11 = vmul.f32 1.442695, %v2312_v4  ;;  %v2420_v2 = vmul.f32 1.442695, %v2313_v54  ;;  %v3714_v49 = vpop.eup %3713 }
 0x4ee   : > { %v3716_v15 = vpop.eup %3715 }
 0x4ef   : > { %3717 = vpow2.f32 %v2418_v11  ;;  %2517 = vadd.xlane.f32.xlu2 %v2516_v61  ;;  %2511 = vadd.xlane.f32.xlu0 %v2510_v28  ;;  %v5298_v48 = vpop.f32.mrf.mxu0  ;;  %v2522_v52 = vadd.f32 %v3716_v15, %v3714_v49 }
 0x4f0   : > { %3719 = vpow2.f32 %v2420_v2  ;;  %2505 = vadd.xlane.f32.xlu1 %v5105_v29 }
 0x4f2   : > { %v2242_v8 = vpop.xlane.xlu1 %2241 }
 0x4f3   : > { %v2314_v40 = vsub.f32 %v5154_v63, %v2242_v8  ;;  %v2315_v58 = vsub.f32 %v5176_v13, %v2242_v8  ;;  %v5294_v63 = vpop.f32.mrf.mxu3 }
 0x4f5   : > { %v3718_v46 = vpop.eup %3717  ;;  %v2422_v18 = vmul.f32 1.442695, %v2314_v40  ;;  %v2424_v57 = vmul.f32 1.442695, %v2315_v58 }
 0x4f6   : > { %v3720_v31 = vpop.eup %3719  ;;  %v2610_v23 = vpack.c.bf16 %v3718_v46, %v3714_v49 }
 0x4f7   : > { %3721 = vpow2.f32 %v2422_v18  ;;  %2520 = vadd.xlane.f32.xlu0 %v2519_v45  ;;  %v2611_v29 = vpack.c.bf16 %v3720_v31, %v3716_v15  ;;  %v2525_v60 = vadd.f32 %v3720_v31, %v3718_v46  ;;  %v5304_v28 = vpop.f32.mrf.mxu0 }
 0x4f8   : > { %3723 = vpow2.f32 %v2424_v57  ;;  %2514 = vadd.xlane.f32.xlu1 %v2513_v39  ;;  %2680 = vmatmul.bf16.gmra.mxu3 %v2610_v23 }
 0x4f9   : > { %2769 = vmatmul.bf16.gmra.mxu0 %v2611_v29  ;;  %2526 = vadd.xlane.f32.xlu2 %v2525_v60 }
 0x4fa   : > { %v2245_v13 = vpop.xlane.xlu2 %2244 }
 0x4fb   : > { %v2316_v47 = vsub.f32 %v5166_v27, %v2245_v13  ;;  %v2317_v62 = vsub.f32 %v5184_v5, %v2245_v13  ;;  %v5300_v1 = vpop.f32.mrf.mxu3 }
 0x4fd   : > { %v3722_v14 = vpop.eup %3721  ;;  %v2426_v50 = vmul.f32 1.442695, %v2316_v47  ;;  %v2428_v17 = vmul.f32 1.442695, %v2317_v62 }
 0x4fe   : > { %v3724_v42 = vpop.eup %3723 }
 0x4ff   : > { %3725 = vpow2.f32 %v2426_v50  ;;  %v2528_v7 = vadd.f32 %v3724_v42, %v3722_v14  ;;  %v5310_v18 = vpop.f32.mrf.mxu0 }
 0x500   : > { %3727 = vpow2.f32 %v2428_v17  ;;  %2523 = vadd.xlane.f32.xlu1 %v2522_v52 }
 0x501   : > { %2529 = vadd.xlane.f32.xlu0 %v2528_v7 }
 0x502   : > { %v2248_v35 = vpop.xlane.xlu0 %2247 }
 0x503   : > { %v2318_v38 = vsub.f32 %v5181_v36, %v2248_v35  ;;  %v2319_v27 = vsub.f32 %v5192_v53, %v2248_v35  ;;  %v5308_v49 = vpop.f32.mrf.mxu3 }
 0x505   : > { %v3726_v5 = vpop.eup %3725  ;;  %v2430_v0 = vmul.f32 1.442695, %v2318_v38  ;;  %v2432_v6 = vmul.f32 1.442695, %v2319_v27 }
 0x506   : > { %v3728_v4 = vpop.eup %3727  ;;  %v2612_v54 = vpack.c.bf16 %v3726_v5, %v3722_v14 }
 0x507   : > { %3729 = vpow2.f32 %v2430_v0  ;;  %v2613_v11 = vpack.c.bf16 %v3728_v4, %v3724_v42  ;;  %v2531_v2 = vadd.f32 %v3728_v4, %v3726_v5  ;;  %v5316_v14 = vpop.f32.mrf.mxu0 }
 0x508   : > { %3731 = vpow2.f32 %v2432_v6  ;;  %2685 = vmatmul.bf16.gmra.mxu3 %v2612_v54 }
 0x509   : > { %2774 = vmatmul.bf16.gmra.mxu0 %v2613_v11  ;;  %2532 = vadd.xlane.f32.xlu1 %v2531_v2 }
 0x50a   : > { %v2251_v61 = vpop.xlane.xlu1 %2250 }
 0x50b   : > { %v2320_v8 = vsub.f32 %v5189_v43, %v2251_v61  ;;  %v2321_v36 = vsub.f32 %v5200_v56, %v2251_v61  ;;  %v5314_v60 = vpop.f32.mrf.mxu3 }
 0x50d   : > { %v3730_v53 = vpop.eup %3729  ;;  %v2434_v40 = vmul.f32 1.442695, %v2320_v8  ;;  %v2436_v58 = vmul.f32 1.442695, %v2321_v36 }
 0x50e   : > { %v3732_v15 = vpop.eup %3731 }
 0x50f   : > { %3733 = vpow2.f32 %v2434_v40  ;;  %v2534_v46 = vadd.f32 %v3732_v15, %v3730_v53  ;;  %v5324_v6 = vpop.f32.mrf.mxu0 }
 0x510   : > { %3735 = vpow2.f32 %v2436_v58 }
 0x511   : > { %2535 = vadd.xlane.f32.xlu2 %v2534_v46 }
 0x512   : > { %v2254_v57 = vpop.xlane.xlu2 %2253 }
 0x513   : > { %v2322_v45 = vsub.f32 %v5198_v30, %v2254_v57  ;;  %v2323_v31 = vsub.f32 %v5208_v3, %v2254_v57  ;;  %v5320_v35 = vpop.f32.mrf.mxu3 }
 0x515   : > { %v3734_v43 = vpop.eup %3733  ;;  %v2438_v39 = vmul.f32 1.442695, %v2322_v45  ;;  %v2440_v56 = vmul.f32 1.442695, %v2323_v31 }
 0x516   : > { %v3736_v23 = vpop.eup %3735  ;;  %v2614_v29 = vpack.c.bf16 %v3734_v43, %v3730_v53 }
 0x517   : > { %3737 = vpow2.f32 %v2438_v39  ;;  %v2615_v13 = vpack.c.bf16 %v3736_v23, %v3732_v15  ;;  %v2537_v47 = vadd.f32 %v3736_v23, %v3734_v43  ;;  %v5331_v15 = vpop.f32.mrf.mxu0 }
 0x518   : > { %3739 = vpow2.f32 %v2440_v56  ;;  %2690 = vmatmul.bf16.gmra.mxu3 %v2614_v29 }
 0x519   : > { %2779 = vmatmul.bf16.gmra.mxu0 %v2615_v13  ;;  %2538 = vadd.xlane.f32.xlu0 %v2537_v47 }
 0x51a   : > { %v2257_v62 = vpop.xlane.xlu0 %2256 }
 0x51b   : > { %v2324_v30 = vsub.f32 %v5206_v33, %v2257_v62  ;;  %v2325_v3 = vsub.f32 %v5214_v44, %v2257_v62 }
 0x51d   : > { %v3738_v50 = vpop.eup %3737  ;;  %v2442_v17 = vmul.f32 1.442695, %v2324_v30  ;;  %v2444_v42 = vmul.f32 1.442695, %v2325_v3 }
 0x51e   : > { %v3740_v52 = vpop.eup %3739 }
 0x51f   : > { %3741 = vpow2.f32 %v2442_v17  ;;  %v2540_v7 = vadd.f32 %v3740_v52, %v3738_v50  ;;  %v5338_v30 = vpop.f32.mrf.mxu0 }
 0x520   : > { %3743 = vpow2.f32 %v2444_v42 }
 0x521   : > { %2541 = vadd.xlane.f32.xlu1 %v2540_v7 }
 0x522   : > { %v2260_v38 = vpop.xlane.xlu1 %2259 }
 0x523   : > { %v2326_v27 = vsub.f32 %v5219_v25, %v2260_v38  ;;  %v2327_v5 = vsub.f32 %v5222_v21, %v2260_v38  ;;  %v5326_v25 = vpop.f32.mrf.mxu3 }
 0x525   : > { %v3742_v0 = vpop.eup %3741  ;;  %v2446_v33 = vmul.f32 1.442695, %v2326_v27  ;;  %v2448_v44 = vmul.f32 1.442695, %v2327_v5 }
 0x526   : > { %v3744_v4 = vpop.eup %3743  ;;  %v2616_v54 = vpack.c.bf16 %v3742_v0, %v3738_v50 }
 0x527   : > { %3745 = vpow2.f32 %v2446_v33  ;;  %v2617_v11 = vpack.c.bf16 %v3744_v4, %v3740_v52  ;;  %v2543_v2 = vadd.f32 %v3744_v4, %v3742_v0 }
 0x528   : > { %3747 = vpow2.f32 %v2448_v44  ;;  %2695 = vmatmul.bf16.gmra.mxu3 %v2616_v54  ;;  %v2723_v44 = vadd.f32 %v5133_v9, %v5138_v22  ;;  %v2736_v22 = vadd.f32 %v5288_v19, %v5294_v63 }
 0x529   : > { %2784 = vmatmul.bf16.gmra.mxu0 %v2617_v11  ;;  %2544 = vadd.xlane.f32.xlu2 %v2543_v2 }
 0x52a   : > { %v2263_v61 = vpop.xlane.xlu2 %2262 }
 0x52b   : > { %v2328_v21 = vsub.f32 %v5227_v51, %v2263_v61  ;;  %v2329_v8 = vsub.f32 %v5230_v34, %v2263_v61  ;;  %v5336_v43 = vpop.f32.mrf.mxu3  ;;  %v5356_v61 = vpop.f32.mrf.mxu0 }
 0x52d   : > { %v3746_v36 = vpop.eup %3745  ;;  %v2450_v53 = vmul.f32 1.442695, %v2328_v21  ;;  %v2452_v40 = vmul.f32 1.442695, %v2329_v8 }
 0x52e   : > { %v3748_v58 = vpop.eup %3747 }
 0x52f   : > { %3749 = vpow2.f32 %v2450_v53  ;;  %v2546_v46 = vadd.f32 %v3748_v58, %v3746_v36 }
 0x530   : > { %3751 = vpow2.f32 %v2452_v40 }
 0x531   : > { %2547 = vadd.xlane.f32.xlu0 %v2546_v46 }
 0x532   : > { %v2464_v57 = vpop.xlane.xlu2 %2463  ;;  %v2266_v45 = vpop.xlane.xlu0 %2265 }
 0x533   : > { %3753 = vrcp.f32 %v2464_v57  ;;  %v2330_v31 = vsub.f32 %v5236_v24, %v2266_v45  ;;  %v2331_v51 = vsub.f32 %v5238_v32, %v2266_v45  ;;  %v5350_v5 = vpop.f32.mrf.mxu3 }
 0x535   : > { %v3750_v34 = vpop.eup %3749  ;;  %v2454_v39 = vmul.f32 1.442695, %v2330_v31  ;;  %v2456_v56 = vmul.f32 1.442695, %v2331_v51  ;;  %v2757_v51 = vpop.f32.mrf.mxu0 }
 0x536   : > { %v3752_v23 = vpop.eup %3751  ;;  %v2618_v29 = vpack.c.bf16 %v3750_v34, %v3746_v36 }
 0x537   : > { %3755 = vpow2.f32 %v2454_v39  ;;  %v2619_v13 = vpack.c.bf16 %v3752_v23, %v3748_v58  ;;  %v2549_v47 = vadd.f32 %v3752_v23, %v3750_v34  ;;  %v2743_v34 = vadd.f32 %v5310_v18, %v5314_v60 }
 0x538   : > { %3757 = vpow2.f32 %v2456_v56  ;;  %2700 = vmatmul.bf16.gmra.mxu3 %v2618_v29 }
 0x539   : > { %v3754_v62 = vpop.eup %3753  ;;  %2789 = vmatmul.bf16.gmra.mxu0 %v2619_v13  ;;  %2550 = vadd.xlane.f32.xlu1 %v2549_v47 }
 0x53a   : > { %v2800_v24 = vmul.f32 %v3754_v62, %v5131_v41  ;;  %v2473_v32 = vpop.xlane.xlu2 %2472  ;;  %v2467_v3 = vpop.xlane.xlu0 %2466  ;;  %v2728_v41 = vadd.f32 %v5156_v37, %v5160_v20 }
 0x53b   : > { %3759 = vrcp.f32 %v2473_v32  ;;  %v2269_v50 = vpop.xlane.xlu1 %2268  ;;  %v5364_v53 = vpop.f32.mrf.mxu3 }
 0x53c   : > { %2833 = vst.msk [vmem:[%s5343_s23] sm:$0xff] %vm2832_vm0, %v2800_v24  ;;  %3761 = vrcp.f32 %v2467_v3  ;;  %v2332_v17 = vsub.f32 %v5245_v26, %v2269_v50  ;;  %v2333_v42 = vsub.f32 %v5247_v59, %v2269_v50  ;;  %v2741_v3 = vadd.f32 %v5304_v28, %v5308_v49 }
 0x53d   : > { %v3756_v52 = vpop.eup %3755 }
 0x53e   : > { %v3758_v7 = vpop.eup %3757  ;;  %v2458_v38 = vmul.f32 1.442695, %v2332_v17  ;;  %v2460_v27 = vmul.f32 1.442695, %v2333_v42 }
 0x53f   : > { %v2552_v0 = vadd.f32 %v3758_v7, %v3756_v52 }
 0x540   : > { %3763 = vpow2.f32 %v2458_v38 }
 0x541   : > { %v3760_v33 = vpop.eup %3759  ;;  %3765 = vpow2.f32 %v2460_v27  ;;  %2553 = vadd.xlane.f32.xlu2 %v2552_v0  ;;  %v2748_v0 = vadd.f32 %v5324_v6, %v5326_v25 }
 0x542   : > { %v3762_v26 = vpop.eup %3761  ;;  %v2803_v59 = vmul.f32 %v3760_v33, %v2728_v41  ;;  %v2482_v4 = vpop.xlane.xlu2 %2481 }
 0x543   : > { %v2476_v54 = vpop.xlane.xlu0 %2475  ;;  %v2801_v11 = vmul.f32 %v3762_v26, %v2723_v44  ;;  %3767 = vrcp.f32 %v2482_v4  ;;  %v2470_v2 = vpop.xlane.xlu1 %2469 }
 0x544   : > { %2836 = vst.msk [vmem:[%s5343_s23 + $0x18] sm:$0xff] %vm2832_vm0, %v2803_v59  ;;  %3769 = vrcp.f32 %v2476_v54  ;;  %v2668_v62 = vpop.f32.mrf.mxu3 }
 0x545   : > { %2834 = vst.msk [vmem:[%s5343_s23 + $0x8] sm:$0xff] %vm2832_vm0, %v2801_v11  ;;  %3771 = vrcp.f32 %v2470_v2  ;;  %v2758_v28 = vadd.f32 %v2757_v51, %v2668_v62 }
 0x546   : > { %v3764_v37 = vpop.eup %3763 }
 0x547   : > { %v3766_v20 = vpop.eup %3765  ;;  %v2620_v9 = vpack.c.bf16 %v3764_v37, %v3756_v52 }
 0x548   : > { %v2621_v21 = vpack.c.bf16 %v3766_v20, %v3758_v7  ;;  %v2555_v8 = vadd.f32 %v3766_v20, %v3764_v37 }
 0x549   : > { %v3768_v36 = vpop.eup %3767  ;;  %2705 = vmatmul.bf16.gmra.mxu3 %v2620_v9 }
 0x54a   : > { %v3770_v40 = vpop.eup %3769  ;;  %v2806_v58 = vmul.f32 %v3768_v36, %v2736_v22  ;;  %2794 = vmatmul.bf16.gmra.mxu0 %v2621_v21  ;;  %2556 = vadd.xlane.f32.xlu0 %v2555_v8  ;;  %v2491_v46 = vpop.xlane.xlu2 %2490 }
 0x54b   : > { %v2485_v57 = vpop.xlane.xlu0 %2484  ;;  %v3772_v45 = vpop.eup %3771  ;;  %v2804_v31 = vmul.f32 %v3770_v40, %v5173_v12  ;;  %3773 = vrcp.f32 %v2491_v46  ;;  %v2738_v12 = vadd.f32 %v5298_v48, %v5300_v1  ;;  %v2746_v1 = vadd.f32 %v5316_v14, %v5320_v35 }
 0x54c   : > { %v2479_v19 = vpop.xlane.xlu1 %2478  ;;  %2839 = vst.msk [vmem:[%s5343_s23 + $0x30] sm:$0xff] %vm2832_vm0, %v2806_v58  ;;  %v2802_v63 = vmul.f32 %v3772_v45, %v5151_v10  ;;  %3775 = vrcp.f32 %v2485_v57  ;;  %v2733_v10 = vadd.f32 %v5281_v16, %v5285_v55  ;;  %v2751_v16 = vadd.f32 %v5331_v15, %v5336_v43 }
 0x54d   : > { %2837 = vst.msk [vmem:[%s5343_s23 + $0x20] sm:$0xff] %vm2832_vm0, %v2804_v31  ;;  %3777 = vrcp.f32 %v2479_v19  ;;  %v2753_v35 = vadd.f32 %v5338_v30, %v5350_v5  ;;  %v2756_v5 = vadd.f32 %v5356_v61, %v5364_v53 }
 0x54e   : > { %2835 = vst.msk [vmem:[%s5343_s23 + $0x10] sm:$0xff] %vm2832_vm0, %v2802_v63 }
 0x551   : > { %v3774_v39 = vpop.eup %3773 }
 0x552   : > { %v3776_v56 = vpop.eup %3775  ;;  %v2809_v23 = vmul.f32 %v3774_v39, %v2743_v34  ;;  %v2500_v29 = vpop.xlane.xlu2 %2499 }
 0x553   : > { %v2494_v13 = vpop.xlane.xlu0 %2493  ;;  %v3778_v47 = vpop.eup %3777  ;;  %v2807_v24 = vmul.f32 %v3776_v56, %v2738_v12  ;;  %3779 = vrcp.f32 %v2500_v29 }
 0x554   : > { %v2488_v32 = vpop.xlane.xlu1 %2487  ;;  %2842 = vst.msk [vmem:[%s5343_s23 + $0x48] sm:$0xff] %vm2832_vm0, %v2809_v23  ;;  %v2805_v18 = vmul.f32 %v3778_v47, %v2733_v10  ;;  %3781 = vrcp.f32 %v2494_v13 }
 0x555   : > { %2840 = vst.msk [vmem:[%s5343_s23 + $0x38] sm:$0xff] %vm2832_vm0, %v2807_v24  ;;  %3783 = vrcp.f32 %v2488_v32 }
 0x556   : > { %2838 = vst.msk [vmem:[%s5343_s23 + $0x28] sm:$0xff] %vm2832_vm0, %v2805_v18  ;;  %v2760_v48 = vpop.f32.mrf.mxu0 }
 0x559   : > { %v3780_v55 = vpop.eup %3779 }
 0x55a   : > { %v3782_v60 = vpop.eup %3781  ;;  %v2812_v50 = vmul.f32 %v3780_v55, %v2751_v16  ;;  %v2509_v17 = vpop.xlane.xlu2 %2508 }
 0x55b   : > { %v2503_v42 = vpop.xlane.xlu0 %2502  ;;  %v3784_v52 = vpop.eup %3783  ;;  %v2810_v7 = vmul.f32 %v3782_v60, %v2746_v1  ;;  %3785 = vrcp.f32 %v2509_v17 }
 0x55c   : > { %v2497_v38 = vpop.xlane.xlu1 %2496  ;;  %v2671_v27 = vpop.f32.mrf.mxu3  ;;  %2845 = vst.msk [vmem:[%s5343_s23 + $0x60] sm:$0xff] %vm2832_vm0, %v2812_v50  ;;  %v2808_v15 = vmul.f32 %v3784_v52, %v2741_v3  ;;  %3787 = vrcp.f32 %v2503_v42 }
 0x55d   : > { %2843 = vst.msk [vmem:[%s5343_s23 + $0x50] sm:$0xff] %vm2832_vm0, %v2810_v7  ;;  %3789 = vrcp.f32 %v2497_v38  ;;  %v2761_v6 = vadd.f32 %v2760_v48, %v2671_v27 }
 0x55e   : > { %2841 = vst.msk [vmem:[%s5343_s23 + $0x40] sm:$0xff] %vm2832_vm0, %v2808_v15  ;;  %v2762_v14 = vpop.f32.mrf.mxu0 }
 0x561   : > { %v3786_v49 = vpop.eup %3785 }
 0x562   : > { %v3788_v43 = vpop.eup %3787  ;;  %v2815_v41 = vmul.f32 %v3786_v49, %v2758_v28  ;;  %v2518_v11 = vpop.xlane.xlu2 %2517 }
 0x563   : > { %v2512_v33 = vpop.xlane.xlu0 %2511  ;;  %v3790_v44 = vpop.eup %3789  ;;  %v2813_v26 = vmul.f32 %v3788_v43, %v2753_v35 }
 0x564   : > { %v2506_v59 = vpop.xlane.xlu1 %2505  ;;  %v2673_v4 = vpop.f32.mrf.mxu3  ;;  %2848 = vst.msk [vmem:[%s5343_s23 + $0x78] sm:$0xff] %vm2832_vm0, %v2815_v41  ;;  %v2811_v54 = vmul.f32 %v3790_v44, %v2748_v0  ;;  %3791 = vrcp.f32 %v2512_v33 }
 0x565   : > { %2846 = vst.msk [vmem:[%s5343_s23 + $0x68] sm:$0xff] %vm2832_vm0, %v2813_v26  ;;  %3793 = vrcp.f32 %v2506_v59  ;;  %v2763_v61 = vadd.f32 %v2762_v14, %v2673_v4 }
 0x566   : > { %2844 = vst.msk [vmem:[%s5343_s23 + $0x58] sm:$0xff] %vm2832_vm0, %v2811_v54  ;;  %v2765_v30 = vpop.f32.mrf.mxu0  ;;  %3795 = vrcp.f32 %v2518_v11 }
 0x56a   : > { %v3792_v25 = vpop.eup %3791 }
 0x56b   : > { %v3794_v2 = vpop.eup %3793  ;;  %v2816_v37 = vmul.f32 %v3792_v25, %v2761_v6  ;;  %v2521_v21 = vpop.xlane.xlu0 %2520 }
 0x56c   : > { %v2515_v20 = vpop.xlane.xlu1 %2514  ;;  %v2676_v9 = vpop.f32.mrf.mxu3  ;;  %v2814_v22 = vmul.f32 %v3794_v2, %v2756_v5 }
 0x56d   : > { %3797 = vrcp.f32 %v2515_v20  ;;  %v2766_v8 = vadd.f32 %v2765_v30, %v2676_v9  ;;  %v3796_v36 = vpop.eup %3795  ;;  %2849 = vst.msk [vmem:[%s5343_s23 + $0x80] sm:$0xff] %vm2832_vm0, %v2816_v37  ;;  %v2527_v39 = vpop.xlane.xlu2 %2526 }
 0x56e   : > { %2847 = vst.msk [vmem:[%s5343_s23 + $0x70] sm:$0xff] %vm2832_vm0, %v2814_v22  ;;  %v2767_v58 = vpop.f32.mrf.mxu0  ;;  %3799 = vrcp.f32 %v2521_v21 }
 0x56f   : > { %v2818_v40 = vmul.f32 %v3796_v36, %v2766_v8 }
 0x571   : > { %2851 = vst.msk [vmem:[%s5343_s23 + $0x90] sm:$0xff] %vm2832_vm0, %v2818_v40 }
 0x573   : > { %v3798_v53 = vpop.eup %3797 }
 0x574   : > { %v2817_v46 = vmul.f32 %v3798_v53, %v2763_v61  ;;  %v2678_v57 = vpop.f32.mrf.mxu3  ;;  %v2524_v45 = vpop.xlane.xlu1 %2523 }
 0x575   : > { %v2768_v31 = vadd.f32 %v2767_v58, %v2678_v57  ;;  %v3800_v19 = vpop.eup %3799  ;;  %3801 = vrcp.f32 %v2524_v45  ;;  %v2530_v13 = vpop.xlane.xlu0 %2529 }
 0x576   : > { %2850 = vst.msk [vmem:[%s5343_s23 + $0x88] sm:$0xff] %vm2832_vm0, %v2817_v46  ;;  %v2770_v51 = vpop.f32.mrf.mxu0  ;;  %3803 = vrcp.f32 %v2527_v39 }
 0x577   : > { %v2819_v63 = vmul.f32 %v3800_v19, %v2768_v31  ;;  %3805 = vrcp.f32 %v2530_v13 }
 0x579   : > { %2852 = vst.msk [vmem:[%s5343_s23 + $0x98] sm:$0xff] %vm2832_vm0, %v2819_v63 }
 0x57b   : > { %v3802_v56 = vpop.eup %3801 }
 0x57c   : > { %v2681_v34 = vpop.f32.mrf.mxu3  ;;  %v3804_v62 = vpop.eup %3803 }
 0x57d   : > { %v2771_v12 = vadd.f32 %v2770_v51, %v2681_v34  ;;  %v2533_v48 = vpop.xlane.xlu1 %2532  ;;  %v3806_v55 = vpop.eup %3805 }
 0x57e   : > { %v2772_v23 = vpop.f32.mrf.mxu0  ;;  %3807 = vrcp.f32 %v2533_v48 }
 0x57f   : > { %v2820_v10 = vmul.f32 %v3802_v56, %v2771_v12 }
 0x581   : > { %2853 = vst.msk [vmem:[%s5343_s23 + $0xa0] sm:$0xff] %vm2832_vm0, %v2820_v10 }
 0x584   : > { %v2683_v29 = vpop.f32.mrf.mxu3  ;;  %v2536_v50 = vpop.xlane.xlu2 %2535 }
 0x585   : > { %v2773_v47 = vadd.f32 %v2772_v23, %v2683_v29  ;;  %v3808_v42 = vpop.eup %3807  ;;  %3809 = vrcp.f32 %v2536_v50 }
 0x586   : > { %v2775_v32 = vpop.f32.mrf.mxu0 }
 0x587   : > { %v2821_v24 = vmul.f32 %v3804_v62, %v2773_v47 }
 0x589   : > { %2854 = vst.msk [vmem:[%s5343_s23 + $0xa8] sm:$0xff] %vm2832_vm0, %v2821_v24 }
 0x58b   : > { %v3810_v14 = vpop.eup %3809 }
 0x58c   : > { %v2686_v18 = vpop.f32.mrf.mxu3  ;;  %v2539_v27 = vpop.xlane.xlu0 %2538 }
 0x58d   : > { %v2776_v16 = vadd.f32 %v2775_v32, %v2686_v18  ;;  %3811 = vrcp.f32 %v2539_v27 }
 0x58e   : > { %v2777_v60 = vpop.f32.mrf.mxu0 }
 0x58f   : > { %v2822_v1 = vmul.f32 %v3806_v55, %v2776_v16 }
 0x591   : > { %2855 = vst.msk [vmem:[%s5343_s23 + $0xb0] sm:$0xff] %vm2832_vm0, %v2822_v1 }
 0x593   : > { %v3812_v41 = vpop.eup %3811 }
 0x594   : > { %v2688_v3 = vpop.f32.mrf.mxu3  ;;  %v2542_v43 = vpop.xlane.xlu1 %2541 }
 0x595   : > { %v2778_v17 = vadd.f32 %v2777_v60, %v2688_v3  ;;  %3813 = vrcp.f32 %v2542_v43 }
 0x596   : > { %v2780_v7 = vpop.f32.mrf.mxu0 }
 0x597   : > { %v2823_v52 = vmul.f32 %v3808_v42, %v2778_v17 }
 0x599   : > { %2856 = vst.msk [vmem:[%s5343_s23 + $0xb8] sm:$0xff] %vm2832_vm0, %v2823_v52 }
 0x59b   : > { %v3814_v54 = vpop.eup %3813 }
 0x59c   : > { %v2691_v38 = vpop.f32.mrf.mxu3  ;;  %v2545_v59 = vpop.xlane.xlu2 %2544 }
 0x59d   : > { %v2781_v15 = vadd.f32 %v2780_v7, %v2691_v38  ;;  %3815 = vrcp.f32 %v2545_v59 }
 0x59e   : > { %v2782_v49 = vpop.f32.mrf.mxu0 }
 0x59f   : > { %v2824_v28 = vmul.f32 %v3810_v14, %v2781_v15 }
 0x5a1   : > { %2857 = vst.msk [vmem:[%s5343_s23 + $0xc0] sm:$0xff] %vm2832_vm0, %v2824_v28 }
 0x5a3   : > { %v3816_v2 = vpop.eup %3815 }
 0x5a4   : > { %v2693_v35 = vpop.f32.mrf.mxu3  ;;  %v2548_v25 = vpop.xlane.xlu0 %2547 }
 0x5a5   : > { %v2783_v0 = vadd.f32 %v2782_v49, %v2693_v35  ;;  %3817 = vrcp.f32 %v2548_v25 }
 0x5a6   : > { %v2785_v44 = vpop.f32.mrf.mxu0 }
 0x5a7   : > { %v2825_v33 = vmul.f32 %v3812_v41, %v2783_v0 }
 0x5a9   : > { %2858 = vst.msk [vmem:[%s5343_s23 + $0xc8] sm:$0xff] %vm2832_vm0, %v2825_v33 }
 0x5ab   : > { %v3818_v8 = vpop.eup %3817 }
 0x5ac   : > { %v2696_v26 = vpop.f32.mrf.mxu3  ;;  %v2551_v22 = vpop.xlane.xlu1 %2550 }
 0x5ad   : > { %v2786_v4 = vadd.f32 %v2785_v44, %v2696_v26  ;;  %3819 = vrcp.f32 %v2551_v22 }
 0x5ae   : > { %v2787_v30 = vpop.f32.mrf.mxu0 }
 0x5af   : > { %v2826_v11 = vmul.f32 %v3814_v54, %v2786_v4 }
 0x5b1   : > { %2859 = vst.msk [vmem:[%s5343_s23 + $0xd0] sm:$0xff] %vm2832_vm0, %v2826_v11 }
 0x5b3   : > { %v3820_v53 = vpop.eup %3819 }
 0x5b4   : > { %v2698_v6 = vpop.f32.mrf.mxu3  ;;  %v2554_v46 = vpop.xlane.xlu2 %2553 }
 0x5b5   : > { %v2788_v5 = vadd.f32 %v2787_v30, %v2698_v6  ;;  %3821 = vrcp.f32 %v2554_v46 }
 0x5b6   : > { %v2790_v20 = vpop.f32.mrf.mxu0 }
 0x5b7   : > { %v2827_v37 = vmul.f32 %v3816_v2, %v2788_v5 }
 0x5b9   : > { %2860 = vst.msk [vmem:[%s5343_s23 + $0xd8] sm:$0xff] %vm2832_vm0, %v2827_v37 }
 0x5bb   : > { %v3822_v51 = vpop.eup %3821 }
 0x5bc   : > { %v2701_v9 = vpop.f32.mrf.mxu3 }
 0x5bd   : > { %v2791_v21 = vadd.f32 %v2790_v20, %v2701_v9  ;;  %v2557_v19 = vpop.xlane.xlu0 %2556 }
 0x5be   : > { %v2792_v40 = vpop.f32.mrf.mxu0  ;;  %3823 = vrcp.f32 %v2557_v19 }
 0x5bf   : > { %v2828_v36 = vmul.f32 %v3818_v8, %v2791_v21 }
 0x5c1   : > { %2861 = vst.msk [vmem:[%s5343_s23 + $0xe0] sm:$0xff] %vm2832_vm0, %v2828_v36 }
 0x5c4   : > { %v2703_v58 = vpop.f32.mrf.mxu3  ;;  %v3824_v10 = vpop.eup %3823 }
 0x5c5   : > { %v2793_v61 = vadd.f32 %v2792_v40, %v2703_v58 }
 0x5c7   : > { %v2829_v57 = vmul.f32 %v3820_v53, %v2793_v61  ;;  %v2795_v45 = vpop.f32.mrf.mxu0 }
 0x5c9   : > { %2862 = vst.msk [vmem:[%s5343_s23 + $0xe8] sm:$0xff] %vm2832_vm0, %v2829_v57 }
 0x5cc   : > { %v2706_v31 = vpop.f32.mrf.mxu3 }
 0x5cd   : > { %v2796_v63 = vadd.f32 %v2795_v45, %v2706_v31 }
 0x5cf   : > { %v2830_v34 = vmul.f32 %v3822_v51, %v2796_v63  ;;  %v2797_v39 = vpop.f32.mrf.mxu0 }
 0x5d1   : > { %2863 = vst.msk [vmem:[%s5343_s23 + $0xf0] sm:$0xff] %vm2832_vm0, %v2830_v34 }
 0x5d4   : > { %v2708_v12 = vpop.f32.mrf.mxu3 }
 0x5d5   : > { %v2798_v56 = vadd.f32 %v2797_v39, %v2708_v12 }
 0x5d7   : > { %v2831_v23 = vmul.f32 %v3824_v10, %v2798_v56 }
 0x5d9   : > { %2864 = vst.msk [vmem:[%s5343_s23 + $0xf8] sm:$0xff] %vm2832_vm0, %v2831_v23 }
 0x5da PF: > { %p13_p4 = scmp.ge.s32.totalorder %s3986_s21, 4   ;;  %s5785_s9 = smov %s3915_s10 }
 0x5db   : > { %s5786_s10 = smov %s3919_s11  ;;  %s5787_s11 = smov %s3999_s26 }
 0x5dc   : > { %s5788_s12 = smov %s3986_s21  ;;  %15 = sbr.rel (!%p13_p4) target bundleno = 4 (0x4), region = 72 }
 0x5e1   :  { %2886 = vsyncpa [#allocation3], 1 }
 0x5e2   :  { %2888 = vsyncpa [#allocation3 + $0x1], 1 }
 0x5e3   :  { %2889 = vsyncpa [#allocation5], 1 }

</bundles_post_ra>
